<compile_context>
chip_gen: v7x
topology: tpu7x:2x2x1
jax: 0.10.0
libtpu: 0.0.40
codegen_flags: <defaults>
</compile_context>

<pallas_src>
import jax
import jax.numpy as jnp
import numpy as np
from jax import lax
from jax.experimental import pallas as pl
from jax.experimental.pallas import tpu as pltpu


def make_disc_classifier_kernel(H, W, K, batch_tile):
    assert batch_tile % 8 == 0, batch_tile
    HW = H * W
    G = batch_tile // 8          # groups of 8 batch elements = one dense output sublane tile

    def kernel(img_ref, bias_ref, w1_ref, w2_ref, out_ref):
        # img_ref  : (bt, enc, H*W)  compute_dtype  NCHW slab, spatial flattened into lanes
        # bias_ref : (bt, enc, 1)    f32            (sent @ W1_sent^T)*bn_scale + bn_shift
        # w1_ref   : (enc, enc)      compute_dtype  bn_scale-folded image half of the 1x1 conv
        # w2_ref   : (K*K, enc)      compute_dtype  final conv weight, (tap, in_channel)
        # out_ref  : (G, 8, H*W)     f32            lane- and sublane-dense output slab

        def one_group(g, carry):
            out_g = out_ref.at[g]                      # (8, HW) ref view, dense sublane tile
            for j in range(8):
                n = g * 8 + j
                # 1x1 conv (+ folded BN scale) on the MXU; N = H*W keeps lanes full.
                h = jnp.dot(w1_ref[...], img_ref[n],
                            preferred_element_type=jnp.float32)
                h = h + bias_ref[n]                    # (enc, 1) lane-broadcast
                h = jnp.where(h > 0, h, 0.2 * h)       # LeakyReLU(0.2)

                # KxK conv channel contraction on the MXU: (K*K, enc) @ (enc, H*W).
                u = jnp.dot(w2_ref[...], h.astype(w2_ref.dtype),
                            preferred_element_type=jnp.float32)

                # Tap reduction: out[p] = sum_t u[t, p + di*W + dj] for every valid
                # output position p.  Wrap-safe XLU lane rotations (no pad/concat copy);
                # wrapped lanes only reach rows >= HO / cols >= WO, which the wrapper
                # slice discards.  K per-di partials + tree sum keep the add chain short.
                partials = []
                for di in range(K):
                    part = None
                    for dj in range(K):
                        t = di * K + dj
                        s = di * W + dj
                        row = u[t:t + 1, :]
                        if s:
                            row = pltpu.roll(row, (HW - s) % HW, axis=1)
                        part = row if part is None else part + row
                    partials.append(part)
                while len(partials) > 1:
                    nxt = [partials[i] + partials[i + 1]
                           for i in range(0, len(partials) - 1, 2)]
                    if len(partials) % 2:
                        nxt.append(partials[-1])
                    partials = nxt

                out_g[j:j + 1, :] = partials[0]
            return carry

        if G == 1:
            one_group(0, 0)                            # single group: fully static
        else:
            lax.fori_loop(0, G, one_group, 0)          # bounds vreg live ranges

    return kernel


def _pick_batch_tile(Bp, enc_dim, HW, itemsize):
    """Multiple-of-8 batch tile targeting a few-hundred-KiB img block per grid step
    while keeping >= 2 grid steps (megacore sharding on v7x) when possible."""
    per_elem = max(1, enc_dim * HW * itemsize)
    target = max(8, (512 * 1024) // per_elem)
    bt = 8
    for cand in range(16, Bp // 2 + 1, 8):             # keep grid length >= 2
        if Bp % cand == 0 and cand <= target:
            bt = cand
    return min(bt, Bp)


def disc_classifier_forward(sent_code, img_code, params, kernel_size, *,
                            batch_tile=None, compute_dtype=jnp.bfloat16):
    """sent_code: (B, emb) f32; img_code: (B, enc, H, W) f32 (NCHW, like torch)."""
    B, emb_dim = sent_code.shape
    _, enc_dim, H, W = img_code.shape
    K = kernel_size
    HO, WO = H - K + 1, W - K + 1
    HW = H * W

    w1 = params["w1"]                       # (enc, enc+emb): Conv2d(inp->enc, 1), no bias
    w2 = params["w2"]                       # (1, enc, K, K): Conv2d(enc->1, K)
    b2 = params["b2"]                       # ()
    eps = 1e-5
    bn_scale = params["gamma"] * lax.rsqrt(params["rvar"] + eps)
    bn_shift = params["beta"] - params["rmean"] * bn_scale

    # Fold BN scale into the image half of the 1x1 conv; hoist the sentence half
    # (a degenerate M=1 matmul) and the BN shift into a per-batch per-channel bias.
    w1_eff = (bn_scale[:, None] * w1[:, :enc_dim]).astype(compute_dtype)      # (enc, enc)
    bias = sent_code @ w1[:, enc_dim:].T                                      # (B, enc)
    bias = (bias * bn_scale[None, :] + bn_shift[None, :])[:, :, None]         # (B, enc, 1)
    bias = bias.astype(jnp.float32)

    w2_mat = jnp.transpose(w2[0], (1, 2, 0)).reshape(K * K, enc_dim)          # (tap, chan)
    w2_mat = w2_mat.astype(compute_dtype)

    # NCHW consumed directly: pure reshape, no HBM transpose of img_code.
    img_flat = img_code.reshape(B, enc_dim, HW).astype(compute_dtype)

    # Pad batch to a multiple of 8 so the output slab is sublane-dense; padded rows
    # produce garbage that is sliced away below.
    Bp = ((B + 7) // 8) * 8
    if Bp != B:
        pad = Bp - B
        img_flat = jnp.concatenate(
            [img_flat, jnp.zeros((pad, enc_dim, HW), img_flat.dtype)], axis=0)
        bias = jnp.concatenate(
            [bias, jnp.zeros((pad, enc_dim, 1), bias.dtype)], axis=0)

    if batch_tile is None:
        itemsize = jax.dtypes.canonicalize_dtype(compute_dtype).itemsize
        batch_tile = _pick_batch_tile(Bp, enc_dim, HW, itemsize)
    assert batch_tile % 8 == 0 and Bp % batch_tile == 0, (B, Bp, batch_tile)
    G = batch_tile // 8

    kern = make_disc_classifier_kernel(H, W, K, batch_tile)
    out = pl.pallas_call(
        kern,
        out_shape=jax.ShapeDtypeStruct((Bp // 8, 8, HW), jnp.float32),
        grid=(Bp // batch_tile,),
        in_specs=[
            pl.BlockSpec((batch_tile, enc_dim, HW), lambda b: (b, 0, 0)),
            pl.BlockSpec((batch_tile, enc_dim, 1), lambda b: (b, 0, 0)),
            pl.BlockSpec((enc_dim, enc_dim), lambda b: (0, 0)),
            pl.BlockSpec((K * K, enc_dim), lambda b: (0, 0)),
        ],
        out_specs=pl.BlockSpec((G, 8, HW), lambda b: (b, 0, 0)),
        compiler_params=pltpu.CompilerParams(
            dimension_semantics=("parallel",)),
        # NOTE: per-step VMEM here is well under every chip's scoped limit; when
        # scaling to enc~512, H=W=64, cap batch_tile / add a spatial grid axis and
        # set vmem_limit_bytes (v7x: 64 MiB physical, 32 MiB default scoped).
    )(img_flat, bias, w1_eff, w2_mat)

    # Keep only the valid KxK-conv window (also discards wrapped roll lanes and any
    # batch padding); fold the final-conv bias here.  torch: output.view(-1, 1).
    out = out.reshape(Bp, HW)[:B].reshape(B, H, W)[:, :HO, :WO] + b2
    return out.reshape(-1, 1)


def reference_forward(sent_code, img_code, params, kernel_size):
    """Pure-JAX NCHW reference matching the PyTorch module (eval-mode BN)."""
    B, emb_dim = sent_code.shape
    _, enc_dim, H, W = img_code.shape
    w1, w2, b2 = params["w1"], params["w2"], params["b2"]
    gamma, beta = params["gamma"], params["beta"]
    rmean, rvar = params["rmean"], params["rvar"]
    eps = 1e-5

    sent_b = jnp.broadcast_to(sent_code[:, :, None, None], (B, emb_dim, H, W))
    comp = jnp.concatenate([img_code, sent_b], axis=1)                  # (B, enc+emb, H, W)
    h = jnp.einsum("bihw,oi->bohw", comp, w1)                           # 1x1 conv, no bias
    h = (h - rmean[None, :, None, None]) / jnp.sqrt(rvar[None, :, None, None] + eps)
    h = h * gamma[None, :, None, None] + beta[None, :, None, None]
    h = jnp.where(h > 0, h, 0.2 * h)
    out = lax.conv_general_dilated(
        h, w2, window_strides=(1, 1), padding="VALID",
        dimension_numbers=("NCHW", "OIHW", "NCHW")) + b2
    return out.reshape(-1, 1)


if __name__ == "__main__":
    # Small deterministic configuration.  B=16 so the default batch_tile=8 yields
    # a 2-step parallel grid (both v7x TensorCores) with dense 8-row output slabs.
    B, enc_dim, emb_dim, H, W, K = 16, 16, 16, 16, 16, 4
    inp_dim = enc_dim + emb_dim
    HO, WO = H - K + 1, W - K + 1

    key = jax.random.PRNGKey(0)
    ks = jax.random.split(key, 8)

    # Inputs (torch-convention shapes).
    sent_code = jax.random.normal(ks[0], (B, emb_dim), jnp.float32)
    img_code = jax.random.normal(ks[1], (B, enc_dim, H, W), jnp.float32)

    # Deterministic parameters (shapes dictated by the module's __init__).
    w1 = 0.1 * jax.random.normal(ks[2], (enc_dim, inp_dim), jnp.float32)   # Conv2d(inp->enc,1)
    gamma = 1.0 + 0.1 * jax.random.normal(ks[3], (enc_dim,), jnp.float32)  # BatchNorm2d affine
    beta = 0.1 * jax.random.normal(ks[4], (enc_dim,), jnp.float32)
    rmean = 0.1 * jax.random.normal(ks[5], (enc_dim,), jnp.float32)
    rvar = jnp.abs(jax.random.normal(ks[6], (enc_dim,), jnp.float32)) + 0.5
    w2 = 0.1 * jax.random.normal(ks[7], (1, enc_dim, K, K), jnp.float32)   # Conv2d(enc->1, K)
    b2 = jnp.float32(0.05)

    params = {"w1": w1, "w2": w2, "b2": b2, "gamma": gamma, "beta": beta,
              "rmean": rmean, "rvar": rvar}

    ref = jax.block_until_ready(reference_forward(sent_code, img_code, params, K))

    # f32 path: tight numerical check of the kernel math.
    out_f32 = jax.block_until_ready(
        disc_classifier_forward(sent_code, img_code, params, K,
                                compute_dtype=jnp.float32))
    assert out_f32.shape == (B * HO * WO, 1), out_f32.shape
    np.testing.assert_allclose(np.asarray(out_f32), np.asarray(ref),
                               rtol=1e-4, atol=1e-4)

    # Default bf16 path (halves the HBM read that bounds this kernel); tolerance
    # loosened for bf16 input/weight rounding, accumulation stays f32.
    out_bf16 = jax.block_until_ready(
        disc_classifier_forward(sent_code, img_code, params, K))
    assert out_bf16.shape == (B * HO * WO, 1), out_bf16.shape
    np.testing.assert_allclose(np.asarray(out_bf16), np.asarray(ref),
                               rtol=5e-2, atol=1e-1)

    print("KERNEL_OK")
</pallas_src>

<mosaic_0001>
module attributes {stable_mosaic.version = 11 : i64} {
  func.func @kernel(%arg0: i32, %arg1: memref<8x16x256xf32, #tpu.memory_space<vmem>>, %arg2: memref<8x16x1xf32, #tpu.memory_space<vmem>>, %arg3: memref<16x16xf32, #tpu.memory_space<vmem>>, %arg4: memref<16x16xf32, #tpu.memory_space<vmem>>, %arg5: memref<1x8x256xf32, #tpu.memory_space<vmem>>) attributes {dimension_semantics = [#tpu.dimension_semantics<parallel>], iteration_bounds = array<i64: 2>, scalar_prefetch = 0 : i64, scratch_operands = 0 : i64, tpu.core_type = #tpu.core_type<tc>, window_params = [{transform_indices = @transform_0, window_bounds = array<i64: 8, 16, 256>}, {transform_indices = @transform_1, window_bounds = array<i64: 8, 16, 1>}, {pipeline_mode = #tpu.pipeline_mode<synchronous>, transform_indices = @transform_2, window_bounds = array<i64: 16, 16>}, {pipeline_mode = #tpu.pipeline_mode<synchronous>, transform_indices = @transform_3, window_bounds = array<i64: 16, 16>}, {transform_indices = @transform_4, window_bounds = array<i64: 1, 8, 256>}]} {
    %c0 = arith.constant 0 : index
    %c0_0 = arith.constant 0 : index
    %0 = vector.load %arg3[%c0, %c0_0] : memref<16x16xf32, #tpu.memory_space<vmem>>, vector<16x16xf32>
    %c0_1 = arith.constant 0 : index
    %c0_2 = arith.constant 0 : index
    %c0_3 = arith.constant 0 : index
    %1 = vector.load %arg1[%c0_1, %c0_2, %c0_3] : memref<8x16x256xf32, #tpu.memory_space<vmem>>, vector<1x16x256xf32>
    %2 = vector.shape_cast %1 : vector<1x16x256xf32> to vector<16x256xf32>
    %cst = arith.constant dense<0.000000e+00> : vector<16x256xf32>
    %3 = tpu.matmul %0, %2, %cst {dimension_numbers = #tpu.dot_dimension_numbers<[1], [0], [0], [1], [0, 0, 1, 1], [], []>} : vector<16x16xf32>, vector<16x256xf32>, vector<16x256xf32> -> vector<16x256xf32>
    %c0_4 = arith.constant 0 : index
    %c0_5 = arith.constant 0 : index
    %c0_6 = arith.constant 0 : index
    %4 = vector.load %arg2[%c0_4, %c0_5, %c0_6] : memref<8x16x1xf32, #tpu.memory_space<vmem>>, vector<1x16x1xf32>
    %5 = vector.shape_cast %4 : vector<1x16x1xf32> to vector<16x1xf32>
    %6 = vector.broadcast %5 : vector<16x1xf32> to vector<16x256xf32>
    %7 = arith.addf %3, %6 : vector<16x256xf32>
    %cst_7 = arith.constant 0.000000e+00 : f32
    %8 = vector.broadcast %cst_7 : f32 to vector<16x256xf32>
    %9 = arith.cmpf ogt, %7, %8 : vector<16x256xf32>
    %cst_8 = arith.constant 2.000000e-01 : f32
    %10 = vector.broadcast %cst_8 : f32 to vector<16x256xf32>
    %11 = arith.mulf %10, %7 : vector<16x256xf32>
    %12 = arith.select %9, %7, %11 : vector<16x256xi1>, vector<16x256xf32>
    %c0_9 = arith.constant 0 : index
    %c0_10 = arith.constant 0 : index
    %13 = vector.load %arg4[%c0_9, %c0_10] : memref<16x16xf32, #tpu.memory_space<vmem>>, vector<16x16xf32>
    %cst_11 = arith.constant dense<0.000000e+00> : vector<16x256xf32>
    %14 = tpu.matmul %13, %12, %cst_11 {dimension_numbers = #tpu.dot_dimension_numbers<[1], [0], [0], [1], [0, 0, 1, 1], [], []>} : vector<16x16xf32>, vector<16x256xf32>, vector<16x256xf32> -> vector<16x256xf32>
    %15 = vector.extract_strided_slice %14 {offsets = [0, 0], sizes = [1, 256], strides = [1, 1]} : vector<16x256xf32> to vector<1x256xf32>
    %16 = vector.extract_strided_slice %14 {offsets = [1, 0], sizes = [1, 256], strides = [1, 1]} : vector<16x256xf32> to vector<1x256xf32>
    %c255_i32 = arith.constant 255 : i32
    %17 = tpu.dynamic_rotate %16 by %c255_i32 dim 1 : vector<1x256xf32>, i32 -> vector<1x256xf32>
    %18 = arith.addf %15, %17 : vector<1x256xf32>
    %19 = vector.extract_strided_slice %14 {offsets = [2, 0], sizes = [1, 256], strides = [1, 1]} : vector<16x256xf32> to vector<1x256xf32>
    %c254_i32 = arith.constant 254 : i32
    %20 = tpu.dynamic_rotate %19 by %c254_i32 dim 1 : vector<1x256xf32>, i32 -> vector<1x256xf32>
    %21 = arith.addf %18, %20 : vector<1x256xf32>
    %22 = vector.extract_strided_slice %14 {offsets = [3, 0], sizes = [1, 256], strides = [1, 1]} : vector<16x256xf32> to vector<1x256xf32>
    %c253_i32 = arith.constant 253 : i32
    %23 = tpu.dynamic_rotate %22 by %c253_i32 dim 1 : vector<1x256xf32>, i32 -> vector<1x256xf32>
    %24 = arith.addf %21, %23 : vector<1x256xf32>
    %25 = vector.extract_strided_slice %14 {offsets = [4, 0], sizes = [1, 256], strides = [1, 1]} : vector<16x256xf32> to vector<1x256xf32>
    %c240_i32 = arith.constant 240 : i32
    %26 = tpu.dynamic_rotate %25 by %c240_i32 dim 1 : vector<1x256xf32>, i32 -> vector<1x256xf32>
    %27 = vector.extract_strided_slice %14 {offsets = [5, 0], sizes = [1, 256], strides = [1, 1]} : vector<16x256xf32> to vector<1x256xf32>
    %c239_i32 = arith.constant 239 : i32
    %28 = tpu.dynamic_rotate %27 by %c239_i32 dim 1 : vector<1x256xf32>, i32 -> vector<1x256xf32>
    %29 = arith.addf %26, %28 : vector<1x256xf32>
    %30 = vector.extract_strided_slice %14 {offsets = [6, 0], sizes = [1, 256], strides = [1, 1]} : vector<16x256xf32> to vector<1x256xf32>
    %c238_i32 = arith.constant 238 : i32
    %31 = tpu.dynamic_rotate %30 by %c238_i32 dim 1 : vector<1x256xf32>, i32 -> vector<1x256xf32>
    %32 = arith.addf %29, %31 : vector<1x256xf32>
    %33 = vector.extract_strided_slice %14 {offsets = [7, 0], sizes = [1, 256], strides = [1, 1]} : vector<16x256xf32> to vector<1x256xf32>
    %c237_i32 = arith.constant 237 : i32
    %34 = tpu.dynamic_rotate %33 by %c237_i32 dim 1 : vector<1x256xf32>, i32 -> vector<1x256xf32>
    %35 = arith.addf %32, %34 : vector<1x256xf32>
    %36 = vector.extract_strided_slice %14 {offsets = [8, 0], sizes = [1, 256], strides = [1, 1]} : vector<16x256xf32> to vector<1x256xf32>
    %c224_i32 = arith.constant 224 : i32
    %37 = tpu.dynamic_rotate %36 by %c224_i32 dim 1 : vector<1x256xf32>, i32 -> vector<1x256xf32>
    %38 = vector.extract_strided_slice %14 {offsets = [9, 0], sizes = [1, 256], strides = [1, 1]} : vector<16x256xf32> to vector<1x256xf32>
    %c223_i32 = arith.constant 223 : i32
    %39 = tpu.dynamic_rotate %38 by %c223_i32 dim 1 : vector<1x256xf32>, i32 -> vector<1x256xf32>
    %40 = arith.addf %37, %39 : vector<1x256xf32>
    %41 = vector.extract_strided_slice %14 {offsets = [10, 0], sizes = [1, 256], strides = [1, 1]} : vector<16x256xf32> to vector<1x256xf32>
    %c222_i32 = arith.constant 222 : i32
    %42 = tpu.dynamic_rotate %41 by %c222_i32 dim 1 : vector<1x256xf32>, i32 -> vector<1x256xf32>
    %43 = arith.addf %40, %42 : vector<1x256xf32>
    %44 = vector.extract_strided_slice %14 {offsets = [11, 0], sizes = [1, 256], strides = [1, 1]} : vector<16x256xf32> to vector<1x256xf32>
    %c221_i32 = arith.constant 221 : i32
    %45 = tpu.dynamic_rotate %44 by %c221_i32 dim 1 : vector<1x256xf32>, i32 -> vector<1x256xf32>
    %46 = arith.addf %43, %45 : vector<1x256xf32>
    %47 = vector.extract_strided_slice %14 {offsets = [12, 0], sizes = [1, 256], strides = [1, 1]} : vector<16x256xf32> to vector<1x256xf32>
    %c208_i32 = arith.constant 208 : i32
    %48 = tpu.dynamic_rotate %47 by %c208_i32 dim 1 : vector<1x256xf32>, i32 -> vector<1x256xf32>
    %49 = vector.extract_strided_slice %14 {offsets = [13, 0], sizes = [1, 256], strides = [1, 1]} : vector<16x256xf32> to vector<1x256xf32>
    %c207_i32 = arith.constant 207 : i32
    %50 = tpu.dynamic_rotate %49 by %c207_i32 dim 1 : vector<1x256xf32>, i32 -> vector<1x256xf32>
    %51 = arith.addf %48, %50 : vector<1x256xf32>
    %52 = vector.extract_strided_slice %14 {offsets = [14, 0], sizes = [1, 256], strides = [1, 1]} : vector<16x256xf32> to vector<1x256xf32>
    %c206_i32 = arith.constant 206 : i32
    %53 = tpu.dynamic_rotate %52 by %c206_i32 dim 1 : vector<1x256xf32>, i32 -> vector<1x256xf32>
    %54 = arith.addf %51, %53 : vector<1x256xf32>
    %55 = vector.extract_strided_slice %14 {offsets = [15, 0], sizes = [1, 256], strides = [1, 1]} : vector<16x256xf32> to vector<1x256xf32>
    %c205_i32 = arith.constant 205 : i32
    %56 = tpu.dynamic_rotate %55 by %c205_i32 dim 1 : vector<1x256xf32>, i32 -> vector<1x256xf32>
    %57 = arith.addf %54, %56 : vector<1x256xf32>
    %58 = arith.addf %24, %35 : vector<1x256xf32>
    %59 = arith.addf %46, %57 : vector<1x256xf32>
    %60 = arith.addf %58, %59 : vector<1x256xf32>
    %c0_i32 = arith.constant 0 : i32
    %c0_i32_12 = arith.constant 0 : i32
    %c0_i32_13 = arith.constant 0 : i32
    %61 = tpu.memref_slice %arg5[%c0_i32, %c0_i32_12, %c0_i32_13] : memref<1x8x256xf32, #tpu.memory_space<vmem>> -> memref<1x8x256xf32, #tpu.memory_space<vmem>>
    %62 = tpu.memref_squeeze %61 : memref<1x8x256xf32, #tpu.memory_space<vmem>> -> memref<8x256xf32, #tpu.memory_space<vmem>>
    %c0_14 = arith.constant 0 : index
    %c0_15 = arith.constant 0 : index
    %63 = vector.load %62[%c0_14, %c0_15] : memref<8x256xf32, #tpu.memory_space<vmem>>, vector<1x256xf32>
    tpu.vector_store %62[%c0_14, %c0_15], %60 {strides = array<i32>} : memref<8x256xf32, #tpu.memory_space<vmem>>, vector<1x256xf32>,
    %c0_16 = arith.constant 0 : index
    %c0_17 = arith.constant 0 : index
    %64 = vector.load %arg3[%c0_16, %c0_17] : memref<16x16xf32, #tpu.memory_space<vmem>>, vector<16x16xf32>
    %c1 = arith.constant 1 : index
    %c0_18 = arith.constant 0 : index
    %c0_19 = arith.constant 0 : index
    %65 = vector.load %arg1[%c1, %c0_18, %c0_19] : memref<8x16x256xf32, #tpu.memory_space<vmem>>, vector<1x16x256xf32>
    %66 = vector.shape_cast %65 : vector<1x16x256xf32> to vector<16x256xf32>
    %cst_20 = arith.constant dense<0.000000e+00> : vector<16x256xf32>
    %67 = tpu.matmul %64, %66, %cst_20 {dimension_numbers = #tpu.dot_dimension_numbers<[1], [0], [0], [1], [0, 0, 1, 1], [], []>} : vector<16x16xf32>, vector<16x256xf32>, vector<16x256xf32> -> vector<16x256xf32>
    %c1_21 = arith.constant 1 : index
    %c0_22 = arith.constant 0 : index
    %c0_23 = arith.constant 0 : index
    %68 = vector.load %arg2[%c1_21, %c0_22, %c0_23] : memref<8x16x1xf32, #tpu.memory_space<vmem>>, vector<1x16x1xf32>
    %69 = vector.shape_cast %68 : vector<1x16x1xf32> to vector<16x1xf32>
    %70 = vector.broadcast %69 : vector<16x1xf32> to vector<16x256xf32>
    %71 = arith.addf %67, %70 : vector<16x256xf32>
    %cst_24 = arith.constant 0.000000e+00 : f32
    %72 = vector.broadcast %cst_24 : f32 to vector<16x256xf32>
    %73 = arith.cmpf ogt, %71, %72 : vector<16x256xf32>
    %cst_25 = arith.constant 2.000000e-01 : f32
    %74 = vector.broadcast %cst_25 : f32 to vector<16x256xf32>
    %75 = arith.mulf %74, %71 : vector<16x256xf32>
    %76 = arith.select %73, %71, %75 : vector<16x256xi1>, vector<16x256xf32>
    %c0_26 = arith.constant 0 : index
    %c0_27 = arith.constant 0 : index
    %77 = vector.load %arg4[%c0_26, %c0_27] : memref<16x16xf32, #tpu.memory_space<vmem>>, vector<16x16xf32>
    %cst_28 = arith.constant dense<0.000000e+00> : vector<16x256xf32>
    %78 = tpu.matmul %77, %76, %cst_28 {dimension_numbers = #tpu.dot_dimension_numbers<[1], [0], [0], [1], [0, 0, 1, 1], [], []>} : vector<16x16xf32>, vector<16x256xf32>, vector<16x256xf32> -> vector<16x256xf32>
    %79 = vector.extract_strided_slice %78 {offsets = [0, 0], sizes = [1, 256], strides = [1, 1]} : vector<16x256xf32> to vector<1x256xf32>
    %80 = vector.extract_strided_slice %78 {offsets = [1, 0], sizes = [1, 256], strides = [1, 1]} : vector<16x256xf32> to vector<1x256xf32>
    %c255_i32_29 = arith.constant 255 : i32
    %81 = tpu.dynamic_rotate %80 by %c255_i32_29 dim 1 : vector<1x256xf32>, i32 -> vector<1x256xf32>
    %82 = arith.addf %79, %81 : vector<1x256xf32>
    %83 = vector.extract_strided_slice %78 {offsets = [2, 0], sizes = [1, 256], strides = [1, 1]} : vector<16x256xf32> to vector<1x256xf32>
    %c254_i32_30 = arith.constant 254 : i32
    %84 = tpu.dynamic_rotate %83 by %c254_i32_30 dim 1 : vector<1x256xf32>, i32 -> vector<1x256xf32>
    %85 = arith.addf %82, %84 : vector<1x256xf32>
    %86 = vector.extract_strided_slice %78 {offsets = [3, 0], sizes = [1, 256], strides = [1, 1]} : vector<16x256xf32> to vector<1x256xf32>
    %c253_i32_31 = arith.constant 253 : i32
    %87 = tpu.dynamic_rotate %86 by %c253_i32_31 dim 1 : vector<1x256xf32>, i32 -> vector<1x256xf32>
    %88 = arith.addf %85, %87 : vector<1x256xf32>
    %89 = vector.extract_strided_slice %78 {offsets = [4, 0], sizes = [1, 256], strides = [1, 1]} : vector<16x256xf32> to vector<1x256xf32>
    %c240_i32_32 = arith.constant 240 : i32
    %90 = tpu.dynamic_rotate %89 by %c240_i32_32 dim 1 : vector<1x256xf32>, i32 -> vector<1x256xf32>
    %91 = vector.extract_strided_slice %78 {offsets = [5, 0], sizes = [1, 256], strides = [1, 1]} : vector<16x256xf32> to vector<1x256xf32>
    %c239_i32_33 = arith.constant 239 : i32
    %92 = tpu.dynamic_rotate %91 by %c239_i32_33 dim 1 : vector<1x256xf32>, i32 -> vector<1x256xf32>
    %93 = arith.addf %90, %92 : vector<1x256xf32>
    %94 = vector.extract_strided_slice %78 {offsets = [6, 0], sizes = [1, 256], strides = [1, 1]} : vector<16x256xf32> to vector<1x256xf32>
    %c238_i32_34 = arith.constant 238 : i32
    %95 = tpu.dynamic_rotate %94 by %c238_i32_34 dim 1 : vector<1x256xf32>, i32 -> vector<1x256xf32>
    %96 = arith.addf %93, %95 : vector<1x256xf32>
    %97 = vector.extract_strided_slice %78 {offsets = [7, 0], sizes = [1, 256], strides = [1, 1]} : vector<16x256xf32> to vector<1x256xf32>
    %c237_i32_35 = arith.constant 237 : i32
    %98 = tpu.dynamic_rotate %97 by %c237_i32_35 dim 1 : vector<1x256xf32>, i32 -> vector<1x256xf32>
    %99 = arith.addf %96, %98 : vector<1x256xf32>
    %100 = vector.extract_strided_slice %78 {offsets = [8, 0], sizes = [1, 256], strides = [1, 1]} : vector<16x256xf32> to vector<1x256xf32>
    %c224_i32_36 = arith.constant 224 : i32
    %101 = tpu.dynamic_rotate %100 by %c224_i32_36 dim 1 : vector<1x256xf32>, i32 -> vector<1x256xf32>
    %102 = vector.extract_strided_slice %78 {offsets = [9, 0], sizes = [1, 256], strides = [1, 1]} : vector<16x256xf32> to vector<1x256xf32>
    %c223_i32_37 = arith.constant 223 : i32
    %103 = tpu.dynamic_rotate %102 by %c223_i32_37 dim 1 : vector<1x256xf32>, i32 -> vector<1x256xf32>
    %104 = arith.addf %101, %103 : vector<1x256xf32>
    %105 = vector.extract_strided_slice %78 {offsets = [10, 0], sizes = [1, 256], strides = [1, 1]} : vector<16x256xf32> to vector<1x256xf32>
    %c222_i32_38 = arith.constant 222 : i32
    %106 = tpu.dynamic_rotate %105 by %c222_i32_38 dim 1 : vector<1x256xf32>, i32 -> vector<1x256xf32>
    %107 = arith.addf %104, %106 : vector<1x256xf32>
    %108 = vector.extract_strided_slice %78 {offsets = [11, 0], sizes = [1, 256], strides = [1, 1]} : vector<16x256xf32> to vector<1x256xf32>
    %c221_i32_39 = arith.constant 221 : i32
    %109 = tpu.dynamic_rotate %108 by %c221_i32_39 dim 1 : vector<1x256xf32>, i32 -> vector<1x256xf32>
    %110 = arith.addf %107, %109 : vector<1x256xf32>
    %111 = vector.extract_strided_slice %78 {offsets = [12, 0], sizes = [1, 256], strides = [1, 1]} : vector<16x256xf32> to vector<1x256xf32>
    %c208_i32_40 = arith.constant 208 : i32
    %112 = tpu.dynamic_rotate %111 by %c208_i32_40 dim 1 : vector<1x256xf32>, i32 -> vector<1x256xf32>
    %113 = vector.extract_strided_slice %78 {offsets = [13, 0], sizes = [1, 256], strides = [1, 1]} : vector<16x256xf32> to vector<1x256xf32>
    %c207_i32_41 = arith.constant 207 : i32
    %114 = tpu.dynamic_rotate %113 by %c207_i32_41 dim 1 : vector<1x256xf32>, i32 -> vector<1x256xf32>
    %115 = arith.addf %112, %114 : vector<1x256xf32>
    %116 = vector.extract_strided_slice %78 {offsets = [14, 0], sizes = [1, 256], strides = [1, 1]} : vector<16x256xf32> to vector<1x256xf32>
    %c206_i32_42 = arith.constant 206 : i32
    %117 = tpu.dynamic_rotate %116 by %c206_i32_42 dim 1 : vector<1x256xf32>, i32 -> vector<1x256xf32>
    %118 = arith.addf %115, %117 : vector<1x256xf32>
    %119 = vector.extract_strided_slice %78 {offsets = [15, 0], sizes = [1, 256], strides = [1, 1]} : vector<16x256xf32> to vector<1x256xf32>
    %c205_i32_43 = arith.constant 205 : i32
    %120 = tpu.dynamic_rotate %119 by %c205_i32_43 dim 1 : vector<1x256xf32>, i32 -> vector<1x256xf32>
    %121 = arith.addf %118, %120 : vector<1x256xf32>
    %122 = arith.addf %88, %99 : vector<1x256xf32>
    %123 = arith.addf %110, %121 : vector<1x256xf32>
    %124 = arith.addf %122, %123 : vector<1x256xf32>
    %c0_i32_44 = arith.constant 0 : i32
    %c0_i32_45 = arith.constant 0 : i32
    %c0_i32_46 = arith.constant 0 : i32
    %125 = tpu.memref_slice %arg5[%c0_i32_44, %c0_i32_45, %c0_i32_46] : memref<1x8x256xf32, #tpu.memory_space<vmem>> -> memref<1x8x256xf32, #tpu.memory_space<vmem>>
    %126 = tpu.memref_squeeze %125 : memref<1x8x256xf32, #tpu.memory_space<vmem>> -> memref<8x256xf32, #tpu.memory_space<vmem>>
    %c1_47 = arith.constant 1 : index
    %c0_48 = arith.constant 0 : index
    %127 = vector.load %126[%c1_47, %c0_48] : memref<8x256xf32, #tpu.memory_space<vmem>>, vector<1x256xf32>
    tpu.vector_store %126[%c1_47, %c0_48], %124 {strides = array<i32>} : memref<8x256xf32, #tpu.memory_space<vmem>>, vector<1x256xf32>,
    %c0_49 = arith.constant 0 : index
    %c0_50 = arith.constant 0 : index
    %128 = vector.load %arg3[%c0_49, %c0_50] : memref<16x16xf32, #tpu.memory_space<vmem>>, vector<16x16xf32>
    %c2 = arith.constant 2 : index
    %c0_51 = arith.constant 0 : index
    %c0_52 = arith.constant 0 : index
    %129 = vector.load %arg1[%c2, %c0_51, %c0_52] : memref<8x16x256xf32, #tpu.memory_space<vmem>>, vector<1x16x256xf32>
    %130 = vector.shape_cast %129 : vector<1x16x256xf32> to vector<16x256xf32>
    %cst_53 = arith.constant dense<0.000000e+00> : vector<16x256xf32>
    %131 = tpu.matmul %128, %130, %cst_53 {dimension_numbers = #tpu.dot_dimension_numbers<[1], [0], [0], [1], [0, 0, 1, 1], [], []>} : vector<16x16xf32>, vector<16x256xf32>, vector<16x256xf32> -> vector<16x256xf32>
    %c2_54 = arith.constant 2 : index
    %c0_55 = arith.constant 0 : index
    %c0_56 = arith.constant 0 : index
    %132 = vector.load %arg2[%c2_54, %c0_55, %c0_56] : memref<8x16x1xf32, #tpu.memory_space<vmem>>, vector<1x16x1xf32>
    %133 = vector.shape_cast %132 : vector<1x16x1xf32> to vector<16x1xf32>
    %134 = vector.broadcast %133 : vector<16x1xf32> to vector<16x256xf32>
    %135 = arith.addf %131, %134 : vector<16x256xf32>
    %cst_57 = arith.constant 0.000000e+00 : f32
    %136 = vector.broadcast %cst_57 : f32 to vector<16x256xf32>
    %137 = arith.cmpf ogt, %135, %136 : vector<16x256xf32>
    %cst_58 = arith.constant 2.000000e-01 : f32
    %138 = vector.broadcast %cst_58 : f32 to vector<16x256xf32>
    %139 = arith.mulf %138, %135 : vector<16x256xf32>
    %140 = arith.select %137, %135, %139 : vector<16x256xi1>, vector<16x256xf32>
    %c0_59 = arith.constant 0 : index
    %c0_60 = arith.constant 0 : index
    %141 = vector.load %arg4[%c0_59, %c0_60] : memref<16x16xf32, #tpu.memory_space<vmem>>, vector<16x16xf32>
    %cst_61 = arith.constant dense<0.000000e+00> : vector<16x256xf32>
    %142 = tpu.matmul %141, %140, %cst_61 {dimension_numbers = #tpu.dot_dimension_numbers<[1], [0], [0], [1], [0, 0, 1, 1], [], []>} : vector<16x16xf32>, vector<16x256xf32>, vector<16x256xf32> -> vector<16x256xf32>
    %143 = vector.extract_strided_slice %142 {offsets = [0, 0], sizes = [1, 256], strides = [1, 1]} : vector<16x256xf32> to vector<1x256xf32>
    %144 = vector.extract_strided_slice %142 {offsets = [1, 0], sizes = [1, 256], strides = [1, 1]} : vector<16x256xf32> to vector<1x256xf32>
    %c255_i32_62 = arith.constant 255 : i32
    %145 = tpu.dynamic_rotate %144 by %c255_i32_62 dim 1 : vector<1x256xf32>, i32 -> vector<1x256xf32>
    %146 = arith.addf %143, %145 : vector<1x256xf32>
    %147 = vector.extract_strided_slice %142 {offsets = [2, 0], sizes = [1, 256], strides = [1, 1]} : vector<16x256xf32> to vector<1x256xf32>
    %c254_i32_63 = arith.constant 254 : i32
    %148 = tpu.dynamic_rotate %147 by %c254_i32_63 dim 1 : vector<1x256xf32>, i32 -> vector<1x256xf32>
    %149 = arith.addf %146, %148 : vector<1x256xf32>
    %150 = vector.extract_strided_slice %142 {offsets = [3, 0], sizes = [1, 256], strides = [1, 1]} : vector<16x256xf32> to vector<1x256xf32>
    %c253_i32_64 = arith.constant 253 : i32
    %151 = tpu.dynamic_rotate %150 by %c253_i32_64 dim 1 : vector<1x256xf32>, i32 -> vector<1x256xf32>
    %152 = arith.addf %149, %151 : vector<1x256xf32>
    %153 = vector.extract_strided_slice %142 {offsets = [4, 0], sizes = [1, 256], strides = [1, 1]} : vector<16x256xf32> to vector<1x256xf32>
    %c240_i32_65 = arith.constant 240 : i32
    %154 = tpu.dynamic_rotate %153 by %c240_i32_65 dim 1 : vector<1x256xf32>, i32 -> vector<1x256xf32>
    %155 = vector.extract_strided_slice %142 {offsets = [5, 0], sizes = [1, 256], strides = [1, 1]} : vector<16x256xf32> to vector<1x256xf32>
    %c239_i32_66 = arith.constant 239 : i32
    %156 = tpu.dynamic_rotate %155 by %c239_i32_66 dim 1 : vector<1x256xf32>, i32 -> vector<1x256xf32>
    %157 = arith.addf %154, %156 : vector<1x256xf32>
    %158 = vector.extract_strided_slice %142 {offsets = [6, 0], sizes = [1, 256], strides = [1, 1]} : vector<16x256xf32> to vector<1x256xf32>
    %c238_i32_67 = arith.constant 238 : i32
    %159 = tpu.dynamic_rotate %158 by %c238_i32_67 dim 1 : vector<1x256xf32>, i32 -> vector<1x256xf32>
    %160 = arith.addf %157, %159 : vector<1x256xf32>
    %161 = vector.extract_strided_slice %142 {offsets = [7, 0], sizes = [1, 256], strides = [1, 1]} : vector<16x256xf32> to vector<1x256xf32>
    %c237_i32_68 = arith.constant 237 : i32
    %162 = tpu.dynamic_rotate %161 by %c237_i32_68 dim 1 : vector<1x256xf32>, i32 -> vector<1x256xf32>
    %163 = arith.addf %160, %162 : vector<1x256xf32>
    %164 = vector.extract_strided_slice %142 {offsets = [8, 0], sizes = [1, 256], strides = [1, 1]} : vector<16x256xf32> to vector<1x256xf32>
    %c224_i32_69 = arith.constant 224 : i32
    %165 = tpu.dynamic_rotate %164 by %c224_i32_69 dim 1 : vector<1x256xf32>, i32 -> vector<1x256xf32>
    %166 = vector.extract_strided_slice %142 {offsets = [9, 0], sizes = [1, 256], strides = [1, 1]} : vector<16x256xf32> to vector<1x256xf32>
    %c223_i32_70 = arith.constant 223 : i32
    %167 = tpu.dynamic_rotate %166 by %c223_i32_70 dim 1 : vector<1x256xf32>, i32 -> vector<1x256xf32>
    %168 = arith.addf %165, %167 : vector<1x256xf32>
    %169 = vector.extract_strided_slice %142 {offsets = [10, 0], sizes = [1, 256], strides = [1, 1]} : vector<16x256xf32> to vector<1x256xf32>
    %c222_i32_71 = arith.constant 222 : i32
    %170 = tpu.dynamic_rotate %169 by %c222_i32_71 dim 1 : vector<1x256xf32>, i32 -> vector<1x256xf32>
    %171 = arith.addf %168, %170 : vector<1x256xf32>
    %172 = vector.extract_strided_slice %142 {offsets = [11, 0], sizes = [1, 256], strides = [1, 1]} : vector<16x256xf32> to vector<1x256xf32>
    %c221_i32_72 = arith.constant 221 : i32
    %173 = tpu.dynamic_rotate %172 by %c221_i32_72 dim 1 : vector<1x256xf32>, i32 -> vector<1x256xf32>
    %174 = arith.addf %171, %173 : vector<1x256xf32>
    %175 = vector.extract_strided_slice %142 {offsets = [12, 0], sizes = [1, 256], strides = [1, 1]} : vector<16x256xf32> to vector<1x256xf32>
    %c208_i32_73 = arith.constant 208 : i32
    %176 = tpu.dynamic_rotate %175 by %c208_i32_73 dim 1 : vector<1x256xf32>, i32 -> vector<1x256xf32>
    %177 = vector.extract_strided_slice %142 {offsets = [13, 0], sizes = [1, 256], strides = [1, 1]} : vector<16x256xf32> to vector<1x256xf32>
    %c207_i32_74 = arith.constant 207 : i32
    %178 = tpu.dynamic_rotate %177 by %c207_i32_74 dim 1 : vector<1x256xf32>, i32 -> vector<1x256xf32>
    %179 = arith.addf %176, %178 : vector<1x256xf32>
    %180 = vector.extract_strided_slice %142 {offsets = [14, 0], sizes = [1, 256], strides = [1, 1]} : vector<16x256xf32> to vector<1x256xf32>
    %c206_i32_75 = arith.constant 206 : i32
    %181 = tpu.dynamic_rotate %180 by %c206_i32_75 dim 1 : vector<1x256xf32>, i32 -> vector<1x256xf32>
    %182 = arith.addf %179, %181 : vector<1x256xf32>
    %183 = vector.extract_strided_slice %142 {offsets = [15, 0], sizes = [1, 256], strides = [1, 1]} : vector<16x256xf32> to vector<1x256xf32>
    %c205_i32_76 = arith.constant 205 : i32
    %184 = tpu.dynamic_rotate %183 by %c205_i32_76 dim 1 : vector<1x256xf32>, i32 -> vector<1x256xf32>
    %185 = arith.addf %182, %184 : vector<1x256xf32>
    %186 = arith.addf %152, %163 : vector<1x256xf32>
    %187 = arith.addf %174, %185 : vector<1x256xf32>
    %188 = arith.addf %186, %187 : vector<1x256xf32>
    %c0_i32_77 = arith.constant 0 : i32
    %c0_i32_78 = arith.constant 0 : i32
    %c0_i32_79 = arith.constant 0 : i32
    %189 = tpu.memref_slice %arg5[%c0_i32_77, %c0_i32_78, %c0_i32_79] : memref<1x8x256xf32, #tpu.memory_space<vmem>> -> memref<1x8x256xf32, #tpu.memory_space<vmem>>
    %190 = tpu.memref_squeeze %189 : memref<1x8x256xf32, #tpu.memory_space<vmem>> -> memref<8x256xf32, #tpu.memory_space<vmem>>
    %c2_80 = arith.constant 2 : index
    %c0_81 = arith.constant 0 : index
    %191 = vector.load %190[%c2_80, %c0_81] : memref<8x256xf32, #tpu.memory_space<vmem>>, vector<1x256xf32>
    tpu.vector_store %190[%c2_80, %c0_81], %188 {strides = array<i32>} : memref<8x256xf32, #tpu.memory_space<vmem>>, vector<1x256xf32>,
    %c0_82 = arith.constant 0 : index
    %c0_83 = arith.constant 0 : index
    %192 = vector.load %arg3[%c0_82, %c0_83] : memref<16x16xf32, #tpu.memory_space<vmem>>, vector<16x16xf32>
    %c3 = arith.constant 3 : index
    %c0_84 = arith.constant 0 : index
    %c0_85 = arith.constant 0 : index
    %193 = vector.load %arg1[%c3, %c0_84, %c0_85] : memref<8x16x256xf32, #tpu.memory_space<vmem>>, vector<1x16x256xf32>
    %194 = vector.shape_cast %193 : vector<1x16x256xf32> to vector<16x256xf32>
    %cst_86 = arith.constant dense<0.000000e+00> : vector<16x256xf32>
    %195 = tpu.matmul %192, %194, %cst_86 {dimension_numbers = #tpu.dot_dimension_numbers<[1], [0], [0], [1], [0, 0, 1, 1], [], []>} : vector<16x16xf32>, vector<16x256xf32>, vector<16x256xf32> -> vector<16x256xf32>
    %c3_87 = arith.constant 3 : index
    %c0_88 = arith.constant 0 : index
    %c0_89 = arith.constant 0 : index
    %196 = vector.load %arg2[%c3_87, %c0_88, %c0_89] : memref<8x16x1xf32, #tpu.memory_space<vmem>>, vector<1x16x1xf32>
    %197 = vector.shape_cast %196 : vector<1x16x1xf32> to vector<16x1xf32>
    %198 = vector.broadcast %197 : vector<16x1xf32> to vector<16x256xf32>
    %199 = arith.addf %195, %198 : vector<16x256xf32>
    %cst_90 = arith.constant 0.000000e+00 : f32
    %200 = vector.broadcast %cst_90 : f32 to vector<16x256xf32>
    %201 = arith.cmpf ogt, %199, %200 : vector<16x256xf32>
    %cst_91 = arith.constant 2.000000e-01 : f32
    %202 = vector.broadcast %cst_91 : f32 to vector<16x256xf32>
    %203 = arith.mulf %202, %199 : vector<16x256xf32>
    %204 = arith.select %201, %199, %203 : vector<16x256xi1>, vector<16x256xf32>
    %c0_92 = arith.constant 0 : index
    %c0_93 = arith.constant 0 : index
    %205 = vector.load %arg4[%c0_92, %c0_93] : memref<16x16xf32, #tpu.memory_space<vmem>>, vector<16x16xf32>
    %cst_94 = arith.constant dense<0.000000e+00> : vector<16x256xf32>
    %206 = tpu.matmul %205, %204, %cst_94 {dimension_numbers = #tpu.dot_dimension_numbers<[1], [0], [0], [1], [0, 0, 1, 1], [], []>} : vector<16x16xf32>, vector<16x256xf32>, vector<16x256xf32> -> vector<16x256xf32>
    %207 = vector.extract_strided_slice %206 {offsets = [0, 0], sizes = [1, 256], strides = [1, 1]} : vector<16x256xf32> to vector<1x256xf32>
    %208 = vector.extract_strided_slice %206 {offsets = [1, 0], sizes = [1, 256], strides = [1, 1]} : vector<16x256xf32> to vector<1x256xf32>
    %c255_i32_95 = arith.constant 255 : i32
    %209 = tpu.dynamic_rotate %208 by %c255_i32_95 dim 1 : vector<1x256xf32>, i32 -> vector<1x256xf32>
    %210 = arith.addf %207, %209 : vector<1x256xf32>
    %211 = vector.extract_strided_slice %206 {offsets = [2, 0], sizes = [1, 256], strides = [1, 1]} : vector<16x256xf32> to vector<1x256xf32>
    %c254_i32_96 = arith.constant 254 : i32
    %212 = tpu.dynamic_rotate %211 by %c254_i32_96 dim 1 : vector<1x256xf32>, i32 -> vector<1x256xf32>
    %213 = arith.addf %210, %212 : vector<1x256xf32>
    %214 = vector.extract_strided_slice %206 {offsets = [3, 0], sizes = [1, 256], strides = [1, 1]} : vector<16x256xf32> to vector<1x256xf32>
    %c253_i32_97 = arith.constant 253 : i32
    %215 = tpu.dynamic_rotate %214 by %c253_i32_97 dim 1 : vector<1x256xf32>, i32 -> vector<1x256xf32>
    %216 = arith.addf %213, %215 : vector<1x256xf32>
    %217 = vector.extract_strided_slice %206 {offsets = [4, 0], sizes = [1, 256], strides = [1, 1]} : vector<16x256xf32> to vector<1x256xf32>
    %c240_i32_98 = arith.constant 240 : i32
    %218 = tpu.dynamic_rotate %217 by %c240_i32_98 dim 1 : vector<1x256xf32>, i32 -> vector<1x256xf32>
    %219 = vector.extract_strided_slice %206 {offsets = [5, 0], sizes = [1, 256], strides = [1, 1]} : vector<16x256xf32> to vector<1x256xf32>
    %c239_i32_99 = arith.constant 239 : i32
    %220 = tpu.dynamic_rotate %219 by %c239_i32_99 dim 1 : vector<1x256xf32>, i32 -> vector<1x256xf32>
    %221 = arith.addf %218, %220 : vector<1x256xf32>
    %222 = vector.extract_strided_slice %206 {offsets = [6, 0], sizes = [1, 256], strides = [1, 1]} : vector<16x256xf32> to vector<1x256xf32>
    %c238_i32_100 = arith.constant 238 : i32
    %223 = tpu.dynamic_rotate %222 by %c238_i32_100 dim 1 : vector<1x256xf32>, i32 -> vector<1x256xf32>
    %224 = arith.addf %221, %223 : vector<1x256xf32>
    %225 = vector.extract_strided_slice %206 {offsets = [7, 0], sizes = [1, 256], strides = [1, 1]} : vector<16x256xf32> to vector<1x256xf32>
    %c237_i32_101 = arith.constant 237 : i32
    %226 = tpu.dynamic_rotate %225 by %c237_i32_101 dim 1 : vector<1x256xf32>, i32 -> vector<1x256xf32>
    %227 = arith.addf %224, %226 : vector<1x256xf32>
    %228 = vector.extract_strided_slice %206 {offsets = [8, 0], sizes = [1, 256], strides = [1, 1]} : vector<16x256xf32> to vector<1x256xf32>
    %c224_i32_102 = arith.constant 224 : i32
    %229 = tpu.dynamic_rotate %228 by %c224_i32_102 dim 1 : vector<1x256xf32>, i32 -> vector<1x256xf32>
    %230 = vector.extract_strided_slice %206 {offsets = [9, 0], sizes = [1, 256], strides = [1, 1]} : vector<16x256xf32> to vector<1x256xf32>
    %c223_i32_103 = arith.constant 223 : i32
    %231 = tpu.dynamic_rotate %230 by %c223_i32_103 dim 1 : vector<1x256xf32>, i32 -> vector<1x256xf32>
    %232 = arith.addf %229, %231 : vector<1x256xf32>
    %233 = vector.extract_strided_slice %206 {offsets = [10, 0], sizes = [1, 256], strides = [1, 1]} : vector<16x256xf32> to vector<1x256xf32>
    %c222_i32_104 = arith.constant 222 : i32
    %234 = tpu.dynamic_rotate %233 by %c222_i32_104 dim 1 : vector<1x256xf32>, i32 -> vector<1x256xf32>
    %235 = arith.addf %232, %234 : vector<1x256xf32>
    %236 = vector.extract_strided_slice %206 {offsets = [11, 0], sizes = [1, 256], strides = [1, 1]} : vector<16x256xf32> to vector<1x256xf32>
    %c221_i32_105 = arith.constant 221 : i32
    %237 = tpu.dynamic_rotate %236 by %c221_i32_105 dim 1 : vector<1x256xf32>, i32 -> vector<1x256xf32>
    %238 = arith.addf %235, %237 : vector<1x256xf32>
    %239 = vector.extract_strided_slice %206 {offsets = [12, 0], sizes = [1, 256], strides = [1, 1]} : vector<16x256xf32> to vector<1x256xf32>
    %c208_i32_106 = arith.constant 208 : i32
    %240 = tpu.dynamic_rotate %239 by %c208_i32_106 dim 1 : vector<1x256xf32>, i32 -> vector<1x256xf32>
    %241 = vector.extract_strided_slice %206 {offsets = [13, 0], sizes = [1, 256], strides = [1, 1]} : vector<16x256xf32> to vector<1x256xf32>
    %c207_i32_107 = arith.constant 207 : i32
    %242 = tpu.dynamic_rotate %241 by %c207_i32_107 dim 1 : vector<1x256xf32>, i32 -> vector<1x256xf32>
    %243 = arith.addf %240, %242 : vector<1x256xf32>
    %244 = vector.extract_strided_slice %206 {offsets = [14, 0], sizes = [1, 256], strides = [1, 1]} : vector<16x256xf32> to vector<1x256xf32>
    %c206_i32_108 = arith.constant 206 : i32
    %245 = tpu.dynamic_rotate %244 by %c206_i32_108 dim 1 : vector<1x256xf32>, i32 -> vector<1x256xf32>
    %246 = arith.addf %243, %245 : vector<1x256xf32>
    %247 = vector.extract_strided_slice %206 {offsets = [15, 0], sizes = [1, 256], strides = [1, 1]} : vector<16x256xf32> to vector<1x256xf32>
    %c205_i32_109 = arith.constant 205 : i32
    %248 = tpu.dynamic_rotate %247 by %c205_i32_109 dim 1 : vector<1x256xf32>, i32 -> vector<1x256xf32>
    %249 = arith.addf %246, %248 : vector<1x256xf32>
    %250 = arith.addf %216, %227 : vector<1x256xf32>
    %251 = arith.addf %238, %249 : vector<1x256xf32>
    %252 = arith.addf %250, %251 : vector<1x256xf32>
    %c0_i32_110 = arith.constant 0 : i32
    %c0_i32_111 = arith.constant 0 : i32
    %c0_i32_112 = arith.constant 0 : i32
    %253 = tpu.memref_slice %arg5[%c0_i32_110, %c0_i32_111, %c0_i32_112] : memref<1x8x256xf32, #tpu.memory_space<vmem>> -> memref<1x8x256xf32, #tpu.memory_space<vmem>>
    %254 = tpu.memref_squeeze %253 : memref<1x8x256xf32, #tpu.memory_space<vmem>> -> memref<8x256xf32, #tpu.memory_space<vmem>>
    %c3_113 = arith.constant 3 : index
    %c0_114 = arith.constant 0 : index
    %255 = vector.load %254[%c3_113, %c0_114] : memref<8x256xf32, #tpu.memory_space<vmem>>, vector<1x256xf32>
    tpu.vector_store %254[%c3_113, %c0_114], %252 {strides = array<i32>} : memref<8x256xf32, #tpu.memory_space<vmem>>, vector<1x256xf32>,
    %c0_115 = arith.constant 0 : index
    %c0_116 = arith.constant 0 : index
    %256 = vector.load %arg3[%c0_115, %c0_116] : memref<16x16xf32, #tpu.memory_space<vmem>>, vector<16x16xf32>
    %c4 = arith.constant 4 : index
    %c0_117 = arith.constant 0 : index
    %c0_118 = arith.constant 0 : index
    %257 = vector.load %arg1[%c4, %c0_117, %c0_118] : memref<8x16x256xf32, #tpu.memory_space<vmem>>, vector<1x16x256xf32>
    %258 = vector.shape_cast %257 : vector<1x16x256xf32> to vector<16x256xf32>
    %cst_119 = arith.constant dense<0.000000e+00> : vector<16x256xf32>
    %259 = tpu.matmul %256, %258, %cst_119 {dimension_numbers = #tpu.dot_dimension_numbers<[1], [0], [0], [1], [0, 0, 1, 1], [], []>} : vector<16x16xf32>, vector<16x256xf32>, vector<16x256xf32> -> vector<16x256xf32>
    %c4_120 = arith.constant 4 : index
    %c0_121 = arith.constant 0 : index
    %c0_122 = arith.constant 0 : index
    %260 = vector.load %arg2[%c4_120, %c0_121, %c0_122] : memref<8x16x1xf32, #tpu.memory_space<vmem>>, vector<1x16x1xf32>
    %261 = vector.shape_cast %260 : vector<1x16x1xf32> to vector<16x1xf32>
    %262 = vector.broadcast %261 : vector<16x1xf32> to vector<16x256xf32>
    %263 = arith.addf %259, %262 : vector<16x256xf32>
    %cst_123 = arith.constant 0.000000e+00 : f32
    %264 = vector.broadcast %cst_123 : f32 to vector<16x256xf32>
    %265 = arith.cmpf ogt, %263, %264 : vector<16x256xf32>
    %cst_124 = arith.constant 2.000000e-01 : f32
    %266 = vector.broadcast %cst_124 : f32 to vector<16x256xf32>
    %267 = arith.mulf %266, %263 : vector<16x256xf32>
    %268 = arith.select %265, %263, %267 : vector<16x256xi1>, vector<16x256xf32>
    %c0_125 = arith.constant 0 : index
    %c0_126 = arith.constant 0 : index
    %269 = vector.load %arg4[%c0_125, %c0_126] : memref<16x16xf32, #tpu.memory_space<vmem>>, vector<16x16xf32>
    %cst_127 = arith.constant dense<0.000000e+00> : vector<16x256xf32>
    %270 = tpu.matmul %269, %268, %cst_127 {dimension_numbers = #tpu.dot_dimension_numbers<[1], [0], [0], [1], [0, 0, 1, 1], [], []>} : vector<16x16xf32>, vector<16x256xf32>, vector<16x256xf32> -> vector<16x256xf32>
    %271 = vector.extract_strided_slice %270 {offsets = [0, 0], sizes = [1, 256], strides = [1, 1]} : vector<16x256xf32> to vector<1x256xf32>
    %272 = vector.extract_strided_slice %270 {offsets = [1, 0], sizes = [1, 256], strides = [1, 1]} : vector<16x256xf32> to vector<1x256xf32>
    %c255_i32_128 = arith.constant 255 : i32
    %273 = tpu.dynamic_rotate %272 by %c255_i32_128 dim 1 : vector<1x256xf32>, i32 -> vector<1x256xf32>
    %274 = arith.addf %271, %273 : vector<1x256xf32>
    %275 = vector.extract_strided_slice %270 {offsets = [2, 0], sizes = [1, 256], strides = [1, 1]} : vector<16x256xf32> to vector<1x256xf32>
    %c254_i32_129 = arith.constant 254 : i32
    %276 = tpu.dynamic_rotate %275 by %c254_i32_129 dim 1 : vector<1x256xf32>, i32 -> vector<1x256xf32>
    %277 = arith.addf %274, %276 : vector<1x256xf32>
    %278 = vector.extract_strided_slice %270 {offsets = [3, 0], sizes = [1, 256], strides = [1, 1]} : vector<16x256xf32> to vector<1x256xf32>
    %c253_i32_130 = arith.constant 253 : i32
    %279 = tpu.dynamic_rotate %278 by %c253_i32_130 dim 1 : vector<1x256xf32>, i32 -> vector<1x256xf32>
    %280 = arith.addf %277, %279 : vector<1x256xf32>
    %281 = vector.extract_strided_slice %270 {offsets = [4, 0], sizes = [1, 256], strides = [1, 1]} : vector<16x256xf32> to vector<1x256xf32>
    %c240_i32_131 = arith.constant 240 : i32
    %282 = tpu.dynamic_rotate %281 by %c240_i32_131 dim 1 : vector<1x256xf32>, i32 -> vector<1x256xf32>
    %283 = vector.extract_strided_slice %270 {offsets = [5, 0], sizes = [1, 256], strides = [1, 1]} : vector<16x256xf32> to vector<1x256xf32>
    %c239_i32_132 = arith.constant 239 : i32
    %284 = tpu.dynamic_rotate %283 by %c239_i32_132 dim 1 : vector<1x256xf32>, i32 -> vector<1x256xf32>
    %285 = arith.addf %282, %284 : vector<1x256xf32>
    %286 = vector.extract_strided_slice %270 {offsets = [6, 0], sizes = [1, 256], strides = [1, 1]} : vector<16x256xf32> to vector<1x256xf32>
    %c238_i32_133 = arith.constant 238 : i32
    %287 = tpu.dynamic_rotate %286 by %c238_i32_133 dim 1 : vector<1x256xf32>, i32 -> vector<1x256xf32>
    %288 = arith.addf %285, %287 : vector<1x256xf32>
    %289 = vector.extract_strided_slice %270 {offsets = [7, 0], sizes = [1, 256], strides = [1, 1]} : vector<16x256xf32> to vector<1x256xf32>
    %c237_i32_134 = arith.constant 237 : i32
    %290 = tpu.dynamic_rotate %289 by %c237_i32_134 dim 1 : vector<1x256xf32>, i32 -> vector<1x256xf32>
    %291 = arith.addf %288, %290 : vector<1x256xf32>
    %292 = vector.extract_strided_slice %270 {offsets = [8, 0], sizes = [1, 256], strides = [1, 1]} : vector<16x256xf32> to vector<1x256xf32>
    %c224_i32_135 = arith.constant 224 : i32
    %293 = tpu.dynamic_rotate %292 by %c224_i32_135 dim 1 : vector<1x256xf32>, i32 -> vector<1x256xf32>
    %294 = vector.extract_strided_slice %270 {offsets = [9, 0], sizes = [1, 256], strides = [1, 1]} : vector<16x256xf32> to vector<1x256xf32>
    %c223_i32_136 = arith.constant 223 : i32
    %295 = tpu.dynamic_rotate %294 by %c223_i32_136 dim 1 : vector<1x256xf32>, i32 -> vector<1x256xf32>
    %296 = arith.addf %293, %295 : vector<1x256xf32>
    %297 = vector.extract_strided_slice %270 {offsets = [10, 0], sizes = [1, 256], strides = [1, 1]} : vector<16x256xf32> to vector<1x256xf32>
    %c222_i32_137 = arith.constant 222 : i32
    %298 = tpu.dynamic_rotate %297 by %c222_i32_137 dim 1 : vector<1x256xf32>, i32 -> vector<1x256xf32>
    %299 = arith.addf %296, %298 : vector<1x256xf32>
    %300 = vector.extract_strided_slice %270 {offsets = [11, 0], sizes = [1, 256], strides = [1, 1]} : vector<16x256xf32> to vector<1x256xf32>
    %c221_i32_138 = arith.constant 221 : i32
    %301 = tpu.dynamic_rotate %300 by %c221_i32_138 dim 1 : vector<1x256xf32>, i32 -> vector<1x256xf32>
    %302 = arith.addf %299, %301 : vector<1x256xf32>
    %303 = vector.extract_strided_slice %270 {offsets = [12, 0], sizes = [1, 256], strides = [1, 1]} : vector<16x256xf32> to vector<1x256xf32>
    %c208_i32_139 = arith.constant 208 : i32
    %304 = tpu.dynamic_rotate %303 by %c208_i32_139 dim 1 : vector<1x256xf32>, i32 -> vector<1x256xf32>
    %305 = vector.extract_strided_slice %270 {offsets = [13, 0], sizes = [1, 256], strides = [1, 1]} : vector<16x256xf32> to vector<1x256xf32>
    %c207_i32_140 = arith.constant 207 : i32
    %306 = tpu.dynamic_rotate %305 by %c207_i32_140 dim 1 : vector<1x256xf32>, i32 -> vector<1x256xf32>
    %307 = arith.addf %304, %306 : vector<1x256xf32>
    %308 = vector.extract_strided_slice %270 {offsets = [14, 0], sizes = [1, 256], strides = [1, 1]} : vector<16x256xf32> to vector<1x256xf32>
    %c206_i32_141 = arith.constant 206 : i32
    %309 = tpu.dynamic_rotate %308 by %c206_i32_141 dim 1 : vector<1x256xf32>, i32 -> vector<1x256xf32>
    %310 = arith.addf %307, %309 : vector<1x256xf32>
    %311 = vector.extract_strided_slice %270 {offsets = [15, 0], sizes = [1, 256], strides = [1, 1]} : vector<16x256xf32> to vector<1x256xf32>
    %c205_i32_142 = arith.constant 205 : i32
    %312 = tpu.dynamic_rotate %311 by %c205_i32_142 dim 1 : vector<1x256xf32>, i32 -> vector<1x256xf32>
    %313 = arith.addf %310, %312 : vector<1x256xf32>
    %314 = arith.addf %280, %291 : vector<1x256xf32>
    %315 = arith.addf %302, %313 : vector<1x256xf32>
    %316 = arith.addf %314, %315 : vector<1x256xf32>
    %c0_i32_143 = arith.constant 0 : i32
    %c0_i32_144 = arith.constant 0 : i32
    %c0_i32_145 = arith.constant 0 : i32
    %317 = tpu.memref_slice %arg5[%c0_i32_143, %c0_i32_144, %c0_i32_145] : memref<1x8x256xf32, #tpu.memory_space<vmem>> -> memref<1x8x256xf32, #tpu.memory_space<vmem>>
    %318 = tpu.memref_squeeze %317 : memref<1x8x256xf32, #tpu.memory_space<vmem>> -> memref<8x256xf32, #tpu.memory_space<vmem>>
    %c4_146 = arith.constant 4 : index
    %c0_147 = arith.constant 0 : index
    %319 = vector.load %318[%c4_146, %c0_147] : memref<8x256xf32, #tpu.memory_space<vmem>>, vector<1x256xf32>
    tpu.vector_store %318[%c4_146, %c0_147], %316 {strides = array<i32>} : memref<8x256xf32, #tpu.memory_space<vmem>>, vector<1x256xf32>,
    %c0_148 = arith.constant 0 : index
    %c0_149 = arith.constant 0 : index
    %320 = vector.load %arg3[%c0_148, %c0_149] : memref<16x16xf32, #tpu.memory_space<vmem>>, vector<16x16xf32>
    %c5 = arith.constant 5 : index
    %c0_150 = arith.constant 0 : index
    %c0_151 = arith.constant 0 : index
    %321 = vector.load %arg1[%c5, %c0_150, %c0_151] : memref<8x16x256xf32, #tpu.memory_space<vmem>>, vector<1x16x256xf32>
    %322 = vector.shape_cast %321 : vector<1x16x256xf32> to vector<16x256xf32>
    %cst_152 = arith.constant dense<0.000000e+00> : vector<16x256xf32>
    %323 = tpu.matmul %320, %322, %cst_152 {dimension_numbers = #tpu.dot_dimension_numbers<[1], [0], [0], [1], [0, 0, 1, 1], [], []>} : vector<16x16xf32>, vector<16x256xf32>, vector<16x256xf32> -> vector<16x256xf32>
    %c5_153 = arith.constant 5 : index
    %c0_154 = arith.constant 0 : index
    %c0_155 = arith.constant 0 : index
    %324 = vector.load %arg2[%c5_153, %c0_154, %c0_155] : memref<8x16x1xf32, #tpu.memory_space<vmem>>, vector<1x16x1xf32>
    %325 = vector.shape_cast %324 : vector<1x16x1xf32> to vector<16x1xf32>
    %326 = vector.broadcast %325 : vector<16x1xf32> to vector<16x256xf32>
    %327 = arith.addf %323, %326 : vector<16x256xf32>
    %cst_156 = arith.constant 0.000000e+00 : f32
    %328 = vector.broadcast %cst_156 : f32 to vector<16x256xf32>
    %329 = arith.cmpf ogt, %327, %328 : vector<16x256xf32>
    %cst_157 = arith.constant 2.000000e-01 : f32
    %330 = vector.broadcast %cst_157 : f32 to vector<16x256xf32>
    %331 = arith.mulf %330, %327 : vector<16x256xf32>
    %332 = arith.select %329, %327, %331 : vector<16x256xi1>, vector<16x256xf32>
    %c0_158 = arith.constant 0 : index
    %c0_159 = arith.constant 0 : index
    %333 = vector.load %arg4[%c0_158, %c0_159] : memref<16x16xf32, #tpu.memory_space<vmem>>, vector<16x16xf32>
    %cst_160 = arith.constant dense<0.000000e+00> : vector<16x256xf32>
    %334 = tpu.matmul %333, %332, %cst_160 {dimension_numbers = #tpu.dot_dimension_numbers<[1], [0], [0], [1], [0, 0, 1, 1], [], []>} : vector<16x16xf32>, vector<16x256xf32>, vector<16x256xf32> -> vector<16x256xf32>
    %335 = vector.extract_strided_slice %334 {offsets = [0, 0], sizes = [1, 256], strides = [1, 1]} : vector<16x256xf32> to vector<1x256xf32>
    %336 = vector.extract_strided_slice %334 {offsets = [1, 0], sizes = [1, 256], strides = [1, 1]} : vector<16x256xf32> to vector<1x256xf32>
    %c255_i32_161 = arith.constant 255 : i32
    %337 = tpu.dynamic_rotate %336 by %c255_i32_161 dim 1 : vector<1x256xf32>, i32 -> vector<1x256xf32>
    %338 = arith.addf %335, %337 : vector<1x256xf32>
    %339 = vector.extract_strided_slice %334 {offsets = [2, 0], sizes = [1, 256], strides = [1, 1]} : vector<16x256xf32> to vector<1x256xf32>
    %c254_i32_162 = arith.constant 254 : i32
    %340 = tpu.dynamic_rotate %339 by %c254_i32_162 dim 1 : vector<1x256xf32>, i32 -> vector<1x256xf32>
    %341 = arith.addf %338, %340 : vector<1x256xf32>
    %342 = vector.extract_strided_slice %334 {offsets = [3, 0], sizes = [1, 256], strides = [1, 1]} : vector<16x256xf32> to vector<1x256xf32>
    %c253_i32_163 = arith.constant 253 : i32
    %343 = tpu.dynamic_rotate %342 by %c253_i32_163 dim 1 : vector<1x256xf32>, i32 -> vector<1x256xf32>
    %344 = arith.addf %341, %343 : vector<1x256xf32>
    %345 = vector.extract_strided_slice %334 {offsets = [4, 0], sizes = [1, 256], strides = [1, 1]} : vector<16x256xf32> to vector<1x256xf32>
    %c240_i32_164 = arith.constant 240 : i32
    %346 = tpu.dynamic_rotate %345 by %c240_i32_164 dim 1 : vector<1x256xf32>, i32 -> vector<1x256xf32>
    %347 = vector.extract_strided_slice %334 {offsets = [5, 0], sizes = [1, 256], strides = [1, 1]} : vector<16x256xf32> to vector<1x256xf32>
    %c239_i32_165 = arith.constant 239 : i32
    %348 = tpu.dynamic_rotate %347 by %c239_i32_165 dim 1 : vector<1x256xf32>, i32 -> vector<1x256xf32>
    %349 = arith.addf %346, %348 : vector<1x256xf32>
    %350 = vector.extract_strided_slice %334 {offsets = [6, 0], sizes = [1, 256], strides = [1, 1]} : vector<16x256xf32> to vector<1x256xf32>
    %c238_i32_166 = arith.constant 238 : i32
    %351 = tpu.dynamic_rotate %350 by %c238_i32_166 dim 1 : vector<1x256xf32>, i32 -> vector<1x256xf32>
    %352 = arith.addf %349, %351 : vector<1x256xf32>
    %353 = vector.extract_strided_slice %334 {offsets = [7, 0], sizes = [1, 256], strides = [1, 1]} : vector<16x256xf32> to vector<1x256xf32>
    %c237_i32_167 = arith.constant 237 : i32
    %354 = tpu.dynamic_rotate %353 by %c237_i32_167 dim 1 : vector<1x256xf32>, i32 -> vector<1x256xf32>
    %355 = arith.addf %352, %354 : vector<1x256xf32>
    %356 = vector.extract_strided_slice %334 {offsets = [8, 0], sizes = [1, 256], strides = [1, 1]} : vector<16x256xf32> to vector<1x256xf32>
    %c224_i32_168 = arith.constant 224 : i32
    %357 = tpu.dynamic_rotate %356 by %c224_i32_168 dim 1 : vector<1x256xf32>, i32 -> vector<1x256xf32>
    %358 = vector.extract_strided_slice %334 {offsets = [9, 0], sizes = [1, 256], strides = [1, 1]} : vector<16x256xf32> to vector<1x256xf32>
    %c223_i32_169 = arith.constant 223 : i32
    %359 = tpu.dynamic_rotate %358 by %c223_i32_169 dim 1 : vector<1x256xf32>, i32 -> vector<1x256xf32>
    %360 = arith.addf %357, %359 : vector<1x256xf32>
    %361 = vector.extract_strided_slice %334 {offsets = [10, 0], sizes = [1, 256], strides = [1, 1]} : vector<16x256xf32> to vector<1x256xf32>
    %c222_i32_170 = arith.constant 222 : i32
    %362 = tpu.dynamic_rotate %361 by %c222_i32_170 dim 1 : vector<1x256xf32>, i32 -> vector<1x256xf32>
    %363 = arith.addf %360, %362 : vector<1x256xf32>
    %364 = vector.extract_strided_slice %334 {offsets = [11, 0], sizes = [1, 256], strides = [1, 1]} : vector<16x256xf32> to vector<1x256xf32>
    %c221_i32_171 = arith.constant 221 : i32
    %365 = tpu.dynamic_rotate %364 by %c221_i32_171 dim 1 : vector<1x256xf32>, i32 -> vector<1x256xf32>
    %366 = arith.addf %363, %365 : vector<1x256xf32>
    %367 = vector.extract_strided_slice %334 {offsets = [12, 0], sizes = [1, 256], strides = [1, 1]} : vector<16x256xf32> to vector<1x256xf32>
    %c208_i32_172 = arith.constant 208 : i32
    %368 = tpu.dynamic_rotate %367 by %c208_i32_172 dim 1 : vector<1x256xf32>, i32 -> vector<1x256xf32>
    %369 = vector.extract_strided_slice %334 {offsets = [13, 0], sizes = [1, 256], strides = [1, 1]} : vector<16x256xf32> to vector<1x256xf32>
    %c207_i32_173 = arith.constant 207 : i32
    %370 = tpu.dynamic_rotate %369 by %c207_i32_173 dim 1 : vector<1x256xf32>, i32 -> vector<1x256xf32>
    %371 = arith.addf %368, %370 : vector<1x256xf32>
    %372 = vector.extract_strided_slice %334 {offsets = [14, 0], sizes = [1, 256], strides = [1, 1]} : vector<16x256xf32> to vector<1x256xf32>
    %c206_i32_174 = arith.constant 206 : i32
    %373 = tpu.dynamic_rotate %372 by %c206_i32_174 dim 1 : vector<1x256xf32>, i32 -> vector<1x256xf32>
    %374 = arith.addf %371, %373 : vector<1x256xf32>
    %375 = vector.extract_strided_slice %334 {offsets = [15, 0], sizes = [1, 256], strides = [1, 1]} : vector<16x256xf32> to vector<1x256xf32>
    %c205_i32_175 = arith.constant 205 : i32
    %376 = tpu.dynamic_rotate %375 by %c205_i32_175 dim 1 : vector<1x256xf32>, i32 -> vector<1x256xf32>
    %377 = arith.addf %374, %376 : vector<1x256xf32>
    %378 = arith.addf %344, %355 : vector<1x256xf32>
    %379 = arith.addf %366, %377 : vector<1x256xf32>
    %380 = arith.addf %378, %379 : vector<1x256xf32>
    %c0_i32_176 = arith.constant 0 : i32
    %c0_i32_177 = arith.constant 0 : i32
    %c0_i32_178 = arith.constant 0 : i32
    %381 = tpu.memref_slice %arg5[%c0_i32_176, %c0_i32_177, %c0_i32_178] : memref<1x8x256xf32, #tpu.memory_space<vmem>> -> memref<1x8x256xf32, #tpu.memory_space<vmem>>
    %382 = tpu.memref_squeeze %381 : memref<1x8x256xf32, #tpu.memory_space<vmem>> -> memref<8x256xf32, #tpu.memory_space<vmem>>
    %c5_179 = arith.constant 5 : index
    %c0_180 = arith.constant 0 : index
    %383 = vector.load %382[%c5_179, %c0_180] : memref<8x256xf32, #tpu.memory_space<vmem>>, vector<1x256xf32>
    tpu.vector_store %382[%c5_179, %c0_180], %380 {strides = array<i32>} : memref<8x256xf32, #tpu.memory_space<vmem>>, vector<1x256xf32>,
    %c0_181 = arith.constant 0 : index
    %c0_182 = arith.constant 0 : index
    %384 = vector.load %arg3[%c0_181, %c0_182] : memref<16x16xf32, #tpu.memory_space<vmem>>, vector<16x16xf32>
    %c6 = arith.constant 6 : index
    %c0_183 = arith.constant 0 : index
    %c0_184 = arith.constant 0 : index
    %385 = vector.load %arg1[%c6, %c0_183, %c0_184] : memref<8x16x256xf32, #tpu.memory_space<vmem>>, vector<1x16x256xf32>
    %386 = vector.shape_cast %385 : vector<1x16x256xf32> to vector<16x256xf32>
    %cst_185 = arith.constant dense<0.000000e+00> : vector<16x256xf32>
    %387 = tpu.matmul %384, %386, %cst_185 {dimension_numbers = #tpu.dot_dimension_numbers<[1], [0], [0], [1], [0, 0, 1, 1], [], []>} : vector<16x16xf32>, vector<16x256xf32>, vector<16x256xf32> -> vector<16x256xf32>
    %c6_186 = arith.constant 6 : index
    %c0_187 = arith.constant 0 : index
    %c0_188 = arith.constant 0 : index
    %388 = vector.load %arg2[%c6_186, %c0_187, %c0_188] : memref<8x16x1xf32, #tpu.memory_space<vmem>>, vector<1x16x1xf32>
    %389 = vector.shape_cast %388 : vector<1x16x1xf32> to vector<16x1xf32>
    %390 = vector.broadcast %389 : vector<16x1xf32> to vector<16x256xf32>
    %391 = arith.addf %387, %390 : vector<16x256xf32>
    %cst_189 = arith.constant 0.000000e+00 : f32
    %392 = vector.broadcast %cst_189 : f32 to vector<16x256xf32>
    %393 = arith.cmpf ogt, %391, %392 : vector<16x256xf32>
    %cst_190 = arith.constant 2.000000e-01 : f32
    %394 = vector.broadcast %cst_190 : f32 to vector<16x256xf32>
    %395 = arith.mulf %394, %391 : vector<16x256xf32>
    %396 = arith.select %393, %391, %395 : vector<16x256xi1>, vector<16x256xf32>
    %c0_191 = arith.constant 0 : index
    %c0_192 = arith.constant 0 : index
    %397 = vector.load %arg4[%c0_191, %c0_192] : memref<16x16xf32, #tpu.memory_space<vmem>>, vector<16x16xf32>
    %cst_193 = arith.constant dense<0.000000e+00> : vector<16x256xf32>
    %398 = tpu.matmul %397, %396, %cst_193 {dimension_numbers = #tpu.dot_dimension_numbers<[1], [0], [0], [1], [0, 0, 1, 1], [], []>} : vector<16x16xf32>, vector<16x256xf32>, vector<16x256xf32> -> vector<16x256xf32>
    %399 = vector.extract_strided_slice %398 {offsets = [0, 0], sizes = [1, 256], strides = [1, 1]} : vector<16x256xf32> to vector<1x256xf32>
    %400 = vector.extract_strided_slice %398 {offsets = [1, 0], sizes = [1, 256], strides = [1, 1]} : vector<16x256xf32> to vector<1x256xf32>
    %c255_i32_194 = arith.constant 255 : i32
    %401 = tpu.dynamic_rotate %400 by %c255_i32_194 dim 1 : vector<1x256xf32>, i32 -> vector<1x256xf32>
    %402 = arith.addf %399, %401 : vector<1x256xf32>
    %403 = vector.extract_strided_slice %398 {offsets = [2, 0], sizes = [1, 256], strides = [1, 1]} : vector<16x256xf32> to vector<1x256xf32>
    %c254_i32_195 = arith.constant 254 : i32
    %404 = tpu.dynamic_rotate %403 by %c254_i32_195 dim 1 : vector<1x256xf32>, i32 -> vector<1x256xf32>
    %405 = arith.addf %402, %404 : vector<1x256xf32>
    %406 = vector.extract_strided_slice %398 {offsets = [3, 0], sizes = [1, 256], strides = [1, 1]} : vector<16x256xf32> to vector<1x256xf32>
    %c253_i32_196 = arith.constant 253 : i32
    %407 = tpu.dynamic_rotate %406 by %c253_i32_196 dim 1 : vector<1x256xf32>, i32 -> vector<1x256xf32>
    %408 = arith.addf %405, %407 : vector<1x256xf32>
    %409 = vector.extract_strided_slice %398 {offsets = [4, 0], sizes = [1, 256], strides = [1, 1]} : vector<16x256xf32> to vector<1x256xf32>
    %c240_i32_197 = arith.constant 240 : i32
    %410 = tpu.dynamic_rotate %409 by %c240_i32_197 dim 1 : vector<1x256xf32>, i32 -> vector<1x256xf32>
    %411 = vector.extract_strided_slice %398 {offsets = [5, 0], sizes = [1, 256], strides = [1, 1]} : vector<16x256xf32> to vector<1x256xf32>
    %c239_i32_198 = arith.constant 239 : i32
    %412 = tpu.dynamic_rotate %411 by %c239_i32_198 dim 1 : vector<1x256xf32>, i32 -> vector<1x256xf32>
    %413 = arith.addf %410, %412 : vector<1x256xf32>
    %414 = vector.extract_strided_slice %398 {offsets = [6, 0], sizes = [1, 256], strides = [1, 1]} : vector<16x256xf32> to vector<1x256xf32>
    %c238_i32_199 = arith.constant 238 : i32
    %415 = tpu.dynamic_rotate %414 by %c238_i32_199 dim 1 : vector<1x256xf32>, i32 -> vector<1x256xf32>
    %416 = arith.addf %413, %415 : vector<1x256xf32>
    %417 = vector.extract_strided_slice %398 {offsets = [7, 0], sizes = [1, 256], strides = [1, 1]} : vector<16x256xf32> to vector<1x256xf32>
    %c237_i32_200 = arith.constant 237 : i32
    %418 = tpu.dynamic_rotate %417 by %c237_i32_200 dim 1 : vector<1x256xf32>, i32 -> vector<1x256xf32>
    %419 = arith.addf %416, %418 : vector<1x256xf32>
    %420 = vector.extract_strided_slice %398 {offsets = [8, 0], sizes = [1, 256], strides = [1, 1]} : vector<16x256xf32> to vector<1x256xf32>
    %c224_i32_201 = arith.constant 224 : i32
    %421 = tpu.dynamic_rotate %420 by %c224_i32_201 dim 1 : vector<1x256xf32>, i32 -> vector<1x256xf32>
    %422 = vector.extract_strided_slice %398 {offsets = [9, 0], sizes = [1, 256], strides = [1, 1]} : vector<16x256xf32> to vector<1x256xf32>
    %c223_i32_202 = arith.constant 223 : i32
    %423 = tpu.dynamic_rotate %422 by %c223_i32_202 dim 1 : vector<1x256xf32>, i32 -> vector<1x256xf32>
    %424 = arith.addf %421, %423 : vector<1x256xf32>
    %425 = vector.extract_strided_slice %398 {offsets = [10, 0], sizes = [1, 256], strides = [1, 1]} : vector<16x256xf32> to vector<1x256xf32>
    %c222_i32_203 = arith.constant 222 : i32
    %426 = tpu.dynamic_rotate %425 by %c222_i32_203 dim 1 : vector<1x256xf32>, i32 -> vector<1x256xf32>
    %427 = arith.addf %424, %426 : vector<1x256xf32>
    %428 = vector.extract_strided_slice %398 {offsets = [11, 0], sizes = [1, 256], strides = [1, 1]} : vector<16x256xf32> to vector<1x256xf32>
    %c221_i32_204 = arith.constant 221 : i32
    %429 = tpu.dynamic_rotate %428 by %c221_i32_204 dim 1 : vector<1x256xf32>, i32 -> vector<1x256xf32>
    %430 = arith.addf %427, %429 : vector<1x256xf32>
    %431 = vector.extract_strided_slice %398 {offsets = [12, 0], sizes = [1, 256], strides = [1, 1]} : vector<16x256xf32> to vector<1x256xf32>
    %c208_i32_205 = arith.constant 208 : i32
    %432 = tpu.dynamic_rotate %431 by %c208_i32_205 dim 1 : vector<1x256xf32>, i32 -> vector<1x256xf32>
    %433 = vector.extract_strided_slice %398 {offsets = [13, 0], sizes = [1, 256], strides = [1, 1]} : vector<16x256xf32> to vector<1x256xf32>
    %c207_i32_206 = arith.constant 207 : i32
    %434 = tpu.dynamic_rotate %433 by %c207_i32_206 dim 1 : vector<1x256xf32>, i32 -> vector<1x256xf32>
    %435 = arith.addf %432, %434 : vector<1x256xf32>
    %436 = vector.extract_strided_slice %398 {offsets = [14, 0], sizes = [1, 256], strides = [1, 1]} : vector<16x256xf32> to vector<1x256xf32>
    %c206_i32_207 = arith.constant 206 : i32
    %437 = tpu.dynamic_rotate %436 by %c206_i32_207 dim 1 : vector<1x256xf32>, i32 -> vector<1x256xf32>
    %438 = arith.addf %435, %437 : vector<1x256xf32>
    %439 = vector.extract_strided_slice %398 {offsets = [15, 0], sizes = [1, 256], strides = [1, 1]} : vector<16x256xf32> to vector<1x256xf32>
    %c205_i32_208 = arith.constant 205 : i32
    %440 = tpu.dynamic_rotate %439 by %c205_i32_208 dim 1 : vector<1x256xf32>, i32 -> vector<1x256xf32>
    %441 = arith.addf %438, %440 : vector<1x256xf32>
    %442 = arith.addf %408, %419 : vector<1x256xf32>
    %443 = arith.addf %430, %441 : vector<1x256xf32>
    %444 = arith.addf %442, %443 : vector<1x256xf32>
    %c0_i32_209 = arith.constant 0 : i32
    %c0_i32_210 = arith.constant 0 : i32
    %c0_i32_211 = arith.constant 0 : i32
    %445 = tpu.memref_slice %arg5[%c0_i32_209, %c0_i32_210, %c0_i32_211] : memref<1x8x256xf32, #tpu.memory_space<vmem>> -> memref<1x8x256xf32, #tpu.memory_space<vmem>>
    %446 = tpu.memref_squeeze %445 : memref<1x8x256xf32, #tpu.memory_space<vmem>> -> memref<8x256xf32, #tpu.memory_space<vmem>>
    %c6_212 = arith.constant 6 : index
    %c0_213 = arith.constant 0 : index
    %447 = vector.load %446[%c6_212, %c0_213] : memref<8x256xf32, #tpu.memory_space<vmem>>, vector<1x256xf32>
    tpu.vector_store %446[%c6_212, %c0_213], %444 {strides = array<i32>} : memref<8x256xf32, #tpu.memory_space<vmem>>, vector<1x256xf32>,
    %c0_214 = arith.constant 0 : index
    %c0_215 = arith.constant 0 : index
    %448 = vector.load %arg3[%c0_214, %c0_215] : memref<16x16xf32, #tpu.memory_space<vmem>>, vector<16x16xf32>
    %c7 = arith.constant 7 : index
    %c0_216 = arith.constant 0 : index
    %c0_217 = arith.constant 0 : index
    %449 = vector.load %arg1[%c7, %c0_216, %c0_217] : memref<8x16x256xf32, #tpu.memory_space<vmem>>, vector<1x16x256xf32>
    %450 = vector.shape_cast %449 : vector<1x16x256xf32> to vector<16x256xf32>
    %cst_218 = arith.constant dense<0.000000e+00> : vector<16x256xf32>
    %451 = tpu.matmul %448, %450, %cst_218 {dimension_numbers = #tpu.dot_dimension_numbers<[1], [0], [0], [1], [0, 0, 1, 1], [], []>} : vector<16x16xf32>, vector<16x256xf32>, vector<16x256xf32> -> vector<16x256xf32>
    %c7_219 = arith.constant 7 : index
    %c0_220 = arith.constant 0 : index
    %c0_221 = arith.constant 0 : index
    %452 = vector.load %arg2[%c7_219, %c0_220, %c0_221] : memref<8x16x1xf32, #tpu.memory_space<vmem>>, vector<1x16x1xf32>
    %453 = vector.shape_cast %452 : vector<1x16x1xf32> to vector<16x1xf32>
    %454 = vector.broadcast %453 : vector<16x1xf32> to vector<16x256xf32>
    %455 = arith.addf %451, %454 : vector<16x256xf32>
    %cst_222 = arith.constant 0.000000e+00 : f32
    %456 = vector.broadcast %cst_222 : f32 to vector<16x256xf32>
    %457 = arith.cmpf ogt, %455, %456 : vector<16x256xf32>
    %cst_223 = arith.constant 2.000000e-01 : f32
    %458 = vector.broadcast %cst_223 : f32 to vector<16x256xf32>
    %459 = arith.mulf %458, %455 : vector<16x256xf32>
    %460 = arith.select %457, %455, %459 : vector<16x256xi1>, vector<16x256xf32>
    %c0_224 = arith.constant 0 : index
    %c0_225 = arith.constant 0 : index
    %461 = vector.load %arg4[%c0_224, %c0_225] : memref<16x16xf32, #tpu.memory_space<vmem>>, vector<16x16xf32>
    %cst_226 = arith.constant dense<0.000000e+00> : vector<16x256xf32>
    %462 = tpu.matmul %461, %460, %cst_226 {dimension_numbers = #tpu.dot_dimension_numbers<[1], [0], [0], [1], [0, 0, 1, 1], [], []>} : vector<16x16xf32>, vector<16x256xf32>, vector<16x256xf32> -> vector<16x256xf32>
    %463 = vector.extract_strided_slice %462 {offsets = [0, 0], sizes = [1, 256], strides = [1, 1]} : vector<16x256xf32> to vector<1x256xf32>
    %464 = vector.extract_strided_slice %462 {offsets = [1, 0], sizes = [1, 256], strides = [1, 1]} : vector<16x256xf32> to vector<1x256xf32>
    %c255_i32_227 = arith.constant 255 : i32
    %465 = tpu.dynamic_rotate %464 by %c255_i32_227 dim 1 : vector<1x256xf32>, i32 -> vector<1x256xf32>
    %466 = arith.addf %463, %465 : vector<1x256xf32>
    %467 = vector.extract_strided_slice %462 {offsets = [2, 0], sizes = [1, 256], strides = [1, 1]} : vector<16x256xf32> to vector<1x256xf32>
    %c254_i32_228 = arith.constant 254 : i32
    %468 = tpu.dynamic_rotate %467 by %c254_i32_228 dim 1 : vector<1x256xf32>, i32 -> vector<1x256xf32>
    %469 = arith.addf %466, %468 : vector<1x256xf32>
    %470 = vector.extract_strided_slice %462 {offsets = [3, 0], sizes = [1, 256], strides = [1, 1]} : vector<16x256xf32> to vector<1x256xf32>
    %c253_i32_229 = arith.constant 253 : i32
    %471 = tpu.dynamic_rotate %470 by %c253_i32_229 dim 1 : vector<1x256xf32>, i32 -> vector<1x256xf32>
    %472 = arith.addf %469, %471 : vector<1x256xf32>
    %473 = vector.extract_strided_slice %462 {offsets = [4, 0], sizes = [1, 256], strides = [1, 1]} : vector<16x256xf32> to vector<1x256xf32>
    %c240_i32_230 = arith.constant 240 : i32
    %474 = tpu.dynamic_rotate %473 by %c240_i32_230 dim 1 : vector<1x256xf32>, i32 -> vector<1x256xf32>
    %475 = vector.extract_strided_slice %462 {offsets = [5, 0], sizes = [1, 256], strides = [1, 1]} : vector<16x256xf32> to vector<1x256xf32>
    %c239_i32_231 = arith.constant 239 : i32
    %476 = tpu.dynamic_rotate %475 by %c239_i32_231 dim 1 : vector<1x256xf32>, i32 -> vector<1x256xf32>
    %477 = arith.addf %474, %476 : vector<1x256xf32>
    %478 = vector.extract_strided_slice %462 {offsets = [6, 0], sizes = [1, 256], strides = [1, 1]} : vector<16x256xf32> to vector<1x256xf32>
    %c238_i32_232 = arith.constant 238 : i32
    %479 = tpu.dynamic_rotate %478 by %c238_i32_232 dim 1 : vector<1x256xf32>, i32 -> vector<1x256xf32>
    %480 = arith.addf %477, %479 : vector<1x256xf32>
    %481 = vector.extract_strided_slice %462 {offsets = [7, 0], sizes = [1, 256], strides = [1, 1]} : vector<16x256xf32> to vector<1x256xf32>
    %c237_i32_233 = arith.constant 237 : i32
    %482 = tpu.dynamic_rotate %481 by %c237_i32_233 dim 1 : vector<1x256xf32>, i32 -> vector<1x256xf32>
    %483 = arith.addf %480, %482 : vector<1x256xf32>
    %484 = vector.extract_strided_slice %462 {offsets = [8, 0], sizes = [1, 256], strides = [1, 1]} : vector<16x256xf32> to vector<1x256xf32>
    %c224_i32_234 = arith.constant 224 : i32
    %485 = tpu.dynamic_rotate %484 by %c224_i32_234 dim 1 : vector<1x256xf32>, i32 -> vector<1x256xf32>
    %486 = vector.extract_strided_slice %462 {offsets = [9, 0], sizes = [1, 256], strides = [1, 1]} : vector<16x256xf32> to vector<1x256xf32>
    %c223_i32_235 = arith.constant 223 : i32
    %487 = tpu.dynamic_rotate %486 by %c223_i32_235 dim 1 : vector<1x256xf32>, i32 -> vector<1x256xf32>
    %488 = arith.addf %485, %487 : vector<1x256xf32>
    %489 = vector.extract_strided_slice %462 {offsets = [10, 0], sizes = [1, 256], strides = [1, 1]} : vector<16x256xf32> to vector<1x256xf32>
    %c222_i32_236 = arith.constant 222 : i32
    %490 = tpu.dynamic_rotate %489 by %c222_i32_236 dim 1 : vector<1x256xf32>, i32 -> vector<1x256xf32>
    %491 = arith.addf %488, %490 : vector<1x256xf32>
    %492 = vector.extract_strided_slice %462 {offsets = [11, 0], sizes = [1, 256], strides = [1, 1]} : vector<16x256xf32> to vector<1x256xf32>
    %c221_i32_237 = arith.constant 221 : i32
    %493 = tpu.dynamic_rotate %492 by %c221_i32_237 dim 1 : vector<1x256xf32>, i32 -> vector<1x256xf32>
    %494 = arith.addf %491, %493 : vector<1x256xf32>
    %495 = vector.extract_strided_slice %462 {offsets = [12, 0], sizes = [1, 256], strides = [1, 1]} : vector<16x256xf32> to vector<1x256xf32>
    %c208_i32_238 = arith.constant 208 : i32
    %496 = tpu.dynamic_rotate %495 by %c208_i32_238 dim 1 : vector<1x256xf32>, i32 -> vector<1x256xf32>
    %497 = vector.extract_strided_slice %462 {offsets = [13, 0], sizes = [1, 256], strides = [1, 1]} : vector<16x256xf32> to vector<1x256xf32>
    %c207_i32_239 = arith.constant 207 : i32
    %498 = tpu.dynamic_rotate %497 by %c207_i32_239 dim 1 : vector<1x256xf32>, i32 -> vector<1x256xf32>
    %499 = arith.addf %496, %498 : vector<1x256xf32>
    %500 = vector.extract_strided_slice %462 {offsets = [14, 0], sizes = [1, 256], strides = [1, 1]} : vector<16x256xf32> to vector<1x256xf32>
    %c206_i32_240 = arith.constant 206 : i32
    %501 = tpu.dynamic_rotate %500 by %c206_i32_240 dim 1 : vector<1x256xf32>, i32 -> vector<1x256xf32>
    %502 = arith.addf %499, %501 : vector<1x256xf32>
    %503 = vector.extract_strided_slice %462 {offsets = [15, 0], sizes = [1, 256], strides = [1, 1]} : vector<16x256xf32> to vector<1x256xf32>
    %c205_i32_241 = arith.constant 205 : i32
    %504 = tpu.dynamic_rotate %503 by %c205_i32_241 dim 1 : vector<1x256xf32>, i32 -> vector<1x256xf32>
    %505 = arith.addf %502, %504 : vector<1x256xf32>
    %506 = arith.addf %472, %483 : vector<1x256xf32>
    %507 = arith.addf %494, %505 : vector<1x256xf32>
    %508 = arith.addf %506, %507 : vector<1x256xf32>
    %c0_i32_242 = arith.constant 0 : i32
    %c0_i32_243 = arith.constant 0 : i32
    %c0_i32_244 = arith.constant 0 : i32
    %509 = tpu.memref_slice %arg5[%c0_i32_242, %c0_i32_243, %c0_i32_244] : memref<1x8x256xf32, #tpu.memory_space<vmem>> -> memref<1x8x256xf32, #tpu.memory_space<vmem>>
    %510 = tpu.memref_squeeze %509 : memref<1x8x256xf32, #tpu.memory_space<vmem>> -> memref<8x256xf32, #tpu.memory_space<vmem>>
    %c7_245 = arith.constant 7 : index
    %c0_246 = arith.constant 0 : index
    %511 = vector.load %510[%c7_245, %c0_246] : memref<8x256xf32, #tpu.memory_space<vmem>>, vector<1x256xf32>
    tpu.vector_store %510[%c7_245, %c0_246], %508 {strides = array<i32>} : memref<8x256xf32, #tpu.memory_space<vmem>>, vector<1x256xf32>,
    return
  }
  func.func @transform_0(%arg0: i32) -> (i32, i32, i32) {
    %c0_i32 = arith.constant 0 : i32
    %c0_i32_0 = arith.constant 0 : i32
    %c0_i32_1 = arith.constant 0 : i32
    return %arg0, %c0_i32, %c0_i32_0 : i32, i32, i32
  }
  func.func @transform_1(%arg0: i32) -> (i32, i32, i32) {
    %c0_i32 = arith.constant 0 : i32
    %c0_i32_0 = arith.constant 0 : i32
    %c0_i32_1 = arith.constant 0 : i32
    return %arg0, %c0_i32, %c0_i32_0 : i32, i32, i32
  }
  func.func @transform_2(%arg0: i32) -> (i32, i32) {
    %c0_i32 = arith.constant 0 : i32
    %c0_i32_0 = arith.constant 0 : i32
    %c0_i32_1 = arith.constant 0 : i32
    return %c0_i32, %c0_i32_0 : i32, i32
  }
  func.func @transform_3(%arg0: i32) -> (i32, i32) {
    %c0_i32 = arith.constant 0 : i32
    %c0_i32_0 = arith.constant 0 : i32
    %c0_i32_1 = arith.constant 0 : i32
    return %c0_i32, %c0_i32_0 : i32, i32
  }
  func.func @transform_4(%arg0: i32) -> (i32, i32, i32) {
    %c0_i32 = arith.constant 0 : i32
    %c0_i32_0 = arith.constant 0 : i32
    %c0_i32_1 = arith.constant 0 : i32
    return %arg0, %c0_i32, %c0_i32_0 : i32, i32, i32
  }
}

</mosaic_0001>

<bundles_post_ra>
// kernel: tpu_custom_call.1
= control target key start
LH: loop header
LB: loop body
LE: loop exit
PB: predicated region body
PF: predicated region fallthrough
CT: control target
= control target key end

     0   :  { %9 = vsyncpa [#allocation3], 0  ;;  %s5885_s0 = inlined_call_operand.hbm [shape: f32[16,16,256], index: 0, kind: input, shape index: {}]   ;;  %s5886_s1 = inlined_call_operand.vmem [shape: f32[16,16,1], index: 1, kind: input, shape index: {}]   ;;  %s5887_s2 = inlined_call_operand.vmem [shape: f32[16,16], index: 2, kind: input, shape index: {}]   ;;  %s5888_s3 = inlined_call_operand.vmem [shape: f32[16,16], index: 3, kind: input, shape index: {}]   ;;  %s5889_s4 = inlined_call_operand.hbm [shape: f32[2,8,256], index: 4, kind: output, shape index: {}]  }
   0x1   :  { %11 = vsyncpa [#allocation3 + $0x1], 0 }
   0x2   :  { %12 = vsyncpa [#allocation4], 0 }
   0x3   :  { %14 = vsyncpa [#allocation4 + $0x1], 0  ;;  %s3947_s15 = smov 0   ;;  %s3949_s16 = smov 0  }
   0x4   :  { %s3951_s17 = smov 0   ;;  %s3953_s18 = smov 0  }
   0x5 LB: > { %s3968_s19 = sadd.s32 4294967295, %s3898_s18   ;;  %s3567_s20 = sadd.s32 4294967294, %s3898_s18   ;;  %s3898_s18 = sphi %s3953_s18, %s5913_s18   ;;  %s3894_s17 = sphi %s3951_s17, %s5912_s17   ;;  %s3890_s16 = sphi %s3949_s16, %s5911_s16   ;;  %s3886_s15 = sphi %s3947_s15, %s5910_s15  }
   0x6   : > { %s3972_s21 = sadd.s32 1, %s3898_s18   ;;  %s27_s22 = sadd.s32 1, %s3894_s17 }
   0x7   : > { %s24_s23 = ssub.s32 %s3898_s18, %s3972_s21  ;;  %p34_p0 = scmp.ne.s32.totalorder %s3894_s17, %s3890_s16 }
   0x8   : > { %p25_p1 = scmp.eq.s32.totalorder %s24_s23, 0  ;;  %p35_p2 = scmp.eq.s32.totalorder %s3898_s18, 0 }
   0x9   : > { %p40_p3 = scmp.ne.s32.totalorder %s3890_s16, %s3886_s15  ;;  %p41_p4 = scmp.eq.s32.totalorder %s3968_s19, 0 }
   0xa   : > { %s3984_s24 = scalar_select %p25_p1, %s3894_s17, %s27_s22  }
   0xb   : > { %p3986_p5 = por %p35_p2, %p34_p0  ;;  %p3990_p6 = por %p41_p4, %p40_p3 }
   0xc   : > { %p132_p7 = scmp.eq.s32.totalorder %s3968_s19, 1  ;;  %p138_p8 = scmp.eq.s32.totalorder %s3567_s20, 1 }
   0xd   : > { %p3746_p10 = scmp.lt.s32.totalorder %s3898_s18, 2  ;;  %s164_s29 = sand.u32 1, %s3894_s17  }
   0xe   : > { %p3997_p11 = por %p132_p7, %p34_p0  ;;  %p4001_p12 = por %p138_p8, %p40_p3 }
   0xf   : > { %s3667_s30 = sshll.u32 %s3898_s18, 12  ;;  %s3570_s5 = sshll.u32 %s164_s29, 8 }
  0x10   : > { %s5899_s27 = scalar_select %p3997_p11, 1, 0 }
  0x11   : > { %s5900_s28 = scalar_select %p4001_p12, 1, 0 }
  0x12   : > { %s4010_s8 = scalar_lea.hbm %s5885_s0, %s3667_s30  ;;  %s168_s9 = scalar_lea.vmem [#allocation2], %s3570_s5 }
  0x13   : > { %s176_s10 = sshll.u32 %s168_s9, 4  ;;  %p4014_p13 = pnand %p3746_p10, %p3986_p5  ;;  %s4018_s10 = int_to_ptr.vmem [resolvable:$true] %s176_s10 }
  0x14   : > { %s4020_s12 = scalar_lea.sflag [#allocation3], %s164_s29  ;;  %s3802_s13 = scalar_lea.hbm %s4010_s8, 4096 }
  0x15   : > { %p3803_p0 = scmp.ne.s32.totalorder %s4010_s8, %s3802_s13  ;;  %p3804_p1 = pneg %p4014_p13 }
  0x16   : > { %s3807_s22 = scalar_lea.hbm %s5885_s0, 8192  ;;  %p3808_p4 = scmp.lt.u32.totalorder %s4010_s8, %s5885_s0 }
  0x17   : > { %p3805_p2 = pnand %p3804_p1, %p3803_p0  ;;  %p3809_p5 = scmp.lt.u32.totalorder %s3807_s22, %s3802_s13 }
  0x18   : > { %p3811_p8 = scmp.lt.u32.totalorder %s3802_s13, %s4010_s8 }
  0x19   : > { %p3806_p3 = pneg %p3805_p2  ;;  %p3810_p7 = por %p3809_p5, %p3808_p4 }
  0x1b   : > { %p3812_p10 = por %p3811_p8, %p3810_p7 }
  0x1d   : > { %p3813_p9 = pnand %p3812_p10, %p3806_p3 }
  0x1f   : > { %3816 = shalt.err (!%p3813_p9)
}
  0x20   : > { %s3817_s29 = scalar_lea.vmem %s4018_s10, 4096  ;;  %s3900_s30 = smov [#allocation2]  }
  0x21   : > { %p3818_p0 = scmp.ne.s32.totalorder %s4018_s10, %s3817_s29  ;;  %s3822_s5 = sshll.u32 %s3900_s30, 4  ;;  %s3823_s5 = int_to_ptr.vmem [resolvable:$false] %s3822_s5 }
  0x22   : > { %s3824_s6 = scalar_lea.vmem %s3823_s5, 8192  ;;  %p3825_p11 = scmp.lt.s32.totalorder %s4018_s10, %s3823_s5 }
  0x23   : > { %p3820_p2 = pnand %p3818_p0, %p3804_p1  ;;  %p3826_p4 = scmp.lt.s32.totalorder %s3824_s6, %s3817_s29 }
  0x25   : > { %p3821_p12 = pneg %p3820_p2  ;;  %p3827_p5 = por %p3826_p4, %p3825_p11 }
  0x27   : > { %p3828_p7 = pnand %p3827_p5, %p3821_p12 }
  0x29   : > { %3831 = shalt.err (!%p3828_p7)
}
  0x2a   : > { %s3901_s7 = smov 256   ;;  %s3902_s9 = smov 16  }
  0x2b   : > { %3741 = dma.hbm_to_vmem [thread:$0]  (!%p4014_p13), %s4010_s8, 4096, %s4018_s10, %s4020_s12, %s3901_s7, %s3901_s7, %s3902_s9  }
  0x2c   : > { %p3574_p9 = scmp.ge.s32.totalorder %s3898_s18, 1  ;;  %p194_p1 = scmp.lt.s32.totalorder %s3898_s18, 3 }
  0x2e   : > { %p195_p3 = pnand %p3574_p9, %p194_p1 }
  0x2f   : > { %s4051_s13 = sand.u32 (!%p195_p3), 1, %s3890_s16  }
  0x30   : > { %198 = sbr.rel (%p195_p3) target bundleno = 1127 (0x467), region = 36  ;;  %s3575_s14 = sshll.u32 (!%p195_p3), %s4051_s13, 8 }
  0x31   : > { %s201_s20 = scalar_lea.sflag (!%p195_p3), [#allocation3], %s4051_s13  ;;  %s4055_s22 = scalar_lea.vmem (!%p195_p3), [#allocation2], %s3575_s14 }
  0x37   : > { %3877 = dma.done.wait (%p3990_p6), %s201_s20, 4096  }
  0x38   : > { %3879 = vsyncadd (%p3990_p6), %s201_s20, 4294963200  ;;  %s3577_s8 = sshll.u32 %s3968_s19, 3  ;;  %v3903_v0 = vmov 0.0   ;;  %v3904_v1 = vmov 0   ;;  %v246_v2 = vld [vmem:[%s4055_s22 + $0x8] sm:$0xff]  ;;  %v248_v3 = vld [vmem:[%s4055_s22 + $0x18] sm:$0xff] }
  0x39   : > { %332 = vmatprep.mubr.f32.mxu0 %v3903_v0  ;;  %3800 = vset.pattern.permute.xlu0 %v3904_v1  ;;  %p237_p6 = scmp.lt.s32.totalorder %s3577_s8, 15  ;;  %v245_v4 = vld [vmem:[%s4055_s22] sm:$0xff]  ;;  %v3670_v5 = vpack.c.bf16 %v248_v3, %v246_v2  ;;  %v247_v6 = vld [vmem:[%s4055_s22 + $0x10] sm:$0xff]  ;;  %v3585_v8 = vld [vmem:[%s4055_s22 + $0x28] sm:$0xff]  ;;  %vm261_vm0 = vcmask 130048   ;;  %s3905_s14 = smov 126  }
  0x3a   : > { %3801 = vset.pattern.permute.xlu1 %v3904_v1  ;;  %429 = vmatprep.mubr.f32.mxu1 %v3903_v0  ;;  %v3672_v7 = vpack.c.bf16 %v247_v6, %v245_v4  ;;  %v3587_v9 = vld [vmem:[%s4055_s22 + $0x38] sm:$0xff]  ;;  %v3584_v10 = vld [vmem:[%s4055_s22 + $0x20] sm:$0xff]  ;;  %v3586_v12 = vld [vmem:[%s4055_s22 + $0x30] sm:$0xff]  ;;  %s3906_s20 = smov 127   ;;  %s3909_s26 = smov 111  }
  0x3b   : > { %s5915_s8 = smov (!%p237_p6, %s3577_s8), 15  ;;  %3671 = vmatprep.subr.bf16.mxu0 %v3670_v5  ;;  %v3678_v11 = vpack.c.bf16 %v3587_v9, %v3585_v8  ;;  %v3596_v13 = vld [vmem:[%s4055_s22 + $0x48] sm:$0xff]  ;;  %v3598_v14 = vld [vmem:[%s4055_s22 + $0x58] sm:$0xff]  ;;  %v4077_v15 = vld [vmem:[%s5887_s2] sm:$0xff]  ;;  %v3680_v16 = vpack.c.bf16 %v3586_v12, %v3584_v10  ;;  %s3910_s10 = smov 110  }
  0x3c   : > { %3673 = vmatpush1.bf16.msra.mxu0 %v3672_v7  ;;  %s3668_s11 = sshll.u32 %s5915_s8, 4  ;;  %v3686_v17 = vpack.c.bf16 %v3598_v14, %v3596_v13  ;;  %v4090_v18 = vld [vmem:[%s5887_s2 + $0x8] sm:$0xff]  ;;  %v3595_v19 = vld [vmem:[%s4055_s22 + $0x40] sm:$0xff]  ;;  %v3597_v20 = vld [vmem:[%s4055_s22 + $0x50] sm:$0xff]  ;;  %s3908_s8 = smov 112  }
  0x3d   : > { %3679 = vmatprep.subr.bf16.mxu0 %v3678_v11  ;;  %s4084_s25 = scalar_lea.vmem %s5886_s1, %s3668_s11  ;;  %v3607_v21 = vld [vmem:[%s4055_s22 + $0x68] sm:$0xff]  ;;  %v3609_v22 = vld [vmem:[%s4055_s22 + $0x78] sm:$0xff]  ;;  %v3688_v24 = vpack.c.bf16 %v3597_v20, %v3595_v19  ;;  %v3606_v29 = vld [vmem:[%s4055_s22 + $0x60] sm:$0xff]  ;;  %s3911_s11 = smov 109  }
  0x3e   : > { %v249_v23 = vld [vmem:[%s4084_s25] sm:$0xff]  ;;  %v250_v25 = vld [vmem:[%s4084_s25 + $0x8] sm:$0xff]  ;;  %v3694_v26 = vpack.c.bf16 %v3609_v22, %v3607_v21  ;;  %v3589_v27 = vld [vmem:[%s4084_s25 + $0x18] sm:$0xff]  ;;  %s3912_s12 = smov 96   ;;  %s3913_s23 = smov 95  }
  0x3f   : > { %3580 = vmatmul.mubr.msk.f32.vlgmr.msra.gmra.mrb[0].mxu0 %vm261_vm0, %v4077_v15  ;;  %253 = vperm.xlu0 %3800, %v249_v23   ;;  %v3588_v28 = vld [vmem:[%s4084_s25 + $0x10] sm:$0xff]  ;;  %v3618_v31 = vld [vmem:[%s4055_s22 + $0x88] sm:$0xff]  ;;  %v3620_v32 = vld [vmem:[%s4055_s22 + $0x98] sm:$0xff]  ;;  %s5893_s29 = smov 93   ;;  %s3916_s30 = smov 80  }
  0x40   : > { %338 = vmatprep.mubr.f32.mxu0 %v3903_v0  ;;  %3681 = vmatpush1.bf16.msra.mxu0 %v3680_v16  ;;  %v3608_v30 = vld [vmem:[%s4055_s22 + $0x70] sm:$0xff]  ;;  %v3599_v33 = vld [vmem:[%s4084_s25 + $0x20] sm:$0xff]  ;;  %v3600_v35 = vld [vmem:[%s4084_s25 + $0x28] sm:$0xff]  ;;  %v3702_v36 = vpack.c.bf16 %v3620_v32, %v3618_v31  ;;  %s3917_s5 = smov 79   ;;  %s5895_s6 = smov 78  }
  0x41   : > { %3687 = vmatprep.subr.bf16.mxu0 %v3686_v17  ;;  %680 = vperm.xlu1 %3801, %v3589_v27   ;;  %v3696_v34 = vpack.c.bf16 %v3608_v30, %v3606_v29  ;;  %v3610_v37 = vld [vmem:[%s4084_s25 + $0x30] sm:$0xff]  ;;  %v3611_v38 = vld [vmem:[%s4084_s25 + $0x38] sm:$0xff]  ;;  %v3617_v39 = vld [vmem:[%s4055_s22 + $0x80] sm:$0xff]  ;;  %s5891_s7 = smov 77   ;;  %s3576_s9 = sshll.u32 %s4051_s13, 4 }
  0x42   : > { %v3619_v40 = vld [vmem:[%s4055_s22 + $0x90] sm:$0xff]  ;;  %v3629_v41 = vld [vmem:[%s4055_s22 + $0xa8] sm:$0xff]  ;;  %v3631_v42 = vld [vmem:[%s4055_s22 + $0xb8] sm:$0xff]  ;;  %p5907_p12 = scmp.ne.s32.totalorder %s5899_s27, 0 }
  0x43   : > { %3581 = vmatmul.mubr.msk.f32.gmra.mrb[2].mxu0 %vm261_vm0, %v4090_v18  ;;  %258 = vperm.xlu0 %3800, %v250_v25   ;;  %v3621_v43 = vld [vmem:[%s4084_s25 + $0x40] sm:$0xff]  ;;  %v3704_v44 = vpack.c.bf16 %v3619_v40, %v3617_v39  ;;  %v3622_v45 = vld [vmem:[%s4084_s25 + $0x48] sm:$0xff]  ;;  %v3710_v46 = vpack.c.bf16 %v3631_v42, %v3629_v41  ;;  %v3632_v47 = vld [vmem:[%s4084_s25 + $0x50] sm:$0xff] }
  0x44   : > { %753 = vmatprep.mubr.f32.mxu0 %v3903_v0  ;;  %v3633_v48 = vld [vmem:[%s4084_s25 + $0x58] sm:$0xff]  ;;  %v3628_v49 = vld [vmem:[%s4055_s22 + $0xa0] sm:$0xff]  ;;  %v3630_v50 = vld [vmem:[%s4055_s22 + $0xb0] sm:$0xff] }
  0x45   : > { %1076 = vperm.xlu1 %3801, %v3599_v33   ;;  %v3640_v51 = vld [vmem:[%s4055_s22 + $0xc8] sm:$0xff]  ;;  %v3642_v52 = vld [vmem:[%s4055_s22 + $0xd8] sm:$0xff]  ;;  %v3643_v53 = vld [vmem:[%s4084_s25 + $0x60] sm:$0xff]  ;;  %v3712_v54 = vpack.c.bf16 %v3630_v50, %v3628_v49 }
  0x46   : > { %v3644_v55 = vld [vmem:[%s4084_s25 + $0x68] sm:$0xff]  ;;  %v3718_v56 = vpack.c.bf16 %v3642_v52, %v3640_v51  ;;  %v3654_v57 = vld [vmem:[%s4084_s25 + $0x70] sm:$0xff]  ;;  %v3655_v58 = vld [vmem:[%s4084_s25 + $0x78] sm:$0xff]  ;;  %s3914_s25 = smov 94  }
  0x47   : > { %3590 = vmatmul.mubr.msk.f32.vlgmr.msra.gmra.mrb[4].mxu0 %vm261_vm0, %v4077_v15  ;;  %675 = vperm.xlu0 %3800, %v3588_v28   ;;  %v3639_v59 = vld [vmem:[%s4055_s22 + $0xc0] sm:$0xff]  ;;  %v3641_v60 = vld [vmem:[%s4055_s22 + $0xd0] sm:$0xff]  ;;  %v3651_v61 = vld [vmem:[%s4055_s22 + $0xe8] sm:$0xff] }
  0x48   : > { %759 = vmatprep.mubr.f32.mxu0 %v3903_v0  ;;  %3689 = vmatpush1.bf16.msra.mxu0 %v3688_v24  ;;  %v3653_v62 = vld [vmem:[%s4055_s22 + $0xf8] sm:$0xff]  ;;  %v3720_v63 = vpack.c.bf16 %v3641_v60, %v3639_v59  ;;  %v3650_v2 = vld [vmem:[%s4055_s22 + $0xe0] sm:$0xff]  ;;  %v3652_v3 = vld [vmem:[%s4055_s22 + $0xf0] sm:$0xff]  ;;  %s3907_s22 = smov 125  }
  0x49   : > { %3695 = vmatprep.subr.bf16.mxu0 %v3694_v26  ;;  %1477 = vperm.xlu1 %3801, %v3610_v37   ;;  %v3726_v1 = vpack.c.bf16 %v3653_v62, %v3651_v61  ;;  %v3728_v4 = vpack.c.bf16 %v3652_v3, %v3650_v2  ;;  %v4177_v37 = vld [vmem:[%s5888_s3] sm:$0xff]  ;;  %v4185_v50 = vld [vmem:[%s5888_s3 + $0x8] sm:$0xff] }
  0x4b   : > { %3591 = vmatmul.mubr.msk.f32.gmra.mrb[6].mxu0 %vm261_vm0, %v4090_v18  ;;  %1081 = vperm.xlu0 %3800, %v3600_v35  }
  0x4c   : > { %1154 = vmatprep.mubr.f32.mxu0 %v3903_v0 }
  0x4d   : > { %1878 = vperm.xlu1 %3801, %v3621_v43  }
  0x4f   : > { %3601 = vmatmul.mubr.msk.f32.vlgmr.msra.gmra.mrb[8].mxu0 %vm261_vm0, %v4077_v15  ;;  %1482 = vperm.xlu0 %3800, %v3611_v38  }
  0x50   : > { %1160 = vmatprep.mubr.f32.mxu0 %v3903_v0  ;;  %3697 = vmatpush1.bf16.msra.mxu0 %v3696_v34 }
  0x51   : > { %3703 = vmatprep.subr.bf16.mxu0 %v3702_v36  ;;  %2279 = vperm.xlu1 %3801, %v3632_v47  }
  0x53   : > { %3602 = vmatmul.mubr.msk.f32.gmra.mrb[10].mxu0 %vm261_vm0, %v4090_v18  ;;  %1883 = vperm.xlu0 %3800, %v3622_v45  }
  0x54   : > { %1555 = vmatprep.mubr.f32.mxu0 %v3903_v0 }
  0x55   : > { %2680 = vperm.xlu1 %3801, %v3643_v53  }
  0x57   : > { %3612 = vmatmul.mubr.msk.f32.vlgmr.msra.gmra.mrb[12].mxu0 %vm261_vm0, %v4077_v15  ;;  %2284 = vperm.xlu0 %3800, %v3633_v48  }
  0x58   : > { %1561 = vmatprep.mubr.f32.mxu0 %v3903_v0  ;;  %3705 = vmatpush1.bf16.msra.mxu0 %v3704_v44 }
  0x59   : > { %3711 = vmatprep.subr.bf16.mxu0 %v3710_v46  ;;  %3081 = vperm.xlu1 %3801, %v3654_v57  }
  0x5b   : > { %3613 = vmatmul.mubr.msk.f32.gmra.mrb[14].mxu0 %vm261_vm0, %v4090_v18  ;;  %2685 = vperm.xlu0 %3800, %v3644_v55  }
  0x5c   : > { %1956 = vmatprep.mubr.f32.mxu0 %v3903_v0 }
  0x5f   : > { %3623 = vmatmul.mubr.msk.f32.vlgmr.msra.gmra.mrb[16].mxu0 %vm261_vm0, %v4077_v15  ;;  %3086 = vperm.xlu0 %3800, %v3655_v58  }
  0x60   : > { %1962 = vmatprep.mubr.f32.mxu0 %v3903_v0  ;;  %3713 = vmatpush1.bf16.msra.mxu0 %v3712_v54 }
  0x61   : > { %3719 = vmatprep.subr.bf16.mxu0 %v3718_v56 }
  0x63   : > { %3624 = vmatmul.mubr.msk.f32.gmra.mrb[18].mxu0 %vm261_vm0, %v4090_v18 }
  0x64   : > { %2357 = vmatprep.mubr.f32.mxu0 %v3903_v0 }
  0x67   : > { %3634 = vmatmul.mubr.msk.f32.vlgmr.msra.gmra.mrb[20].mxu0 %vm261_vm0, %v4077_v15 }
  0x68   : > { %2363 = vmatprep.mubr.f32.mxu0 %v3903_v0  ;;  %3721 = vmatpush1.bf16.msra.mxu0 %v3720_v63 }
  0x69   : > { %3727 = vmatprep.subr.bf16.mxu0 %v3726_v1 }
  0x6b   : > { %3635 = vmatmul.mubr.msk.f32.gmra.mrb[22].mxu0 %vm261_vm0, %v4090_v18 }
  0x6c   : > { %2758 = vmatprep.mubr.f32.mxu0 %v3903_v0 }
  0x6f   : > { %3645 = vmatmul.mubr.msk.f32.vlgmr.msra.gmra.mrb[24].mxu0 %vm261_vm0, %v4077_v15 }
  0x70   : > { %2764 = vmatprep.mubr.f32.mxu0 %v3903_v0  ;;  %3729 = vmatpush1.bf16.msra.mxu0 %v3728_v4 }
  0x73   : > { %3646 = vmatmul.mubr.msk.f32.gmra.mrb[26].mxu0 %vm261_vm0, %v4090_v18 }
  0x74   : > { %3159 = vmatprep.mubr.f32.mxu0 %v3903_v0 }
  0x77   : > { %3656 = vmatmul.mubr.msk.f32.vlgmr.msra.gmra.mrb[28].mxu0 %vm261_vm0, %v4077_v15 }
  0x78   : > { %3165 = vmatprep.mubr.f32.mxu0 %v3903_v0 }
  0x7b   : > { %3657 = vmatmul.mubr.msk.f32.gmra.mrb[30].mxu0 %vm261_vm0, %v4090_v18 }
  0xbe   : > { %v254_v5 = vpop.permute.xlu0 %253 }
  0xc0   : > { %v681_v26 = vpop.permute.xlu1 %680 }
  0xc2   : > { %v259_v9 = vpop.permute.xlu0 %258 }
  0xc4   : > { %v1077_v38 = vpop.permute.xlu1 %1076 }
  0xc6   : > { %v676_v15 = vpop.permute.xlu0 %675 }
  0xc8   : > { %v1478_v59 = vpop.permute.xlu1 %1477 }
  0xca   : > { %v1082_v53 = vpop.permute.xlu0 %1081 }
 0x112   : > { %v334_v6 = vpop.f32.mrb[0].mxu0 }
 0x113   : > { %v335_v7 = vadd.f32 %v334_v6, %v254_v5  ;;  %v336_v8 = vpop.f32.mrb[1].mxu0 }
 0x114   : > { %v337_v10 = vadd.f32 %v336_v8, %v254_v5 }
 0x115   : > { %v349_v12 = vmul.f32 0.2, %v335_v7  ;;  %vm345_vm1 = vcmp.gt.f32.partialorder %v335_v7, 0.0 }
 0x116   : > { %v340_v11 = vpop.f32.mrb[2].mxu0  ;;  %v350_v16 = vmul.f32 0.2, %v337_v10  ;;  %vm346_vm2 = vcmp.gt.f32.partialorder %v337_v10, 0.0 }
 0x117   : > { %v341_v13 = vadd.f32 %v340_v11, %v259_v9  ;;  %v342_v14 = vpop.f32.mrb[3].mxu0  ;;  %v353_v23 = vsel %vm345_vm1, %v335_v7, %v349_v12 }
 0x118   : > { %v343_v17 = vadd.f32 %v342_v14, %v259_v9  ;;  %v354_v27 = vsel %vm346_vm2, %v337_v10, %v350_v16  ;;  %v1483_v10 = vpop.permute.xlu0 %1482 }
 0x119   : > { %v351_v19 = vmul.f32 0.2, %v341_v13  ;;  %vm347_vm3 = vcmp.gt.f32.partialorder %v341_v13, 0.0 }
 0x11a   : > { %v352_v20 = vmul.f32 0.2, %v343_v17  ;;  %v755_v21 = vpop.f32.mrb[4].mxu0  ;;  %vm348_vm4 = vcmp.gt.f32.partialorder %v343_v17, 0.0 }
 0x11b   : > { %v756_v18 = vadd.f32 %v755_v21, %v676_v15  ;;  %v757_v22 = vpop.f32.mrb[5].mxu0  ;;  %v355_v24 = vsel %vm347_vm3, %v341_v13, %v351_v19 }
 0x11c   : > { %v758_v25 = vadd.f32 %v757_v22, %v676_v15  ;;  %v356_v28 = vsel %vm348_vm4, %v343_v17, %v352_v20  ;;  %v3676_v29 = vpack.c.bf16 %v355_v24, %v353_v23  ;;  %v1879_v17 = vpop.permute.xlu1 %1878 }
 0x11d   : > { %v3674_v30 = vpack.c.bf16 %v356_v28, %v354_v27  ;;  %v770_v32 = vmul.f32 0.2, %v756_v18  ;;  %vm766_vm5 = vcmp.gt.f32.partialorder %v756_v18, 0.0 }
 0x11e   : > { %v761_v31 = vpop.f32.mrb[6].mxu0  ;;  %v771_v35 = vmul.f32 0.2, %v758_v25  ;;  %vm767_vm6 = vcmp.gt.f32.partialorder %v758_v25, 0.0 }
 0x11f   : > { %v762_v33 = vadd.f32 %v761_v31, %v681_v26  ;;  %3675 = vmatprep.subr.bf16.mxu1 %v3674_v30  ;;  %v763_v34 = vpop.f32.mrb[7].mxu0  ;;  %v774_v42 = vsel %vm766_vm5, %v756_v18, %v770_v32  ;;  %v1884_v30 = vpop.permute.xlu0 %1883 }
 0x120   : > { %v764_v36 = vadd.f32 %v763_v34, %v681_v26  ;;  %3677 = vmatpush1.bf16.msra.mxu1 %v3676_v29  ;;  %v775_v48 = vsel %vm767_vm6, %v758_v25, %v771_v35 }
 0x121   : > { %vm768_vm7 = vcmp.gt.f32.partialorder %v762_v33, 0.0  ;;  %v772_v39 = vmul.f32 0.2, %v762_v33 }
 0x122   : > { %vm769_vm8 = vcmp.gt.f32.partialorder %v764_v36, 0.0  ;;  %v773_v40 = vmul.f32 0.2, %v764_v36  ;;  %v1156_v41 = vpop.f32.mrb[8].mxu0 }
 0x123   : > { %v776_v43 = vsel %vm768_vm7, %v762_v33, %v772_v39  ;;  %3582 = vmatmul.mubr.msk.f32.vlgmr.msra.gmra.mrb[0].mxu1 %vm261_vm0, %v4177_v37  ;;  %v1158_v44 = vpop.f32.mrb[9].mxu0  ;;  %v1157_v45 = vadd.f32 %v1156_v41, %v1077_v38 }
 0x124   : > { %v3684_v46 = vpack.c.bf16 %v776_v43, %v774_v42  ;;  %v1159_v47 = vadd.f32 %v1158_v44, %v1077_v38  ;;  %v777_v49 = vsel %vm769_vm8, %v764_v36, %v773_v40  ;;  %435 = vmatprep.mubr.f32.mxu1 %v3903_v0  ;;  %v2280_v36 = vpop.permute.xlu1 %2279 }
 0x125   : > { %v1171_v51 = vmul.f32 0.2, %v1157_v45  ;;  %v3682_v52 = vpack.c.bf16 %v777_v49, %v775_v48  ;;  %vm1167_vm9 = vcmp.gt.f32.partialorder %v1157_v45, 0.0 }
 0x126   : > { %v1172_v54 = vmul.f32 0.2, %v1159_v47  ;;  %v1162_v55 = vpop.f32.mrb[10].mxu0  ;;  %vm1168_vm10 = vcmp.gt.f32.partialorder %v1159_v47, 0.0 }
 0x127   : > { %v1163_v56 = vadd.f32 %v1162_v55, %v1082_v53  ;;  %3683 = vmatprep.subr.bf16.mxu1 %v3682_v52  ;;  %v1164_v57 = vpop.f32.mrb[11].mxu0  ;;  %3583 = vmatmul.mubr.msk.f32.gmra.mrb[2].mxu1 %vm261_vm0, %v4185_v50  ;;  %v1175_v61 = vsel %vm1167_vm9, %v1157_v45, %v1171_v51  ;;  %v2285_v52 = vpop.permute.xlu0 %2284 }
 0x128   : > { %v1165_v58 = vadd.f32 %v1164_v57, %v1082_v53  ;;  %3685 = vmatpush1.bf16.msra.mxu1 %v3684_v46  ;;  %850 = vmatprep.mubr.f32.mxu1 %v3903_v0  ;;  %v1176_v1 = vsel %vm1168_vm10, %v1159_v47, %v1172_v54 }
 0x129   : > { %vm1169_vm11 = vcmp.gt.f32.partialorder %v1163_v56, 0.0  ;;  %v1173_v60 = vmul.f32 0.2, %v1163_v56 }
 0x12a   : > { %vm1170_vm12 = vcmp.gt.f32.partialorder %v1165_v58, 0.0  ;;  %v1174_v62 = vmul.f32 0.2, %v1165_v58  ;;  %v1557_v63 = vpop.f32.mrb[12].mxu0 }
 0x12b   : > { %v1177_v2 = vsel %vm1169_vm11, %v1163_v56, %v1173_v60  ;;  %v1559_v3 = vpop.f32.mrb[13].mxu0  ;;  %v1558_v4 = vadd.f32 %v1557_v63, %v1478_v59  ;;  %3592 = vmatmul.mubr.msk.f32.vlgmr.msra.gmra.mrb[4].mxu1 %vm261_vm0, %v4177_v37 }
 0x12c   : > { %v3692_v5 = vpack.c.bf16 %v1177_v2, %v1175_v61  ;;  %v1560_v6 = vadd.f32 %v1559_v3, %v1478_v59  ;;  %v1178_v7 = vsel %vm1170_vm12, %v1165_v58, %v1174_v62  ;;  %856 = vmatprep.mubr.f32.mxu1 %v3903_v0  ;;  %v2681_v58 = vpop.permute.xlu1 %2680 }
 0x12d   : > { %v1572_v8 = vmul.f32 0.2, %v1558_v4  ;;  %v3690_v9 = vpack.c.bf16 %v1178_v7, %v1176_v1  ;;  %vm1568_vm13 = vcmp.gt.f32.partialorder %v1558_v4, 0.0 }
 0x12e   : > { %v1573_v11 = vmul.f32 0.2, %v1560_v6  ;;  %v1563_v12 = vpop.f32.mrb[14].mxu0  ;;  %vm1569_vm14 = vcmp.gt.f32.partialorder %v1560_v6, 0.0 }
 0x12f   : > { %v1564_v13 = vadd.f32 %v1563_v12, %v1483_v10  ;;  %3691 = vmatprep.subr.bf16.mxu1 %v3690_v9  ;;  %v1565_v14 = vpop.f32.mrb[15].mxu0  ;;  %3593 = vmatmul.mubr.msk.f32.gmra.mrb[6].mxu1 %vm261_vm0, %v4185_v50  ;;  %v1576_v15 = vsel %vm1568_vm13, %v1558_v4, %v1572_v8  ;;  %v2686_v9 = vpop.permute.xlu0 %2685 }
 0x130   : > { %v1566_v16 = vadd.f32 %v1565_v14, %v1483_v10  ;;  %3693 = vmatpush1.bf16.msra.mxu1 %v3692_v5  ;;  %1251 = vmatprep.mubr.f32.mxu1 %v3903_v0  ;;  %v1577_v18 = vsel %vm1569_vm14, %v1560_v6, %v1573_v11 }
 0x131   : > { %vm1570_vm15 = vcmp.gt.f32.partialorder %v1564_v13, 0.0  ;;  %v1574_v19 = vmul.f32 0.2, %v1564_v13 }
 0x132   : > { %vm1571_vm1 = vcmp.gt.f32.partialorder %v1566_v16, 0.0  ;;  %v1575_v20 = vmul.f32 0.2, %v1566_v16  ;;  %v1958_v21 = vpop.f32.mrb[16].mxu0 }
 0x133   : > { %v1578_v22 = vsel %vm1570_vm15, %v1564_v13, %v1574_v19  ;;  %v1960_v23 = vpop.f32.mrb[17].mxu0  ;;  %v1959_v24 = vadd.f32 %v1958_v21, %v1879_v17  ;;  %3603 = vmatmul.mubr.msk.f32.vlgmr.msra.gmra.mrb[8].mxu1 %vm261_vm0, %v4177_v37 }
 0x134   : > { %v3700_v25 = vpack.c.bf16 %v1578_v22, %v1576_v15  ;;  %v1961_v26 = vadd.f32 %v1960_v23, %v1879_v17  ;;  %v1579_v27 = vsel %vm1571_vm1, %v1566_v16, %v1575_v20  ;;  %1257 = vmatprep.mubr.f32.mxu1 %v3903_v0  ;;  %v3082_v16 = vpop.permute.xlu1 %3081 }
 0x135   : > { %v1973_v28 = vmul.f32 0.2, %v1959_v24  ;;  %v3698_v29 = vpack.c.bf16 %v1579_v27, %v1577_v18  ;;  %vm1969_vm2 = vcmp.gt.f32.partialorder %v1959_v24, 0.0 }
 0x136   : > { %v1974_v31 = vmul.f32 0.2, %v1961_v26  ;;  %v1964_v32 = vpop.f32.mrb[18].mxu0  ;;  %vm1970_vm3 = vcmp.gt.f32.partialorder %v1961_v26, 0.0 }
 0x137   : > { %v1965_v33 = vadd.f32 %v1964_v32, %v1884_v30  ;;  %3699 = vmatprep.subr.bf16.mxu1 %v3698_v29  ;;  %v1966_v34 = vpop.f32.mrb[19].mxu0  ;;  %3604 = vmatmul.mubr.msk.f32.gmra.mrb[10].mxu1 %vm261_vm0, %v4185_v50  ;;  %v1977_v39 = vsel %vm1969_vm2, %v1959_v24, %v1973_v28  ;;  %v3087_v29 = vpop.permute.xlu0 %3086 }
 0x138   : > { %v1967_v35 = vadd.f32 %v1966_v34, %v1884_v30  ;;  %3701 = vmatpush1.bf16.msra.mxu1 %v3700_v25  ;;  %1652 = vmatprep.mubr.f32.mxu1 %v3903_v0  ;;  %v1978_v42 = vsel %vm1970_vm3, %v1961_v26, %v1974_v31 }
 0x139   : > { %vm1971_vm4 = vcmp.gt.f32.partialorder %v1965_v33, 0.0  ;;  %v1975_v38 = vmul.f32 0.2, %v1965_v33 }
 0x13a   : > { %vm1972_vm5 = vcmp.gt.f32.partialorder %v1967_v35, 0.0  ;;  %v1976_v40 = vmul.f32 0.2, %v1967_v35  ;;  %v2359_v41 = vpop.f32.mrb[20].mxu0 }
 0x13b   : > { %v1979_v43 = vsel %vm1971_vm4, %v1965_v33, %v1975_v38  ;;  %v2361_v44 = vpop.f32.mrb[21].mxu0  ;;  %v2360_v45 = vadd.f32 %v2359_v41, %v2280_v36  ;;  %3614 = vmatmul.mubr.msk.f32.vlgmr.msra.gmra.mrb[12].mxu1 %vm261_vm0, %v4177_v37 }
 0x13c   : > { %v3708_v46 = vpack.c.bf16 %v1979_v43, %v1977_v39  ;;  %v2362_v47 = vadd.f32 %v2361_v44, %v2280_v36  ;;  %v1980_v48 = vsel %vm1972_vm5, %v1967_v35, %v1976_v40  ;;  %1658 = vmatprep.mubr.f32.mxu1 %v3903_v0 }
 0x13d   : > { %v2374_v49 = vmul.f32 0.2, %v2360_v45  ;;  %v3706_v51 = vpack.c.bf16 %v1980_v48, %v1978_v42  ;;  %vm2370_vm6 = vcmp.gt.f32.partialorder %v2360_v45, 0.0 }
 0x13e   : > { %v2375_v53 = vmul.f32 0.2, %v2362_v47  ;;  %v2365_v54 = vpop.f32.mrb[22].mxu0  ;;  %vm2371_vm7 = vcmp.gt.f32.partialorder %v2362_v47, 0.0 }
 0x13f   : > { %v2366_v55 = vadd.f32 %v2365_v54, %v2285_v52  ;;  %3707 = vmatprep.subr.bf16.mxu1 %v3706_v51  ;;  %v2367_v56 = vpop.f32.mrb[23].mxu0  ;;  %3615 = vmatmul.mubr.msk.f32.gmra.mrb[14].mxu1 %vm261_vm0, %v4185_v50  ;;  %v2378_v60 = vsel %vm2370_vm6, %v2360_v45, %v2374_v49 }
 0x140   : > { %v2368_v57 = vadd.f32 %v2367_v56, %v2285_v52  ;;  %3709 = vmatpush1.bf16.msra.mxu1 %v3708_v46  ;;  %2053 = vmatprep.mubr.f32.mxu1 %v3903_v0  ;;  %v2379_v63 = vsel %vm2371_vm7, %v2362_v47, %v2375_v53 }
 0x141   : > { %vm2372_vm8 = vcmp.gt.f32.partialorder %v2366_v55, 0.0  ;;  %v2376_v59 = vmul.f32 0.2, %v2366_v55 }
 0x142   : > { %vm2373_vm9 = vcmp.gt.f32.partialorder %v2368_v57, 0.0  ;;  %v2377_v61 = vmul.f32 0.2, %v2368_v57  ;;  %v2760_v62 = vpop.f32.mrb[24].mxu0 }
 0x143   : > { %v2380_v1 = vsel %vm2372_vm8, %v2366_v55, %v2376_v59  ;;  %v2762_v2 = vpop.f32.mrb[25].mxu0  ;;  %v2761_v3 = vadd.f32 %v2760_v62, %v2681_v58  ;;  %3625 = vmatmul.mubr.msk.f32.vlgmr.msra.gmra.mrb[16].mxu1 %vm261_vm0, %v4177_v37 }
 0x144   : > { %v3716_v4 = vpack.c.bf16 %v2380_v1, %v2378_v60  ;;  %v2763_v5 = vadd.f32 %v2762_v2, %v2681_v58  ;;  %v2381_v6 = vsel %vm2373_vm9, %v2368_v57, %v2377_v61  ;;  %2059 = vmatprep.mubr.f32.mxu1 %v3903_v0 }
 0x145   : > { %v2775_v7 = vmul.f32 0.2, %v2761_v3  ;;  %v3714_v8 = vpack.c.bf16 %v2381_v6, %v2379_v63  ;;  %vm2771_vm10 = vcmp.gt.f32.partialorder %v2761_v3, 0.0 }
 0x146   : > { %v2776_v10 = vmul.f32 0.2, %v2763_v5  ;;  %v2766_v11 = vpop.f32.mrb[26].mxu0  ;;  %vm2772_vm11 = vcmp.gt.f32.partialorder %v2763_v5, 0.0 }
 0x147   : > { %v2767_v12 = vadd.f32 %v2766_v11, %v2686_v9  ;;  %3715 = vmatprep.subr.bf16.mxu1 %v3714_v8  ;;  %v2768_v13 = vpop.f32.mrb[27].mxu0  ;;  %3626 = vmatmul.mubr.msk.f32.gmra.mrb[18].mxu1 %vm261_vm0, %v4185_v50  ;;  %v2779_v19 = vsel %vm2771_vm10, %v2761_v3, %v2775_v7 }
 0x148   : > { %v2769_v14 = vadd.f32 %v2768_v13, %v2686_v9  ;;  %3717 = vmatpush1.bf16.msra.mxu1 %v3716_v4  ;;  %2454 = vmatprep.mubr.f32.mxu1 %v3903_v0  ;;  %v2780_v21 = vsel %vm2772_vm11, %v2763_v5, %v2776_v10 }
 0x149   : > { %vm2773_vm12 = vcmp.gt.f32.partialorder %v2767_v12, 0.0  ;;  %v2777_v17 = vmul.f32 0.2, %v2767_v12 }
 0x14a   : > { %vm2774_vm13 = vcmp.gt.f32.partialorder %v2769_v14, 0.0  ;;  %v2778_v15 = vmul.f32 0.2, %v2769_v14  ;;  %v3161_v20 = vpop.f32.mrb[28].mxu0 }
 0x14b   : > { %v2781_v18 = vsel %vm2773_vm12, %v2767_v12, %v2777_v17  ;;  %v3163_v22 = vpop.f32.mrb[29].mxu0  ;;  %v3162_v23 = vadd.f32 %v3161_v20, %v3082_v16  ;;  %3636 = vmatmul.mubr.msk.f32.vlgmr.msra.gmra.mrb[20].mxu1 %vm261_vm0, %v4177_v37 }
 0x14c   : > { %v3724_v24 = vpack.c.bf16 %v2781_v18, %v2779_v19  ;;  %v3164_v25 = vadd.f32 %v3163_v22, %v3082_v16  ;;  %v2782_v26 = vsel %vm2774_vm13, %v2769_v14, %v2778_v15  ;;  %2460 = vmatprep.mubr.f32.mxu1 %v3903_v0 }
 0x14d   : > { %v3176_v27 = vmul.f32 0.2, %v3162_v23  ;;  %v3722_v28 = vpack.c.bf16 %v2782_v26, %v2780_v21  ;;  %vm3172_vm14 = vcmp.gt.f32.partialorder %v3162_v23, 0.0 }
 0x14e   : > { %v3177_v30 = vmul.f32 0.2, %v3164_v25  ;;  %v3167_v31 = vpop.f32.mrb[30].mxu0  ;;  %vm3173_vm15 = vcmp.gt.f32.partialorder %v3164_v25, 0.0 }
 0x14f   : > { %v3168_v32 = vadd.f32 %v3167_v31, %v3087_v29  ;;  %3723 = vmatprep.subr.bf16.mxu1 %v3722_v28  ;;  %v3169_v33 = vpop.f32.mrb[31].mxu0  ;;  %3637 = vmatmul.mubr.msk.f32.gmra.mrb[22].mxu1 %vm261_vm0, %v4185_v50  ;;  %v3180_v36 = vsel %vm3172_vm14, %v3162_v23, %v3176_v27 }
 0x150   : > { %v3170_v34 = vadd.f32 %v3169_v33, %v3087_v29  ;;  %3725 = vmatpush1.bf16.msra.mxu1 %v3724_v24  ;;  %2855 = vmatprep.mubr.f32.mxu1 %v3903_v0  ;;  %v3181_v39 = vsel %vm3173_vm15, %v3164_v25, %v3177_v30  ;;  %v3184_v30 = vld [vmem:[%s5888_s3] sm:$0xff] }
 0x151   : > { %vm3174_vm1 = vcmp.gt.f32.partialorder %v3168_v32, 0.0  ;;  %v3178_v35 = vmul.f32 0.2, %v3168_v32 }
 0x152   : > { %vm3175_vm2 = vcmp.gt.f32.partialorder %v3170_v34, 0.0  ;;  %v3179_v38 = vmul.f32 0.2, %v3170_v34 }
 0x153   : > { %v3182_v40 = vsel %vm3174_vm1, %v3168_v32, %v3178_v35  ;;  %3647 = vmatmul.mubr.msk.f32.vlgmr.msra.gmra.mrb[24].mxu1 %vm261_vm0, %v4177_v37 }
 0x154   : > { %v3732_v41 = vpack.c.bf16 %v3182_v40, %v3180_v36  ;;  %v3183_v42 = vsel %vm3175_vm2, %v3170_v34, %v3179_v38  ;;  %2861 = vmatprep.mubr.f32.mxu1 %v3903_v0 }
 0x155   : > { %v3730_v43 = vpack.c.bf16 %v3183_v42, %v3181_v39 }
 0x157   : > { %3731 = vmatprep.subr.bf16.mxu1 %v3730_v43  ;;  %3648 = vmatmul.mubr.msk.f32.gmra.mrb[26].mxu1 %vm261_vm0, %v4185_v50 }
 0x158   : > { %3733 = vmatpush1.bf16.msra.mxu1 %v3732_v41  ;;  %3256 = vmatprep.mubr.f32.mxu1 %v3903_v0 }
 0x15b   : > { %3658 = vmatmul.mubr.msk.f32.vlgmr.msra.gmra.mrb[28].mxu1 %vm261_vm0, %v3184_v30 }
 0x15c   : > { %3262 = vmatprep.mubr.f32.mxu1 %v3903_v0 }
 0x1f6   : > { %v4226_v44 = vpop.f32.mrb[0].mxu1 }
 0x1f7   : > { %v4228_v45 = vpop.f32.mrb[1].mxu1  ;;  %v459_v46 = vrot.slane %v4226_v44, 2  ;;  %v444_v37 = vrot.slane %v4226_v44, 1  ;;  %v472_v50 = vrot.slane %v4226_v44, 3  ;;  %v485_v52 = vrot.slane %v4226_v44, 4 }
 0x1f8   : > { %v445_v48 = vrot.slane %v4228_v45, 1  ;;  %v460_v53 = vrot.slane %v4228_v45, 2  ;;  %v496_v56 = vrot.slane %v4226_v44, 5  ;;  %v473_v57 = vrot.slane %v4228_v45, 3 }
 0x1f9   : > { %463 = vrot.lane.b32.xlu0 %v459_v46, %s3905_s14  ;;  %448 = vrot.lane.b32.xlu1 %v444_v37, %s3906_s20  ;;  %v509_v60 = vrot.slane %v4226_v44, 6  ;;  %v486_v61 = vrot.slane %v4228_v45, 4  ;;  %v522_v1 = vrot.slane %v4226_v44, 7  ;;  %v497_v2 = vrot.slane %v4228_v45, 5 }
 0x1fa   : > { %v4234_v47 = vpop.f32.mrb[2].mxu1  ;;  %v510_v3 = vrot.slane %v4228_v45, 6  ;;  %v523_v6 = vrot.slane %v4228_v45, 7 }
 0x1fb   : > { %v4238_v49 = vpop.f32.mrb[3].mxu1  ;;  %v544_v5 = vrot.slane %v4234_v47, 1  ;;  %v557_v7 = vrot.slane %v4234_v47, 2  ;;  %v570_v8 = vrot.slane %v4234_v47, 3  ;;  %v583_v10 = vrot.slane %v4234_v47, 4 }
 0x1fc   : > { %v545_v9 = vrot.slane %v4238_v49, 1  ;;  %v558_v11 = vrot.slane %v4238_v49, 2  ;;  %v594_v12 = vrot.slane %v4234_v47, 5  ;;  %v571_v13 = vrot.slane %v4238_v49, 3 }
 0x1fd   : > { %476 = vrot.lane.b32.xlu0 %v472_v50, %s3907_s22  ;;  %450 = vrot.lane.b32.xlu1 %v445_v48, %s3906_s20  ;;  %v607_v16 = vrot.slane %v4234_v47, 6  ;;  %v584_v17 = vrot.slane %v4238_v49, 4  ;;  %v620_v19 = vrot.slane %v4234_v47, 7  ;;  %v595_v15 = vrot.slane %v4238_v49, 5  ;;  %v3185_v50 = vld [vmem:[%s5888_s3 + $0x8] sm:$0xff] }
 0x1fe   : > { %v4242_v51 = vpop.f32.mrb[4].mxu1  ;;  %v608_v21 = vrot.slane %v4238_v49, 6  ;;  %v621_v23 = vrot.slane %v4238_v49, 7  ;;  %3659 = vmatmul.mubr.msk.f32.gmra.mrb[30].mxu1 %vm261_vm0, %v3185_v50 }
 0x1ff   : > { %v4246_v54 = vpop.f32.mrb[5].mxu1  ;;  %v865_v20 = vrot.slane %v4242_v51, 1  ;;  %v877_v22 = vrot.slane %v4242_v51, 2  ;;  %v889_v24 = vrot.slane %v4242_v51, 3  ;;  %v901_v26 = vrot.slane %v4242_v51, 4 }
 0x200   : > { %v866_v25 = vrot.slane %v4246_v54, 1  ;;  %v878_v27 = vrot.slane %v4246_v54, 2  ;;  %v911_v28 = vrot.slane %v4242_v51, 5  ;;  %v890_v29 = vrot.slane %v4246_v54, 3 }
 0x201   : > { %489 = vrot.lane.b32.xlu0 %v485_v52, %s3908_s8  ;;  %465 = vrot.lane.b32.xlu1 %v460_v53, %s3905_s14  ;;  %v923_v31 = vrot.slane %v4242_v51, 6  ;;  %v902_v32 = vrot.slane %v4246_v54, 4  ;;  %v935_v34 = vrot.slane %v4242_v51, 7  ;;  %v912_v35 = vrot.slane %v4246_v54, 5 }
 0x202   : > { %v4250_v55 = vpop.f32.mrb[6].mxu1  ;;  %v924_v36 = vrot.slane %v4246_v54, 6  ;;  %v936_v39 = vrot.slane %v4246_v54, 7 }
 0x203   : > { %v4254_v58 = vpop.f32.mrb[7].mxu1  ;;  %v955_v0 = vrot.slane %v4250_v55, 1  ;;  %v967_v40 = vrot.slane %v4250_v55, 2  ;;  %v979_v41 = vrot.slane %v4250_v55, 3  ;;  %v991_v43 = vrot.slane %v4250_v55, 4 }
 0x204   : > { %v956_v42 = vrot.slane %v4254_v58, 1  ;;  %v968_v46 = vrot.slane %v4254_v58, 2  ;;  %v1001_v37 = vrot.slane %v4250_v55, 5  ;;  %v992_v52 = vrot.slane %v4254_v58, 4 }
 0x205   : > { %500 = vrot.lane.b32.xlu0 %v496_v56, %s3909_s26  ;;  %478 = vrot.lane.b32.xlu1 %v473_v57, %s3907_s22  ;;  %v1025_v53 = vrot.slane %v4250_v55, 7  ;;  %v1002_v56 = vrot.slane %v4254_v58, 5 }
 0x206   : > { %v4258_v59 = vpop.f32.mrb[8].mxu1 }
 0x207   : > { %v4262_v62 = vpop.f32.mrb[9].mxu1  ;;  %v1266_v57 = vrot.slane %v4258_v59, 1 }
 0x209   : > { %513 = vrot.lane.b32.xlu0 %v509_v60, %s3910_s10  ;;  %491 = vrot.lane.b32.xlu1 %v486_v61, %s3908_s8 }
 0x20a   : > { %v4266_v63 = vpop.f32.mrb[10].mxu1 }
 0x20b   : > { %v4273_v4 = vpop.f32.mrb[11].mxu1 }
 0x20c   : > { %v1357_v50 = vrot.slane %v4273_v4, 1 }
 0x20d   : > { %526 = vrot.lane.b32.xlu0 %v522_v1, %s3911_s11  ;;  %502 = vrot.lane.b32.xlu1 %v497_v2, %s3909_s26  ;;  %v1014_v1 = vrot.slane %v4254_v58, 6 }
 0x20e   : > { %v4298_v14 = vpop.f32.mrb[12].mxu1 }
 0x20f   : > { %v4310_v18 = vpop.f32.mrb[13].mxu1 }
 0x211   : > { %515 = vrot.lane.b32.xlu1 %v510_v3, %s3910_s10  ;;  %535 = vrot.lane.b32.xlu0 %v4234_v47, %s3912_s12  ;;  %v980_v47 = vrot.slane %v4254_v58, 3 }
 0x212   : > { %v4339_v33 = vpop.f32.mrb[14].mxu1 }
 0x213   : > { %v4346_v38 = vpop.f32.mrb[15].mxu1 }
 0x215   : > { %528 = vrot.lane.b32.xlu1 %v523_v6, %s3911_s11  ;;  %548 = vrot.lane.b32.xlu0 %v544_v5, %s3913_s23  ;;  %v1026_v6 = vrot.slane %v4254_v58, 7 }
 0x216   : > { %v4375_v48 = vpop.f32.mrb[16].mxu1 }
 0x217   : > { %v4391_v2 = vpop.f32.mrb[17].mxu1 }
 0x219   : > { %561 = vrot.lane.b32.xlu0 %v557_v7, %s3914_s25  ;;  %537 = vrot.lane.b32.xlu1 %v4238_v49, %s3912_s12  ;;  %v1013_v49 = vrot.slane %v4250_v55, 6  ;;  %v1290_v7 = vrot.slane %v4258_v59, 3 }
 0x21d   : > { %574 = vrot.lane.b32.xlu0 %v570_v8, %s5893_s29  ;;  %550 = vrot.lane.b32.xlu1 %v545_v9, %s3913_s23  ;;  %v1267_v8 = vrot.slane %v4262_v62, 1 }
 0x221   : > { %587 = vrot.lane.b32.xlu0 %v583_v10, %s3916_s30  ;;  %563 = vrot.lane.b32.xlu1 %v558_v11, %s3914_s25 }
 0x225   : > { %598 = vrot.lane.b32.xlu0 %v594_v12, %s3917_s5  ;;  %576 = vrot.lane.b32.xlu1 %v571_v13, %s5893_s29  ;;  %v1279_v13 = vrot.slane %v4262_v62, 2 }
 0x229   : > { %611 = vrot.lane.b32.xlu0 %v607_v16, %s5895_s6  ;;  %589 = vrot.lane.b32.xlu1 %v584_v17, %s3916_s30 }
 0x22d   : > { %624 = vrot.lane.b32.xlu0 %v620_v19, %s5891_s7  ;;  %600 = vrot.lane.b32.xlu1 %v595_v15, %s3917_s5  ;;  %v1312_v19 = vrot.slane %v4258_v59, 5  ;;  %v1291_v15 = vrot.slane %v4262_v62, 3 }
 0x231   : > { %869 = vrot.lane.b32.xlu0 %v865_v20, %s3906_s20  ;;  %613 = vrot.lane.b32.xlu1 %v608_v21, %s5895_s6 }
 0x235   : > { %881 = vrot.lane.b32.xlu0 %v877_v22, %s3905_s14  ;;  %626 = vrot.lane.b32.xlu1 %v621_v23, %s5891_s7  ;;  %v1324_v22 = vrot.slane %v4258_v59, 6  ;;  %v1303_v23 = vrot.slane %v4262_v62, 4  ;;  %s5903_s7 = smov 93  }
 0x239   : > { %893 = vrot.lane.b32.xlu0 %v889_v24, %s3907_s22  ;;  %871 = vrot.lane.b32.xlu1 %v866_v25, %s3906_s20  ;;  %v4435_v24 = vpop.f32.mrb[18].mxu1 }
 0x23d   : > { %905 = vrot.lane.b32.xlu0 %v901_v26, %s3908_s8  ;;  %883 = vrot.lane.b32.xlu1 %v878_v27, %s3905_s14  ;;  %v1336_v27 = vrot.slane %v4258_v59, 7 }
 0x241   : > { %915 = vrot.lane.b32.xlu0 %v911_v28, %s3909_s26  ;;  %895 = vrot.lane.b32.xlu1 %v890_v29, %s3907_s22  ;;  %v1313_v28 = vrot.slane %v4262_v62, 5 }
 0x245   : > { %927 = vrot.lane.b32.xlu0 %v923_v31, %s3910_s10  ;;  %907 = vrot.lane.b32.xlu1 %v902_v32, %s3908_s8  ;;  %v1325_v31 = vrot.slane %v4262_v62, 6  ;;  %v4450_v32 = vpop.f32.mrb[19].mxu1 }
 0x249   : > { %939 = vrot.lane.b32.xlu0 %v935_v34, %s3911_s11  ;;  %917 = vrot.lane.b32.xlu1 %v912_v35, %s3909_s26  ;;  %v1356_v34 = vrot.slane %v4266_v63, 1 }
 0x24d   : > { %947 = vrot.lane.b32.xlu0 %v4250_v55, %s3912_s12  ;;  %929 = vrot.lane.b32.xlu1 %v924_v36, %s3910_s10  ;;  %v1278_v55 = vrot.slane %v4258_v59, 2 }
 0x251   : > { %959 = vrot.lane.b32.xlu0 %v955_v0, %s3913_s23  ;;  %941 = vrot.lane.b32.xlu1 %v936_v39, %s3911_s11  ;;  %v1337_v0 = vrot.slane %v4262_v62, 7  ;;  %v452_v39 = vlaneseq }
 0x253   : > { %vm4664_vm2 = vcmp.lt.s32.totalorder %v452_v39, 256 }
 0x255   : > { %971 = vrot.lane.b32.xlu0 %v967_v40, %s3914_s25  ;;  %949 = vrot.lane.b32.xlu1 %v4254_v58, %s3912_s12  ;;  %v1302_v58 = vrot.slane %v4258_v59, 4  ;;  %v1368_v40 = vrot.slane %v4266_v63, 2 }
 0x259   : > { %983 = vrot.lane.b32.xlu0 %v979_v41, %s5893_s29  ;;  %961 = vrot.lane.b32.xlu1 %v956_v42, %s3913_s23 }
 0x25d   : > { %995 = vrot.lane.b32.xlu0 %v991_v43, %s3916_s30  ;;  %973 = vrot.lane.b32.xlu1 %v968_v46, %s3914_s25  ;;  %v4469_v43 = vand.u32 127, %v452_v39 }
 0x25f   : > { %vm454_vm0 = vcmp.lt.s32.totalorder %v4469_v43, 127  ;;  %vm467_vm3 = vcmp.lt.s32.totalorder %v4469_v43, 126  ;;  %vm480_vm4 = vcmp.lt.s32.totalorder %v4469_v43, 125  ;;  %vm493_vm5 = vcmp.lt.s32.totalorder %v4469_v43, 112 }
 0x260   : > { %vm504_vm6 = vcmp.lt.s32.totalorder %v4469_v43, 111  ;;  %vm517_vm7 = vcmp.lt.s32.totalorder %v4469_v43, 110  ;;  %vm530_vm8 = vcmp.lt.s32.totalorder %v4469_v43, 109  ;;  %vm539_vm9 = vcmp.lt.s32.totalorder %v4469_v43, 96 }
 0x261   : > { %1005 = vrot.lane.b32.xlu0 %v1001_v37, %s3917_s5  ;;  %985 = vrot.lane.b32.xlu1 %v980_v47, %s5893_s29  ;;  %s5902_s29 = smov 77   ;;  %v1380_v47 = vrot.slane %v4266_v63, 3  ;;  %vm552_vm10 = vcmp.lt.s32.totalorder %v4469_v43, 95  ;;  %vm565_vm11 = vcmp.lt.s32.totalorder %v4469_v43, 94  ;;  %vm578_vm12 = vcmp.lt.s32.totalorder %v4469_v43, 93 }
 0x262   : > { %vm591_vm13 = vcmp.lt.s32.totalorder %v4469_v43, 80  ;;  %vm602_vm14 = vcmp.lt.s32.totalorder %v4469_v43, 79  ;;  %vm615_vm15 = vcmp.lt.s32.totalorder %v4469_v43, 78  ;;  %vm628_vm1 = vcmp.lt.s32.totalorder %v4469_v43, 77 }
 0x265   : > { %1017 = vrot.lane.b32.xlu0 %v1013_v49, %s5895_s6  ;;  %997 = vrot.lane.b32.xlu1 %v992_v52, %s3916_s30 }
 0x269   : > { %1029 = vrot.lane.b32.xlu0 %v1025_v53, %s5902_s29  ;;  %1007 = vrot.lane.b32.xlu1 %v1002_v56, %s3917_s5  ;;  %v1392_v53 = vrot.slane %v4266_v63, 4  ;;  %v1369_v56 = vrot.slane %v4273_v4, 2 }
 0x26b   : > { %v4386_v60 = vpop.permute.xlu0 %463  ;;  %v4388_v61 = vpop.permute.xlu1 %448 }
 0x26d   : > { %1270 = vrot.lane.b32.xlu0 %v1266_v57, %s3906_s20  ;;  %1019 = vrot.lane.b32.xlu1 %v1014_v1, %s5895_s6  ;;  %v1402_v57 = vrot.slane %v4266_v63, 5  ;;  %v1381_v1 = vrot.slane %v4273_v4, 3 }
 0x26f   : > { %v4396_v3 = vpop.permute.xlu0 %476  ;;  %v4398_v5 = vpop.permute.xlu1 %450 }
 0x271   : > { %1282 = vrot.lane.b32.xlu0 %v1278_v55, %s3905_s14  ;;  %1031 = vrot.lane.b32.xlu1 %v1026_v6, %s5902_s29  ;;  %v1414_v55 = vrot.slane %v4266_v63, 6  ;;  %v455_v6 = vsel %vm454_vm0, %v4388_v61, %v4398_v5 }
 0x273   : > { %v4405_v9 = vpop.permute.xlu0 %489  ;;  %v4407_v10 = vpop.permute.xlu1 %465 }
 0x275   : > { %1294 = vrot.lane.b32.xlu0 %v1290_v7, %s3907_s22  ;;  %1272 = vrot.lane.b32.xlu1 %v1267_v8, %s3906_s20  ;;  %v1393_v7 = vrot.slane %v4273_v4, 4  ;;  %v1426_v8 = vrot.slane %v4266_v63, 7 }
 0x277   : > { %v4411_v11 = vpop.permute.xlu0 %500  ;;  %v4413_v12 = vpop.permute.xlu1 %478 }
 0x279   : > { %1306 = vrot.lane.b32.xlu0 %v1302_v58, %s3908_s8  ;;  %1284 = vrot.lane.b32.xlu1 %v1279_v13, %s3905_s14  ;;  %v1403_v58 = vrot.slane %v4273_v4, 5  ;;  %v456_v13 = vsel %vm454_vm0, %v4398_v5, %v4388_v61  ;;  %v468_v61 = vsel %vm467_vm3, %v4386_v60, %v4407_v10  ;;  %v469_v5 = vsel %vm467_vm3, %v4407_v10, %v4386_v60 }
 0x27a   : > { %v4547_v60 = vshrl.u32 %v452_v39, 7 }
 0x27b   : > { %v4419_v16 = vpop.permute.xlu0 %513  ;;  %v4421_v17 = vpop.permute.xlu1 %491 }
 0x27d   : > { %1316 = vrot.lane.b32.xlu0 %v1312_v19, %s3909_s26  ;;  %1296 = vrot.lane.b32.xlu1 %v1291_v15, %s3907_s22  ;;  %v1415_v19 = vrot.slane %v4273_v4, 6 }
 0x27f   : > { %v4427_v20 = vpop.permute.xlu0 %526  ;;  %v4429_v21 = vpop.permute.xlu1 %502 }
 0x280   : > { %v505_v15 = vsel %vm504_vm6, %v4411_v11, %v4429_v21 }
 0x281   : > { %1328 = vrot.lane.b32.xlu0 %v1324_v22, %s3910_s10  ;;  %1308 = vrot.lane.b32.xlu1 %v1303_v23, %s3908_s8  ;;  %v457_v23 = vadd.f32 %v455_v6, %v4226_v44  ;;  %v494_v44 = vsel %vm493_vm5, %v4405_v9, %v4421_v17 }
 0x282   : > { %v507_v10 = vadd.f32 %v505_v15, %v494_v44 }
 0x283   : > { %v4437_v25 = vpop.permute.xlu1 %515  ;;  %v4439_v26 = vpop.permute.xlu0 %535 }
 0x285   : > { %1340 = vrot.lane.b32.xlu0 %v1336_v27, %s3911_s11  ;;  %1318 = vrot.lane.b32.xlu1 %v1313_v28, %s3909_s26  ;;  %v506_v27 = vsel %vm504_vm6, %v4429_v21, %v4411_v11  ;;  %v458_v28 = vadd.f32 %v456_v13, %v4228_v45  ;;  %v495_v45 = vsel %vm493_vm5, %v4421_v17, %v4405_v9  ;;  %v3920_v21 = vmov 1966171168  }
 0x286   : > { %v519_v11 = vsel %vm517_vm7, %v4437_v25, %v4419_v16 }
 0x287   : > { %v4445_v29 = vpop.permute.xlu1 %528  ;;  %v4447_v30 = vpop.permute.xlu0 %548 }
 0x288   : > { %v531_v6 = vsel %vm530_vm8, %v4427_v20, %v4445_v29 }
 0x289   : > { %1348 = vrot.lane.b32.xlu0 %v4266_v63, %s3912_s12  ;;  %1330 = vrot.lane.b32.xlu1 %v1325_v31, %s3910_s10  ;;  %v518_v31 = vsel %vm517_vm7, %v4419_v16, %v4437_v25  ;;  %v482_v16 = vsel %vm480_vm4, %v4413_v12, %v4396_v3 }
 0x28a   : > { %v520_v25 = vadd.f32 %v518_v31, %v507_v10 }
 0x28b   : > { %v4456_v35 = vpop.permute.xlu0 %561  ;;  %v4458_v36 = vpop.permute.xlu1 %537 }
 0x28d   : > { %1360 = vrot.lane.b32.xlu0 %v1356_v34, %s3913_s23  ;;  %1342 = vrot.lane.b32.xlu1 %v1337_v0, %s3911_s11  ;;  %v4557_v34 = vunpack.c.l.s4 %v3920_v21  ;;  %v4559_v0 = vpop.f32.mrb[20].mxu1 }
 0x28f   : > { %v4464_v41 = vpop.permute.xlu0 %574  ;;  %v4466_v42 = vpop.permute.xlu1 %550 }
 0x291   : > { %1372 = vrot.lane.b32.xlu0 %v1368_v40, %s3914_s25  ;;  %1350 = vrot.lane.b32.xlu1 %v4273_v4, %s3912_s12  ;;  %v470_v40 = vadd.f32 %v468_v61, %v457_v23 }
 0x293   : > { %v4474_v46 = vpop.permute.xlu0 %587  ;;  %v4476_v37 = vpop.permute.xlu1 %563 }
 0x294   : > { %v567_v15 = vsel %vm565_vm11, %v4476_v37, %v4456_v35 }
 0x295   : > { %1384 = vrot.lane.b32.xlu0 %v1380_v47, %s5903_s7  ;;  %1362 = vrot.lane.b32.xlu1 %v1357_v50, %s3913_s23  ;;  %v471_v47 = vadd.f32 %v469_v5, %v458_v28  ;;  %v481_v50 = vsel %vm480_vm4, %v4396_v3, %v4413_v12  ;;  %v532_v3 = vsel %vm530_vm8, %v4445_v29, %v4427_v20  ;;  %v1667_v12 = vrot.slane %v4298_v14, 1 }
 0x296   : > { %v644_v28 = vunpack.c.0.s8 %v4557_v34 }
 0x297   : > { %v599_v49 = vpop.permute.xlu0 %598  ;;  %v4491_v52 = vpop.permute.xlu1 %576 }
 0x299   : > { %1396 = vrot.lane.b32.xlu0 %v1392_v53, %s3916_s30  ;;  %1374 = vrot.lane.b32.xlu1 %v1369_v56, %s3914_s25  ;;  %v508_v53 = vadd.f32 %v506_v27, %v495_v45  ;;  %v553_v56 = vsel %vm552_vm10, %v4447_v30, %v4466_v42 }
 0x29b   : > { %v612_v22 = vpop.permute.xlu0 %611  ;;  %v590_v63 = vpop.permute.xlu1 %589 }
 0x29d   : > { %1406 = vrot.lane.b32.xlu0 %v1402_v57, %s3917_s5  ;;  %1386 = vrot.lane.b32.xlu1 %v1381_v1, %s5903_s7  ;;  %v554_v57 = vsel %vm552_vm10, %v4466_v42, %v4447_v30  ;;  %v521_v1 = vadd.f32 %v519_v11, %v508_v53  ;;  %v540_v30 = vsel %vm539_vm9, %v4439_v26, %v4458_v36 }
 0x29e   : > { %v541_v42 = vsel %vm539_vm9, %v4458_v36, %v4439_v26  ;;  %v555_v29 = vadd.f32 %v553_v56, %v540_v30  ;;  %v592_v36 = vsel %vm591_vm13, %v4474_v46, %v590_v63 }
 0x29f   : > { %v625_v9 = vpop.permute.xlu0 %624  ;;  %v601_v17 = vpop.permute.xlu1 %600  ;;  %v534_v31 = vadd.f32 %v532_v3, %v521_v1  ;;  %v4650_v3 = vsub.s32 %v644_v28, %v4547_v60  ;;  %v1704_v28 = vrot.slane %v4310_v18, 4 }
 0x2a0   : > { %v603_v13 = vsel %vm602_vm14, %v599_v49, %v601_v17  ;;  %v604_v20 = vsel %vm602_vm14, %v601_v17, %v599_v49  ;;  %v593_v49 = vsel %vm591_vm13, %v590_v63, %v4474_v46  ;;  %v483_v46 = vadd.f32 %v481_v50, %v470_v40  ;;  %v4637_v40 = vpop.f32.mrb[21].mxu1 }
 0x2a1   : > { %1418 = vrot.lane.b32.xlu0 %v1414_v55, %s5895_s6  ;;  %1398 = vrot.lane.b32.xlu1 %v1393_v7, %s3916_s30  ;;  %v556_v55 = vadd.f32 %v554_v57, %v541_v42  ;;  %v566_v7 = vsel %vm565_vm11, %v4456_v35, %v4476_v37  ;;  %v579_v35 = vsel %vm578_vm12, %v4464_v41, %v4491_v52  ;;  %v1668_v42 = vrot.slane %v4310_v18, 1 }
 0x2a2   : > { %v605_v37 = vadd.f32 %v603_v13, %v592_v36  ;;  %v606_v27 = vadd.f32 %v604_v20, %v593_v49  ;;  %v533_v63 = vadd.f32 %v531_v6, %v520_v25  ;;  %v568_v44 = vadd.f32 %v566_v7, %v555_v29 }
 0x2a3   : > { %v4608_v23 = vpop.permute.xlu0 %869  ;;  %v614_v26 = vpop.permute.xlu1 %613  ;;  %v569_v45 = vadd.f32 %v567_v15, %v556_v55  ;;  %v1427_v6 = vrot.slane %v4273_v4, 7  ;;  %v1680_v36 = vrot.slane %v4310_v18, 2 }
 0x2a4   : > { %v616_v61 = vsel %vm615_vm15, %v612_v22, %v614_v26  ;;  %v617_v5 = vsel %vm615_vm15, %v614_v26, %v612_v22  ;;  %v580_v22 = vsel %vm578_vm12, %v4491_v52, %v4464_v41  ;;  %v581_v17 = vadd.f32 %v579_v35, %v568_v44 }
 0x2a5   : > { %1430 = vrot.lane.b32.xlu0 %v1426_v8, %s5902_s29  ;;  %1408 = vrot.lane.b32.xlu1 %v1403_v58, %s3917_s5  ;;  %v618_v10 = vadd.f32 %v616_v61, %v605_v37  ;;  %v619_v11 = vadd.f32 %v617_v5, %v606_v27  ;;  %v484_v8 = vadd.f32 %v482_v16, %v471_v47  ;;  %v1679_v52 = vrot.slane %v4298_v14, 2 }
 0x2a6   : > { %v582_v50 = vadd.f32 %v580_v22, %v569_v45  ;;  %v633_v47 = vadd.f32 %v533_v63, %v483_v46  ;;  %v1703_v26 = vrot.slane %v4298_v14, 4  ;;  %v1713_v61 = vrot.slane %v4298_v14, 5  ;;  %v4697_v46 = vpop.f32.mrb[22].mxu1 }
 0x2a7   : > { %v4631_v21 = vpop.permute.xlu0 %881  ;;  %v627_v53 = vpop.permute.xlu1 %626  ;;  %v634_v16 = vadd.f32 %v534_v31, %v484_v8  ;;  %v1692_v5 = vrot.slane %v4310_v18, 3  ;;  %v1725_v27 = vrot.slane %v4298_v14, 6  ;;  %v1737_v22 = vrot.slane %v4298_v14, 7 }
 0x2a8   : > { %v629_v58 = vsel %vm628_vm1, %v625_v9, %v627_v53  ;;  %v630_v34 = vsel %vm628_vm1, %v627_v53, %v625_v9  ;;  %v1714_v31 = vrot.slane %v4310_v18, 5  ;;  %v4710_v53 = vpop.f32.mrb[23].mxu1  ;;  %v1757_v8 = vrot.slane %v4339_v33, 1 }
 0x2a9   : > { %v631_v25 = vadd.f32 %v629_v58, %v618_v10  ;;  %v632_v41 = vadd.f32 %v630_v34, %v619_v11  ;;  %1671 = vrot.lane.b32.xlu0 %v1667_v12, %s3906_s20  ;;  %1420 = vrot.lane.b32.xlu1 %v1415_v19, %s5895_s6  ;;  %v1691_v19 = vrot.slane %v4298_v14, 3  ;;  %s4676_s6 = scalar_lea.vmem [#allocation5], %s3576_s9  ;;  %v1726_v11 = vrot.slane %v4310_v18, 6  ;;  %s5906_s9 = smov 78  }
 0x2aa   : > { %v1738_v34 = vrot.slane %v4310_v18, 7 }
 0x2ab   : > { %v635_v56 = vadd.f32 %v631_v25, %v581_v17  ;;  %v636_v57 = vadd.f32 %v632_v41, %v582_v50  ;;  %v4644_v1 = vpop.permute.xlu0 %893  ;;  %v4646_v9 = vpop.permute.xlu1 %871  ;;  %v1769_v50 = vrot.slane %v4339_v33, 2 }
 0x2ad   : > { %v637_v12 = vadd.f32 %v635_v56, %v633_v47  ;;  %v638_v30 = vadd.f32 %v636_v57, %v634_v16  ;;  %1683 = vrot.lane.b32.xlu0 %v1679_v52, %s3905_s14  ;;  %1432 = vrot.lane.b32.xlu1 %v1427_v6, %s5902_s29  ;;  %v1781_v16 = vrot.slane %v4339_v33, 3  ;;  %v1758_v56 = vrot.slane %v4346_v38, 1 }
 0x2af   : > { %v641_v13 = vcombine.low %v637_v12, %v638_v30  ;;  %v4657_v20 = vpop.permute.xlu0 %905  ;;  %v4659_v29 = vpop.permute.xlu1 %883  ;;  %v1793_v12 = vrot.slane %v4339_v33, 4  ;;  %v1770_v30 = vrot.slane %v4346_v38, 2 }
 0x2b1   : > { %v648_v4 = vrot.slane %v641_v13, %v4650_v3  ;;  %1695 = vrot.lane.b32.xlu0 %v1691_v19, %s3907_s22  ;;  %1673 = vrot.lane.b32.xlu1 %v1668_v42, %s3906_s20  ;;  %v873_v19 = vsel %vm454_vm0, %v4608_v23, %v4646_v9  ;;  %v874_v42 = vsel %vm454_vm0, %v4646_v9, %v4608_v23  ;;  %v1803_v13 = vrot.slane %v4339_v33, 5 }
 0x2b2   : > { %v1804_v9 = vrot.slane %v4346_v38, 5 }
 0x2b3   : > { %v655_v55 = vrot.slane %v648_v4, %v4650_v3  ;;  %v4670_v7 = vpop.permute.xlu0 %915  ;;  %v4672_v15 = vpop.permute.xlu1 %895 }
 0x2b5   : > { %661 = vst.msk [vmem:[%s4676_s6] ss:$8 sm:$0x3] %vm4664_vm2, %v655_v55  ;;  %1707 = vrot.lane.b32.xlu0 %v1703_v26, %s3908_s8  ;;  %1685 = vrot.lane.b32.xlu1 %v1680_v36, %s3905_s14  ;;  %v1782_v26 = vrot.slane %v4346_v38, 3  ;;  %v1815_v36 = vrot.slane %v4339_v33, 6 }
 0x2b7   : > { %v4683_v39 = vpop.permute.xlu0 %927  ;;  %v4685_v49 = vpop.permute.xlu1 %907 }
 0x2b9   : > { %1717 = vrot.lane.b32.xlu0 %v1713_v61, %s3909_s26  ;;  %1697 = vrot.lane.b32.xlu1 %v1692_v5, %s3907_s22  ;;  %v1794_v61 = vrot.slane %v4346_v38, 4  ;;  %v1827_v5 = vrot.slane %v4339_v33, 7 }
 0x2bb   : > { %v4691_v35 = vpop.permute.xlu0 %939  ;;  %v918_v37 = vpop.permute.xlu1 %917 }
 0x2bc   : > { %v920_v23 = vsel %vm504_vm6, %v918_v37, %v4670_v7 }
 0x2bd   : > { %1729 = vrot.lane.b32.xlu0 %v1725_v27, %s3910_s10  ;;  %1709 = vrot.lane.b32.xlu1 %v1704_v28, %s3908_s8  ;;  %v919_v27 = vsel %vm504_vm6, %v4670_v7, %v918_v37  ;;  %v1816_v28 = vrot.slane %v4346_v38, 6  ;;  %v909_v7 = vsel %vm493_vm5, %v4657_v20, %v4685_v49 }
 0x2be   : > { %v921_v37 = vadd.f32 %v919_v27, %v909_v7 }
 0x2bf   : > { %v4699_v63 = vpop.permute.xlu0 %947  ;;  %v930_v44 = vpop.permute.xlu1 %929 }
 0x2c1   : > { %1741 = vrot.lane.b32.xlu0 %v1737_v22, %s3911_s11  ;;  %1719 = vrot.lane.b32.xlu1 %v1714_v31, %s3909_s26  ;;  %v875_v22 = vadd.f32 %v873_v19, %v4242_v51  ;;  %v876_v31 = vadd.f32 %v874_v42, %v4246_v54  ;;  %v910_v51 = vsel %vm493_vm5, %v4685_v49, %v4657_v20  ;;  %v2080_v20 = vrot.slane %v4375_v48, 2 }
 0x2c2   : > { %v931_v54 = vsel %vm517_vm7, %v4683_v39, %v930_v44 }
 0x2c3   : > { %v4705_v45 = vpop.permute.xlu0 %959  ;;  %v4707_v10 = vpop.permute.xlu1 %941 }
 0x2c4   : > { %v943_v19 = vsel %vm530_vm8, %v4691_v35, %v4707_v10  ;;  %v944_v42 = vsel %vm530_vm8, %v4707_v10, %v4691_v35 }
 0x2c5   : > { %1749 = vrot.lane.b32.xlu0 %v4339_v33, %s3912_s12  ;;  %1731 = vrot.lane.b32.xlu1 %v1726_v11, %s3910_s10  ;;  %v885_v33 = vsel %vm467_vm3, %v4631_v21, %v4659_v29  ;;  %v886_v11 = vsel %vm467_vm3, %v4659_v29, %v4631_v21  ;;  %v932_v21 = vsel %vm517_vm7, %v930_v44, %v4683_v39  ;;  %v4788_v29 = vpop.f32.mrb[24].mxu1 }
 0x2c6   : > { %v887_v49 = vadd.f32 %v885_v33, %v875_v22  ;;  %v898_v39 = vsel %vm480_vm4, %v4672_v15, %v4644_v1  ;;  %v933_v44 = vadd.f32 %v931_v54, %v921_v37 }
 0x2c7   : > { %v4716_v17 = vpop.permute.xlu0 %971  ;;  %v4718_v58 = vpop.permute.xlu1 %949 }
 0x2c8   : > { %v951_v35 = vsel %vm539_vm9, %v4699_v63, %v4718_v58  ;;  %v952_v10 = vsel %vm539_vm9, %v4718_v58, %v4699_v63 }
 0x2c9   : > { %1761 = vrot.lane.b32.xlu0 %v1757_v8, %s3913_s23  ;;  %1743 = vrot.lane.b32.xlu1 %v1738_v34, %s3911_s11  ;;  %v922_v8 = vadd.f32 %v920_v23, %v910_v51 }
 0x2cb   : > { %v4724_v25 = vpop.permute.xlu0 %983  ;;  %v962_v41 = vpop.permute.xlu1 %961 }
 0x2cd   : > { %1773 = vrot.lane.b32.xlu0 %v1769_v50, %s3914_s25  ;;  %1751 = vrot.lane.b32.xlu1 %v4346_v38, %s3912_s12 }
 0x2cf   : > { %v4729_v52 = vpop.permute.xlu0 %995  ;;  %v974_v47 = vpop.permute.xlu1 %973 }
 0x2d1   : > { %1785 = vrot.lane.b32.xlu0 %v1781_v16, %s5903_s7  ;;  %1763 = vrot.lane.b32.xlu1 %v1758_v56, %s3913_s23  ;;  %v2068_v16 = vrot.slane %v4375_v48, 1  ;;  %v888_v56 = vadd.f32 %v886_v11, %v876_v31  ;;  %v945_v31 = vadd.f32 %v943_v19, %v933_v44  ;;  %v4862_v44 = vpop.f32.mrb[25].mxu1 }
 0x2d3   : > { %v1006_v57 = vpop.permute.xlu0 %1005  ;;  %v4735_v6 = vpop.permute.xlu1 %985  ;;  %v900_v37 = vadd.f32 %v898_v39, %v888_v56 }
 0x2d4   : > { %v987_v11 = vsel %vm578_vm12, %v4724_v25, %v4735_v6 }
 0x2d5   : > { %1797 = vrot.lane.b32.xlu0 %v1793_v12, %s3916_s30  ;;  %1775 = vrot.lane.b32.xlu1 %v1770_v30, %s3914_s25  ;;  %v897_v12 = vsel %vm480_vm4, %v4644_v1, %v4672_v15  ;;  %v934_v30 = vadd.f32 %v932_v21, %v922_v8  ;;  %v964_v1 = vsel %vm552_vm10, %v962_v41, %v4705_v45 }
 0x2d6   : > { %v966_v22 = vadd.f32 %v964_v1, %v952_v10  ;;  %v899_v21 = vadd.f32 %v897_v12, %v887_v49 }
 0x2d7   : > { %v1018_v4 = vpop.permute.xlu0 %1017  ;;  %v998_v55 = vpop.permute.xlu1 %997  ;;  %v946_v33 = vadd.f32 %v944_v42, %v934_v30 }
 0x2d8   : > { %v1000_v27 = vsel %vm591_vm13, %v998_v55, %v4729_v52  ;;  %v1037_v49 = vadd.f32 %v945_v31, %v899_v21  ;;  %v4910_v31 = vpop.f32.mrb[26].mxu1  ;;  %v2158_v21 = vrot.slane %v4435_v24, 1 }
 0x2d9   : > { %1807 = vrot.lane.b32.xlu0 %v1803_v13, %s3917_s5  ;;  %1787 = vrot.lane.b32.xlu1 %v1782_v26, %s5903_s7  ;;  %v963_v13 = vsel %vm552_vm10, %v4705_v45, %v962_v41  ;;  %v975_v45 = vsel %vm565_vm11, %v4716_v17, %v974_v47  ;;  %v976_v41 = vsel %vm565_vm11, %v974_v47, %v4716_v17 }
 0x2da   : > { %v965_v23 = vadd.f32 %v963_v13, %v951_v35  ;;  %v1038_v56 = vadd.f32 %v946_v33, %v900_v37 }
 0x2db   : > { %v1030_v34 = vpop.permute.xlu0 %1029  ;;  %v1008_v50 = vpop.permute.xlu1 %1007 }
 0x2dc   : > { %v1009_v15 = vsel %vm602_vm14, %v1006_v57, %v1008_v50  ;;  %v1010_v26 = vsel %vm602_vm14, %v1008_v50, %v1006_v57 }
 0x2dd   : > { %1819 = vrot.lane.b32.xlu0 %v1815_v36, %s5906_s9  ;;  %1799 = vrot.lane.b32.xlu1 %v1794_v61, %s3916_s30  ;;  %v999_v61 = vsel %vm591_vm13, %v4729_v52, %v998_v55  ;;  %v1012_v47 = vadd.f32 %v1010_v26, %v1000_v27  ;;  %v988_v52 = vsel %vm578_vm12, %v4735_v6, %v4724_v25 }
 0x2de   : > { %v1011_v17 = vadd.f32 %v1009_v15, %v999_v61  ;;  %v978_v55 = vadd.f32 %v976_v41, %v966_v22  ;;  %v2104_v41 = vrot.slane %v4375_v48, 4 }
 0x2df   : > { %v4834_v57 = vpop.permute.xlu0 %1270  ;;  %v1020_v36 = vpop.permute.xlu1 %1019 }
 0x2e0   : > { %v1021_v63 = vsel %vm615_vm15, %v1018_v4, %v1020_v36  ;;  %v1022_v58 = vsel %vm615_vm15, %v1020_v36, %v1018_v4  ;;  %v977_v4 = vadd.f32 %v975_v45, %v965_v23  ;;  %v990_v6 = vadd.f32 %v988_v52, %v978_v55 }
 0x2e1   : > { %1831 = vrot.lane.b32.xlu0 %v1827_v5, %s5902_s29  ;;  %1809 = vrot.lane.b32.xlu1 %v1804_v9, %s3917_s5  ;;  %v1023_v7 = vadd.f32 %v1021_v63, %v1011_v17  ;;  %v1024_v51 = vadd.f32 %v1022_v58, %v1012_v47  ;;  %v2081_v36 = vrot.slane %v4391_v2, 2  ;;  %v2114_v63 = vrot.slane %v4375_v48, 5 }
 0x2e2   : > { %v989_v25 = vadd.f32 %v987_v11, %v977_v4  ;;  %v2093_v58 = vrot.slane %v4391_v2, 3  ;;  %v2126_v17 = vrot.slane %v4375_v48, 6  ;;  %v2105_v47 = vrot.slane %v4391_v2, 4 }
 0x2e3   : > { %v4856_v54 = vpop.permute.xlu0 %1282  ;;  %v1032_v5 = vpop.permute.xlu1 %1031  ;;  %v2138_v52 = vrot.slane %v4375_v48, 7  ;;  %v2115_v4 = vrot.slane %v4391_v2, 5 }
 0x2e4   : > { %v1033_v8 = vsel %vm628_vm1, %v1030_v34, %v1032_v5  ;;  %v1034_v50 = vsel %vm628_vm1, %v1032_v5, %v1030_v34  ;;  %v1828_v34 = vrot.slane %v4346_v38, 7  ;;  %v4923_v5 = vpop.f32.mrb[27].mxu1 }
 0x2e5   : > { %v1035_v9 = vadd.f32 %v1033_v8, %v1023_v7  ;;  %v1036_v30 = vadd.f32 %v1034_v50, %v1024_v51  ;;  %2072 = vrot.lane.b32.xlu0 %v2068_v16, %s3906_s20  ;;  %1821 = vrot.lane.b32.xlu1 %v1816_v28, %s5906_s9  ;;  %v2092_v16 = vrot.slane %v4375_v48, 3  ;;  %v2069_v28 = vrot.slane %v4391_v2, 1 }
 0x2e6   : > { %v2127_v51 = vrot.slane %v4391_v2, 6  ;;  %v2139_v50 = vrot.slane %v4391_v2, 7 }
 0x2e7   : > { %v1039_v12 = vadd.f32 %v1035_v9, %v989_v25  ;;  %v1040_v39 = vadd.f32 %v1036_v30, %v990_v6  ;;  %v4868_v19 = vpop.permute.xlu0 %1294  ;;  %v4870_v42 = vpop.permute.xlu1 %1272  ;;  %v2170_v25 = vrot.slane %v4435_v24, 2 }
 0x2e9   : > { %v1041_v13 = vadd.f32 %v1039_v12, %v1037_v49  ;;  %v1042_v1 = vadd.f32 %v1040_v39, %v1038_v56  ;;  %2084 = vrot.lane.b32.xlu0 %v2080_v20, %s3905_s14  ;;  %1833 = vrot.lane.b32.xlu1 %v1828_v34, %s5902_s29  ;;  %v2182_v56 = vrot.slane %v4435_v24, 3  ;;  %v2159_v12 = vrot.slane %v4450_v32, 1 }
 0x2eb   : > { %v1045_v15 = vcombine.low %v1041_v13, %v1042_v1  ;;  %v4877_v26 = vpop.permute.xlu0 %1306  ;;  %v4879_v35 = vpop.permute.xlu1 %1284  ;;  %v2194_v13 = vrot.slane %v4435_v24, 4  ;;  %v2171_v1 = vrot.slane %v4450_v32, 2 }
 0x2ed   : > { %v1052_v10 = vrot.slane %v1045_v15, %v4650_v3  ;;  %2096 = vrot.lane.b32.xlu0 %v2092_v16, %s3907_s22  ;;  %2074 = vrot.lane.b32.xlu1 %v2069_v28, %s3906_s20  ;;  %v1274_v16 = vsel %vm454_vm0, %v4834_v57, %v4870_v42  ;;  %v1275_v28 = vsel %vm454_vm0, %v4870_v42, %v4834_v57  ;;  %v2205_v42 = vrot.slane %v4450_v32, 5 }
 0x2ef   : > { %v1059_v38 = vrot.slane %v1052_v10, %v4650_v3  ;;  %v4885_v20 = vpop.permute.xlu0 %1316  ;;  %v4887_v45 = vpop.permute.xlu1 %1296 }
 0x2f1   : > { %3594 = vst.msk [vmem:[%s4676_s6 + $0x1] ss:$8 sm:$0x3] %vm4664_vm2, %v1059_v38  ;;  %2108 = vrot.lane.b32.xlu0 %v2104_v41, %s3908_s8  ;;  %2086 = vrot.lane.b32.xlu1 %v2081_v36, %s3905_s14  ;;  %v2204_v38 = vrot.slane %v4435_v24, 5  ;;  %v2183_v41 = vrot.slane %v4450_v32, 3  ;;  %v2216_v36 = vrot.slane %v4435_v24, 6 }
 0x2f3   : > { %v4896_v61 = vpop.permute.xlu0 %1328  ;;  %v4898_v27 = vpop.permute.xlu1 %1308 }
 0x2f5   : > { %2118 = vrot.lane.b32.xlu0 %v2114_v63, %s3909_s26  ;;  %2098 = vrot.lane.b32.xlu1 %v2093_v58, %s3907_s22  ;;  %v2195_v63 = vrot.slane %v4450_v32, 4  ;;  %v2228_v58 = vrot.slane %v4435_v24, 7 }
 0x2f7   : > { %v4904_v23 = vpop.permute.xlu0 %1340  ;;  %v1319_v22 = vpop.permute.xlu1 %1318 }
 0x2f8   : > { %v1321_v57 = vsel %vm504_vm6, %v1319_v22, %v4885_v20 }
 0x2f9   : > { %2130 = vrot.lane.b32.xlu0 %v2126_v17, %s3910_s10  ;;  %2110 = vrot.lane.b32.xlu1 %v2105_v47, %s3908_s8  ;;  %v1320_v17 = vsel %vm504_vm6, %v4885_v20, %v1319_v22  ;;  %v2217_v47 = vrot.slane %v4450_v32, 6  ;;  %v1287_v20 = vsel %vm467_vm3, %v4879_v35, %v4856_v54  ;;  %v4987_v22 = vpop.f32.mrb[28].mxu1 }
 0x2fb   : > { %v4912_v33 = vpop.permute.xlu0 %1348  ;;  %v1331_v11 = vpop.permute.xlu1 %1330 }
 0x2fd   : > { %2142 = vrot.lane.b32.xlu0 %v2138_v52, %s3911_s11  ;;  %2120 = vrot.lane.b32.xlu1 %v2115_v4, %s3909_s26  ;;  %v1276_v52 = vadd.f32 %v1274_v16, %v4258_v59  ;;  %v1277_v4 = vadd.f32 %v1275_v28, %v4262_v62  ;;  %v1310_v59 = vsel %vm493_vm5, %v4877_v26, %v4898_v27 }
 0x2fe   : > { %v1311_v62 = vsel %vm493_vm5, %v4898_v27, %v4877_v26  ;;  %v1298_v26 = vsel %vm480_vm4, %v4868_v19, %v4887_v45 }
 0x2ff   : > { %v4918_v55 = vpop.permute.xlu0 %1360  ;;  %v4920_v7 = vpop.permute.xlu1 %1342 }
 0x300   : > { %v1344_v16 = vsel %vm530_vm8, %v4904_v23, %v4920_v7  ;;  %v1345_v28 = vsel %vm530_vm8, %v4920_v7, %v4904_v23 }
 0x301   : > { %2150 = vrot.lane.b32.xlu0 %v4435_v24, %s3912_s12  ;;  %2132 = vrot.lane.b32.xlu1 %v2127_v51, %s3910_s10  ;;  %v1286_v24 = vsel %vm467_vm3, %v4856_v54, %v4879_v35  ;;  %v1332_v51 = vsel %vm517_vm7, %v4896_v61, %v1331_v11  ;;  %v1333_v54 = vsel %vm517_vm7, %v1331_v11, %v4896_v61 }
 0x302   : > { %v1299_v61 = vsel %vm480_vm4, %v4887_v45, %v4868_v19 }
 0x303   : > { %v4929_v37 = vpop.permute.xlu0 %1372  ;;  %v4931_v8 = vpop.permute.xlu1 %1350 }
 0x304   : > { %v1352_v23 = vsel %vm539_vm9, %v4912_v33, %v4931_v8  ;;  %v1353_v7 = vsel %vm539_vm9, %v4931_v8, %v4912_v33 }
 0x305   : > { %2162 = vrot.lane.b32.xlu0 %v2158_v21, %s3913_s23  ;;  %2144 = vrot.lane.b32.xlu1 %v2139_v50, %s3911_s11  ;;  %v1322_v50 = vadd.f32 %v1320_v17, %v1310_v59 }
 0x307   : > { %v4937_v6 = vpop.permute.xlu0 %1384  ;;  %v1363_v9 = vpop.permute.xlu1 %1362  ;;  %v1334_v27 = vadd.f32 %v1332_v51, %v1322_v50 }
 0x308   : > { %v1364_v19 = vsel %vm552_vm10, %v4918_v55, %v1363_v9  ;;  %v1365_v45 = vsel %vm552_vm10, %v1363_v9, %v4918_v55 }
 0x309   : > { %2174 = vrot.lane.b32.xlu0 %v2170_v25, %s3914_s25  ;;  %2152 = vrot.lane.b32.xlu1 %v4450_v32, %s3912_s12  ;;  %v1323_v25 = vadd.f32 %v1321_v57, %v1311_v62  ;;  %v1366_v8 = vadd.f32 %v1364_v19, %v1352_v23  ;;  %v2505_v23 = vrot.slane %v4559_v0, 4 }
 0x30b   : > { %v4942_v30 = vpop.permute.xlu0 %1396  ;;  %v1375_v49 = vpop.permute.xlu1 %1374  ;;  %v1335_v11 = vadd.f32 %v1333_v54, %v1323_v25 }
 0x30c   : > { %v1376_v55 = vsel %vm565_vm11, %v4929_v37, %v1375_v49  ;;  %v1377_v9 = vsel %vm565_vm11, %v1375_v49, %v4929_v37  ;;  %v1346_v49 = vadd.f32 %v1344_v16, %v1334_v27 }
 0x30d   : > { %2186 = vrot.lane.b32.xlu0 %v2182_v56, %s5903_s7  ;;  %2164 = vrot.lane.b32.xlu1 %v2159_v12, %s3913_s23  ;;  %v2469_v56 = vrot.slane %v4559_v0, 1  ;;  %v2481_v12 = vrot.slane %v4559_v0, 2 }
 0x30f   : > { %v1407_v39 = vpop.permute.xlu0 %1406  ;;  %v4948_v34 = vpop.permute.xlu1 %1386 }
 0x311   : > { %2198 = vrot.lane.b32.xlu0 %v2194_v13, %s3916_s30  ;;  %2176 = vrot.lane.b32.xlu1 %v2171_v1, %s3914_s25  ;;  %v1288_v13 = vadd.f32 %v1286_v24, %v1276_v52  ;;  %v1289_v1 = vadd.f32 %v1287_v20, %v1277_v4  ;;  %v1367_v52 = vadd.f32 %v1365_v45, %v1353_v7 }
 0x312   : > { %v1347_v24 = vadd.f32 %v1345_v28, %v1335_v11  ;;  %v1378_v20 = vadd.f32 %v1376_v55, %v1366_v8 }
 0x313   : > { %v1419_v15 = vpop.permute.xlu0 %1418  ;;  %v1399_v10 = vpop.permute.xlu1 %1398  ;;  %v1379_v59 = vadd.f32 %v1377_v9, %v1367_v52  ;;  %v1300_v54 = vadd.f32 %v1298_v26, %v1288_v13  ;;  %v2229_v13 = vrot.slane %v4450_v32, 7  ;;  %v2482_v9 = vrot.slane %v4637_v40, 2 }
 0x314   : > { %v2527_v52 = vrot.slane %v4559_v0, 6 }
 0x315   : > { %2208 = vrot.lane.b32.xlu0 %v2204_v38, %s3917_s5  ;;  %2188 = vrot.lane.b32.xlu1 %v2183_v41, %s5903_s7 }
 0x317   : > { %v1431_v35 = vpop.permute.xlu0 %1430  ;;  %v1409_v21 = vpop.permute.xlu1 %1408 }
 0x318   : > { %v1410_v38 = vsel %vm602_vm14, %v1407_v39, %v1409_v21  ;;  %v1411_v41 = vsel %vm602_vm14, %v1409_v21, %v1407_v39  ;;  %v1400_v39 = vsel %vm591_vm13, %v4942_v30, %v1399_v10  ;;  %v1301_v21 = vadd.f32 %v1299_v61, %v1289_v1 }
 0x319   : > { %2220 = vrot.lane.b32.xlu0 %v2216_v36, %s5906_s9  ;;  %2200 = vrot.lane.b32.xlu1 %v2195_v63, %s3916_s30  ;;  %v1401_v63 = vsel %vm591_vm13, %v1399_v10, %v4942_v30  ;;  %v1412_v4 = vadd.f32 %v1410_v38, %v1400_v39  ;;  %v1388_v30 = vsel %vm578_vm12, %v4937_v6, %v4948_v34 }
 0x31a   : > { %v1413_v37 = vadd.f32 %v1411_v41, %v1401_v63  ;;  %v1438_v1 = vadd.f32 %v1346_v49, %v1300_v54  ;;  %v1439_v26 = vadd.f32 %v1347_v24, %v1301_v21  ;;  %v2515_v63 = vrot.slane %v4559_v0, 5 }
 0x31b   : > { %v5033_v36 = vpop.permute.xlu0 %1671  ;;  %v1421_v17 = vpop.permute.xlu1 %1420  ;;  %v2559_v54 = vrot.slane %v4697_v46, 1 }
 0x31c   : > { %v1422_v57 = vsel %vm615_vm15, %v1419_v15, %v1421_v17  ;;  %v1423_v33 = vsel %vm615_vm15, %v1421_v17, %v1419_v15  ;;  %v1389_v15 = vsel %vm578_vm12, %v4948_v34, %v4937_v6  ;;  %v1390_v6 = vadd.f32 %v1388_v30, %v1378_v20 }
 0x31d   : > { %2232 = vrot.lane.b32.xlu0 %v2228_v58, %s5902_s29  ;;  %2210 = vrot.lane.b32.xlu1 %v2205_v42, %s3917_s5  ;;  %v5071_v58 = vpop.f32.mrb[29].mxu1  ;;  %v1424_v62 = vadd.f32 %v1422_v57, %v1412_v4  ;;  %v1425_v42 = vadd.f32 %v1423_v33, %v1413_v37  ;;  %v1391_v34 = vadd.f32 %v1389_v15, %v1379_v59  ;;  %v2494_v33 = vrot.slane %v4637_v40, 3 }
 0x31e   : > { %v2506_v37 = vrot.slane %v4637_v40, 4  ;;  %v5123_v49 = vpop.f32.mrb[30].mxu1  ;;  %v2539_v30 = vrot.slane %v4559_v0, 7  ;;  %v2516_v20 = vrot.slane %v4637_v40, 5 }
 0x31f   : > { %v5069_v10 = vpop.permute.xlu0 %1683  ;;  %v1433_v51 = vpop.permute.xlu1 %1432 }
 0x320   : > { %v1434_v50 = vsel %vm628_vm1, %v1431_v35, %v1433_v51  ;;  %v1435_v25 = vsel %vm628_vm1, %v1433_v51, %v1431_v35  ;;  %v2493_v35 = vrot.slane %v4559_v0, 3  ;;  %v2528_v51 = vrot.slane %v4637_v40, 6 }
 0x321   : > { %2473 = vrot.lane.b32.xlu0 %v2469_v56, %s3906_s20  ;;  %v1436_v27 = vadd.f32 %v1434_v50, %v1424_v62  ;;  %v1437_v11 = vadd.f32 %v1435_v25, %v1425_v42  ;;  %2222 = vrot.lane.b32.xlu1 %v2217_v47, %s5906_s9  ;;  %v2470_v47 = vrot.slane %v4637_v40, 1  ;;  %v5133_v62 = vpop.f32.mrb[31].mxu1  ;;  %v2540_v25 = vrot.slane %v4637_v40, 7 }
 0x323   : > { %v5081_v16 = vpop.permute.xlu0 %1695  ;;  %v1440_v61 = vadd.f32 %v1436_v27, %v1390_v6  ;;  %v1441_v28 = vadd.f32 %v1437_v11, %v1391_v34  ;;  %v5084_v19 = vpop.permute.xlu1 %1673  ;;  %v2571_v6 = vrot.slane %v4697_v46, 2 }
 0x325   : > { %2485 = vrot.lane.b32.xlu0 %v2481_v12, %s3905_s14  ;;  %v1442_v56 = vadd.f32 %v1440_v61, %v1438_v1  ;;  %v1443_v45 = vadd.f32 %v1441_v28, %v1439_v26  ;;  %2234 = vrot.lane.b32.xlu1 %v2229_v13, %s5902_s29  ;;  %v2583_v13 = vrot.slane %v4697_v46, 3  ;;  %v2560_v26 = vrot.slane %v4710_v53, 1 }
 0x326   : > { %v2595_v28 = vrot.slane %v4697_v46, 4 }
 0x327   : > { %v5090_v38 = vpop.permute.xlu0 %1707  ;;  %v1446_v32 = vcombine.low %v1442_v56, %v1443_v45  ;;  %v5092_v41 = vpop.permute.xlu1 %1685  ;;  %v2572_v56 = vrot.slane %v4710_v53, 2  ;;  %v1675_v45 = vsel %vm454_vm0, %v5033_v36, %v5084_v19 }
 0x329   : > { %2497 = vrot.lane.b32.xlu0 %v2493_v35, %s3907_s22  ;;  %v1453_v17 = vrot.slane %v1446_v32, %v4650_v3  ;;  %2475 = vrot.lane.b32.xlu1 %v2470_v47, %s3906_s20  ;;  %v1676_v47 = vsel %vm454_vm0, %v5084_v19, %v5033_v36  ;;  %v2606_v19 = vrot.slane %v4710_v53, 5 }
 0x32b   : > { %v5097_v12 = vpop.permute.xlu0 %1717  ;;  %v1460_v7 = vrot.slane %v1453_v17, %v4650_v3  ;;  %v5101_v55 = vpop.permute.xlu1 %1697  ;;  %v2605_v17 = vrot.slane %v4697_v46, 5 }
 0x32d   : > { %2509 = vrot.lane.b32.xlu0 %v2505_v23, %s3908_s8  ;;  %3605 = vst.msk [vmem:[%s4676_s6 + $0x2] ss:$8 sm:$0x3] %vm4664_vm2, %v1460_v7  ;;  %2487 = vrot.lane.b32.xlu1 %v2482_v9, %s3905_s14  ;;  %v2584_v7 = vrot.slane %v4710_v53, 3  ;;  %v2617_v9 = vrot.slane %v4697_v46, 6 }
 0x32f   : > { %v5109_v39 = vpop.permute.xlu0 %1729  ;;  %v5112_v57 = vpop.permute.xlu1 %1709 }
 0x331   : > { %2519 = vrot.lane.b32.xlu0 %v2515_v63, %s3909_s26  ;;  %2499 = vrot.lane.b32.xlu1 %v2494_v33, %s3907_s22  ;;  %v2596_v63 = vrot.slane %v4710_v53, 4  ;;  %v2629_v33 = vrot.slane %v4697_v46, 7 }
 0x333   : > { %v5117_v8 = vpop.permute.xlu0 %1741  ;;  %v1720_v4 = vpop.permute.xlu1 %1719 }
 0x334   : > { %v1722_v36 = vsel %vm504_vm6, %v1720_v4, %v5097_v12 }
 0x335   : > { %2531 = vrot.lane.b32.xlu0 %v2527_v52, %s3910_s10  ;;  %2511 = vrot.lane.b32.xlu1 %v2506_v37, %s3908_s8  ;;  %v1721_v52 = vsel %vm504_vm6, %v5097_v12, %v1720_v4  ;;  %v2618_v37 = vrot.slane %v4710_v53, 6  ;;  %v1688_v12 = vsel %vm467_vm3, %v5092_v41, %v5069_v10  ;;  %v1711_v4 = vsel %vm493_vm5, %v5090_v38, %v5112_v57 }
 0x337   : > { %v5125_v24 = vpop.permute.xlu0 %1749  ;;  %v1732_v15 = vpop.permute.xlu1 %1731 }
 0x339   : > { %2543 = vrot.lane.b32.xlu0 %v2539_v30, %s3911_s11  ;;  %2521 = vrot.lane.b32.xlu1 %v2516_v20, %s3909_s26  ;;  %v1677_v30 = vadd.f32 %v1675_v45, %v4298_v14  ;;  %v1678_v20 = vadd.f32 %v1676_v47, %v4310_v18  ;;  %v1712_v14 = vsel %vm493_vm5, %v5112_v57, %v5090_v38 }
 0x33a   : > { %v1733_v18 = vsel %vm517_vm7, %v5109_v39, %v1732_v15  ;;  %v1699_v38 = vsel %vm480_vm4, %v5081_v16, %v5101_v55 }
 0x33b   : > { %v5131_v59 = vpop.permute.xlu0 %1761  ;;  %v5135_v42 = vpop.permute.xlu1 %1743 }
 0x33c   : > { %v1746_v45 = vsel %vm530_vm8, %v5135_v42, %v5117_v8 }
 0x33d   : > { %2551 = vrot.lane.b32.xlu0 %v4697_v46, %s3912_s12  ;;  %2533 = vrot.lane.b32.xlu1 %v2528_v51, %s3910_s10  ;;  %v1687_v46 = vsel %vm467_vm3, %v5069_v10, %v5092_v41  ;;  %v1734_v10 = vsel %vm517_vm7, %v1732_v15, %v5109_v39  ;;  %v1723_v51 = vadd.f32 %v1721_v52, %v1711_v4 }
 0x33e   : > { %v1700_v39 = vsel %vm480_vm4, %v5101_v55, %v5081_v16 }
 0x33f   : > { %v5142_v21 = vpop.permute.xlu0 %1773  ;;  %v5144_v50 = vpop.permute.xlu1 %1751  ;;  %v1735_v57 = vadd.f32 %v1733_v18, %v1723_v51 }
 0x341   : > { %2563 = vrot.lane.b32.xlu0 %v2559_v54, %s3913_s23  ;;  %2545 = vrot.lane.b32.xlu1 %v2540_v25, %s3911_s11  ;;  %v1724_v54 = vadd.f32 %v1722_v36, %v1712_v14 }
 0x343   : > { %v5150_v34 = vpop.permute.xlu0 %1785  ;;  %v1764_v27 = vpop.permute.xlu1 %1763  ;;  %v1736_v15 = vadd.f32 %v1734_v10, %v1724_v54 }
 0x344   : > { %v1765_v16 = vsel %vm552_vm10, %v5131_v59, %v1764_v27  ;;  %v1766_v55 = vsel %vm552_vm10, %v1764_v27, %v5131_v59 }
 0x345   : > { %2575 = vrot.lane.b32.xlu0 %v2571_v6, %s3914_s25  ;;  %2553 = vrot.lane.b32.xlu1 %v4710_v53, %s3912_s12  ;;  %v2870_v6 = vrot.slane %v4788_v29, 1 }
 0x347   : > { %v5155_v11 = vpop.permute.xlu0 %1797  ;;  %v1776_v1 = vpop.permute.xlu1 %1775 }
 0x348   : > { %v1777_v59 = vsel %vm565_vm11, %v5142_v21, %v1776_v1  ;;  %v1778_v27 = vsel %vm565_vm11, %v1776_v1, %v5142_v21 }
 0x349   : > { %2587 = vrot.lane.b32.xlu0 %v2583_v13, %s5903_s7  ;;  %2565 = vrot.lane.b32.xlu1 %v2560_v26, %s3913_s23  ;;  %v2882_v13 = vrot.slane %v4788_v29, 2  ;;  %v1689_v26 = vadd.f32 %v1687_v46, %v1677_v30 }
 0x34b   : > { %v1808_v61 = vpop.permute.xlu0 %1807  ;;  %v5162_v35 = vpop.permute.xlu1 %1787 }
 0x34d   : > { %2599 = vrot.lane.b32.xlu0 %v2595_v28, %s3916_s30  ;;  %2577 = vrot.lane.b32.xlu1 %v2572_v56, %s3914_s25  ;;  %v1690_v28 = vadd.f32 %v1688_v12, %v1678_v20  ;;  %v1745_v56 = vsel %vm530_vm8, %v5117_v8, %v5135_v42  ;;  %v1753_v8 = vsel %vm539_vm9, %v5125_v24, %v5144_v50 }
 0x34e   : > { %v1754_v42 = vsel %vm539_vm9, %v5144_v50, %v5125_v24  ;;  %v1767_v52 = vadd.f32 %v1765_v16, %v1753_v8  ;;  %v1747_v30 = vadd.f32 %v1745_v56, %v1735_v57  ;;  %v1748_v20 = vadd.f32 %v1746_v45, %v1736_v15 }
 0x34f   : > { %v1820_v32 = vpop.permute.xlu0 %1819  ;;  %v1800_v23 = vpop.permute.xlu1 %1799  ;;  %v1768_v36 = vadd.f32 %v1766_v55, %v1754_v42  ;;  %v1702_v18 = vadd.f32 %v1700_v39, %v1690_v28 }
 0x351   : > { %2609 = vrot.lane.b32.xlu0 %v2605_v17, %s3917_s5  ;;  %2589 = vrot.lane.b32.xlu1 %v2584_v7, %s5903_s7  ;;  %v1780_v46 = vadd.f32 %v1778_v27, %v1768_v36  ;;  %v2907_v36 = vrot.slane %v4862_v44, 4 }
 0x353   : > { %v1832_v41 = vpop.permute.xlu0 %1831  ;;  %v1810_v25 = vpop.permute.xlu1 %1809 }
 0x354   : > { %v1811_v47 = vsel %vm602_vm14, %v1808_v61, %v1810_v25  ;;  %v1812_v17 = vsel %vm602_vm14, %v1810_v25, %v1808_v61 }
 0x355   : > { %2621 = vrot.lane.b32.xlu0 %v2617_v9, %s5906_s9  ;;  %2601 = vrot.lane.b32.xlu1 %v2596_v63, %s3916_s30  ;;  %v1801_v9 = vsel %vm591_vm13, %v5155_v11, %v1800_v23  ;;  %v1802_v63 = vsel %vm591_vm13, %v1800_v23, %v5155_v11  ;;  %v1789_v11 = vsel %vm578_vm12, %v5150_v34, %v5162_v35 }
 0x356   : > { %v1813_v21 = vadd.f32 %v1811_v47, %v1801_v9  ;;  %v1814_v1 = vadd.f32 %v1812_v17, %v1802_v63  ;;  %v2906_v17 = vrot.slane %v4788_v29, 4  ;;  %v2895_v63 = vrot.slane %v4862_v44, 3 }
 0x357   : > { %v5244_v7 = vpop.permute.xlu0 %2072  ;;  %v1822_v61 = vpop.permute.xlu1 %1821 }
 0x358   : > { %v1823_v24 = vsel %vm615_vm15, %v1820_v32, %v1822_v61  ;;  %v1824_v50 = vsel %vm615_vm15, %v1822_v61, %v1820_v32  ;;  %v1790_v32 = vsel %vm578_vm12, %v5162_v35, %v5150_v34  ;;  %v2916_v61 = vrot.slane %v4788_v29, 5 }
 0x359   : > { %2633 = vrot.lane.b32.xlu0 %v2629_v33, %s5902_s29  ;;  %2611 = vrot.lane.b32.xlu1 %v2606_v19, %s3917_s5  ;;  %v1779_v33 = vadd.f32 %v1777_v59, %v1767_v52  ;;  %v1825_v12 = vadd.f32 %v1823_v24, %v1813_v21  ;;  %v1826_v4 = vadd.f32 %v1824_v50, %v1814_v1  ;;  %v2883_v59 = vrot.slane %v4862_v44, 2 }
 0x35a   : > { %v1701_v19 = vadd.f32 %v1699_v38, %v1689_v26  ;;  %v1792_v25 = vadd.f32 %v1790_v32, %v1780_v46  ;;  %v2630_v26 = vrot.slane %v4710_v53, 7  ;;  %v1840_v38 = vadd.f32 %v1748_v20, %v1702_v18 }
 0x35b   : > { %v5280_v23 = vpop.permute.xlu0 %2084  ;;  %v1834_v14 = vpop.permute.xlu1 %1833  ;;  %v1791_v54 = vadd.f32 %v1789_v11, %v1779_v33  ;;  %v2928_v50 = vrot.slane %v4788_v29, 6  ;;  %v2940_v1 = vrot.slane %v4788_v29, 7  ;;  %v2917_v20 = vrot.slane %v4862_v44, 5 }
 0x35c   : > { %v1835_v10 = vsel %vm628_vm1, %v1832_v41, %v1834_v14  ;;  %v1836_v51 = vsel %vm628_vm1, %v1834_v14, %v1832_v41  ;;  %v1839_v28 = vadd.f32 %v1747_v30, %v1701_v19  ;;  %v2894_v41 = vrot.slane %v4788_v29, 3 }
 0x35d   : > { %2874 = vrot.lane.b32.xlu0 %v2870_v6, %s3906_s20  ;;  %v1837_v34 = vadd.f32 %v1835_v10, %v1825_v12  ;;  %v1838_v35 = vadd.f32 %v1836_v51, %v1826_v4  ;;  %2623 = vrot.lane.b32.xlu1 %v2618_v37, %s5906_s9  ;;  %v2871_v37 = vrot.slane %v4862_v44, 1  ;;  %v2929_v33 = vrot.slane %v4862_v44, 6 }
 0x35e   : > { %v2960_v46 = vrot.slane %v4910_v31, 1  ;;  %v2941_v14 = vrot.slane %v4862_v44, 7  ;;  %v2972_v19 = vrot.slane %v4910_v31, 2 }
 0x35f   : > { %v5290_v57 = vpop.permute.xlu0 %2096  ;;  %v1841_v39 = vadd.f32 %v1837_v34, %v1791_v54  ;;  %v1842_v15 = vadd.f32 %v1838_v35, %v1792_v25  ;;  %v5293_v56 = vpop.permute.xlu1 %2074  ;;  %v2984_v54 = vrot.slane %v4910_v31, 3  ;;  %v2961_v34 = vrot.slane %v4923_v5, 1 }
 0x361   : > { %2886 = vrot.lane.b32.xlu0 %v2882_v13, %s3905_s14  ;;  %v1843_v6 = vadd.f32 %v1841_v39, %v1839_v28  ;;  %v1844_v45 = vadd.f32 %v1842_v15, %v1840_v38  ;;  %2635 = vrot.lane.b32.xlu1 %v2630_v26, %s5902_s29  ;;  %v2996_v26 = vrot.slane %v4910_v31, 4  ;;  %v2973_v38 = vrot.slane %v4923_v5, 2 }
 0x362   : > { %v2076_v39 = vsel %vm454_vm0, %v5244_v7, %v5293_v56  ;;  %v2077_v15 = vsel %vm454_vm0, %v5293_v56, %v5244_v7  ;;  %v3007_v56 = vrot.slane %v4923_v5, 5 }
 0x363   : > { %v5299_v16 = vpop.permute.xlu0 %2108  ;;  %v1847_v53 = vcombine.low %v1843_v6, %v1844_v45  ;;  %v5301_v55 = vpop.permute.xlu1 %2086  ;;  %v3006_v6 = vrot.slane %v4910_v31, 5 }
 0x365   : > { %2898 = vrot.lane.b32.xlu0 %v2894_v41, %s3907_s22  ;;  %v1854_v47 = vrot.slane %v1847_v53, %v4650_v3  ;;  %2876 = vrot.lane.b32.xlu1 %v2871_v37, %s3906_s20  ;;  %v2985_v37 = vrot.slane %v4923_v5, 3  ;;  %v3018_v53 = vrot.slane %v4910_v31, 6 }
 0x367   : > { %v5306_v13 = vpop.permute.xlu0 %2118  ;;  %v1861_v8 = vrot.slane %v1854_v47, %v4650_v3  ;;  %v5310_v42 = vpop.permute.xlu1 %2098  ;;  %v2997_v47 = vrot.slane %v4923_v5, 4 }
 0x369   : > { %2910 = vrot.lane.b32.xlu0 %v2906_v17, %s3908_s8  ;;  %3616 = vst.msk [vmem:[%s4676_s6 + $0x3] ss:$8 sm:$0x3] %vm4664_vm2, %v1861_v8  ;;  %2888 = vrot.lane.b32.xlu1 %v2883_v59, %s3905_s14  ;;  %v3030_v17 = vrot.slane %v4910_v31, 7  ;;  %v3019_v59 = vrot.slane %v4923_v5, 6 }
 0x36b   : > { %v5318_v27 = vpop.permute.xlu0 %2130  ;;  %v5321_v9 = vpop.permute.xlu1 %2110 }
 0x36d   : > { %2920 = vrot.lane.b32.xlu0 %v2916_v61, %s3909_s26  ;;  %2900 = vrot.lane.b32.xlu1 %v2895_v63, %s3907_s22  ;;  %v2078_v61 = vadd.f32 %v2076_v39, %v4375_v48  ;;  %v2079_v63 = vadd.f32 %v2077_v15, %v4391_v2  ;;  %v2113_v48 = vsel %vm493_vm5, %v5321_v9, %v5299_v16 }
 0x36f   : > { %v5326_v24 = vpop.permute.xlu0 %2142  ;;  %v2121_v52 = vpop.permute.xlu1 %2120 }
 0x370   : > { %v2122_v8 = vsel %vm504_vm6, %v5306_v13, %v2121_v52  ;;  %v2123_v7 = vsel %vm504_vm6, %v2121_v52, %v5306_v13  ;;  %v2089_v13 = vsel %vm467_vm3, %v5301_v55, %v5280_v23 }
 0x371   : > { %2932 = vrot.lane.b32.xlu0 %v2928_v50, %s3910_s10  ;;  %2912 = vrot.lane.b32.xlu1 %v2907_v36, %s3908_s8  ;;  %v2112_v50 = vsel %vm493_vm5, %v5299_v16, %v5321_v9  ;;  %v2125_v36 = vadd.f32 %v2123_v7, %v2113_v48  ;;  %v2100_v16 = vsel %vm480_vm4, %v5290_v57, %v5310_v42 }
 0x372   : > { %v2124_v52 = vadd.f32 %v2122_v8, %v2112_v50 }
 0x373   : > { %v5332_v21 = vpop.permute.xlu0 %2150  ;;  %v2133_v30 = vpop.permute.xlu1 %2132 }
 0x374   : > { %v2134_v2 = vsel %vm517_vm7, %v5318_v27, %v2133_v30 }
 0x375   : > { %2944 = vrot.lane.b32.xlu0 %v2940_v1, %s3911_s11  ;;  %2922 = vrot.lane.b32.xlu1 %v2917_v20, %s3909_s26  ;;  %v3271_v20 = vrot.slane %v4987_v22, 1  ;;  %v2136_v9 = vadd.f32 %v2134_v2, %v2124_v52  ;;  %v3031_v52 = vrot.slane %v4923_v5, 7 }
 0x377   : > { %v5338_v11 = vpop.permute.xlu0 %2162  ;;  %v5340_v32 = vpop.permute.xlu1 %2144 }
 0x379   : > { %2952 = vrot.lane.b32.xlu0 %v4910_v31, %s3912_s12  ;;  %2934 = vrot.lane.b32.xlu1 %v2929_v33, %s3910_s10  ;;  %v2088_v31 = vsel %vm467_vm3, %v5280_v23, %v5301_v55  ;;  %v2135_v23 = vsel %vm517_vm7, %v2133_v30, %v5318_v27  ;;  %v3307_v33 = vrot.slane %v4987_v22, 4  ;;  %v2101_v27 = vsel %vm480_vm4, %v5310_v42, %v5290_v57 }
 0x37a   : > { %v2137_v30 = vadd.f32 %v2135_v23, %v2125_v36 }
 0x37b   : > { %v5347_v12 = vpop.permute.xlu0 %2174  ;;  %v5349_v4 = vpop.permute.xlu1 %2152 }
 0x37d   : > { %2964 = vrot.lane.b32.xlu0 %v2960_v46, %s3913_s23  ;;  %2946 = vrot.lane.b32.xlu1 %v2941_v14, %s3911_s11  ;;  %v2090_v46 = vadd.f32 %v2088_v31, %v2078_v61  ;;  %v2091_v14 = vadd.f32 %v2089_v13, %v2079_v63 }
 0x37f   : > { %v5355_v18 = vpop.permute.xlu0 %2186  ;;  %v2165_v10 = vpop.permute.xlu1 %2164  ;;  %v2103_v31 = vadd.f32 %v2101_v27, %v2091_v14 }
 0x380   : > { %v2166_v57 = vsel %vm552_vm10, %v5338_v11, %v2165_v10  ;;  %v2167_v42 = vsel %vm552_vm10, %v2165_v10, %v5338_v11 }
 0x381   : > { %2976 = vrot.lane.b32.xlu0 %v2972_v19, %s3914_s25  ;;  %2954 = vrot.lane.b32.xlu1 %v4923_v5, %s3912_s12  ;;  %v2146_v19 = vsel %vm530_vm8, %v5326_v24, %v5340_v32 }
 0x383   : > { %v5360_v51 = vpop.permute.xlu0 %2198  ;;  %v2177_v25 = vpop.permute.xlu1 %2176 }
 0x384   : > { %v2178_v11 = vsel %vm565_vm11, %v5347_v12, %v2177_v25  ;;  %v2179_v10 = vsel %vm565_vm11, %v2177_v25, %v5347_v12 }
 0x385   : > { %2988 = vrot.lane.b32.xlu0 %v2984_v54, %s5903_s7  ;;  %2966 = vrot.lane.b32.xlu1 %v2961_v34, %s3913_s23  ;;  %v2147_v54 = vsel %vm530_vm8, %v5340_v32, %v5326_v24  ;;  %v2154_v24 = vsel %vm539_vm9, %v5332_v21, %v5349_v4  ;;  %v2155_v32 = vsel %vm539_vm9, %v5349_v4, %v5332_v21 }
 0x387   : > { %v2209_v35 = vpop.permute.xlu0 %2208  ;;  %v5367_v28 = vpop.permute.xlu1 %2188 }
 0x389   : > { %3000 = vrot.lane.b32.xlu0 %v2996_v26, %s3916_s30  ;;  %2978 = vrot.lane.b32.xlu1 %v2973_v38, %s3914_s25 }
 0x38b   : > { %v2221_v41 = vpop.permute.xlu0 %2220  ;;  %v2201_v45 = vpop.permute.xlu1 %2200 }
 0x38c   : > { %v2202_v39 = vsel %vm591_vm13, %v5360_v51, %v2201_v45  ;;  %v2203_v15 = vsel %vm591_vm13, %v2201_v45, %v5360_v51  ;;  %v2190_v51 = vsel %vm578_vm12, %v5355_v18, %v5367_v28 }
 0x38d   : > { %3010 = vrot.lane.b32.xlu0 %v3006_v6, %s3917_s5  ;;  %2990 = vrot.lane.b32.xlu1 %v2985_v37, %s5903_s7  ;;  %v2168_v6 = vadd.f32 %v2166_v57, %v2154_v24  ;;  %v2169_v37 = vadd.f32 %v2167_v42, %v2155_v32  ;;  %v3329_v24 = vrot.slane %v4987_v22, 6 }
 0x38f   : > { %v2233_v55 = vpop.permute.xlu0 %2232  ;;  %v2211_v1 = vpop.permute.xlu1 %2210  ;;  %v2181_v8 = vadd.f32 %v2179_v10, %v2169_v37  ;;  %v3330_v37 = vrot.slane %v5071_v58, 6 }
 0x390   : > { %v2212_v34 = vsel %vm602_vm14, %v2209_v35, %v2211_v1  ;;  %v2213_v26 = vsel %vm602_vm14, %v2211_v1, %v2209_v35 }
 0x391   : > { %3022 = vrot.lane.b32.xlu0 %v3018_v53, %s5906_s9  ;;  %3002 = vrot.lane.b32.xlu1 %v2997_v47, %s3916_s30  ;;  %v2214_v12 = vadd.f32 %v2212_v34, %v2202_v39  ;;  %v2215_v25 = vadd.f32 %v2213_v26, %v2203_v15  ;;  %v2148_v53 = vadd.f32 %v2146_v19, %v2136_v9  ;;  %v3308_v34 = vrot.slane %v5071_v58, 4 }
 0x392   : > { %v2149_v47 = vadd.f32 %v2147_v54, %v2137_v30  ;;  %v3283_v54 = vrot.slane %v4987_v22, 2  ;;  %v3284_v15 = vrot.slane %v5071_v58, 2 }
 0x393   : > { %v5449_v38 = vpop.permute.xlu0 %2473  ;;  %v2223_v35 = vpop.permute.xlu1 %2222 }
 0x394   : > { %v2224_v21 = vsel %vm615_vm15, %v2221_v41, %v2223_v35  ;;  %v2225_v4 = vsel %vm615_vm15, %v2223_v35, %v2221_v41  ;;  %v2191_v41 = vsel %vm578_vm12, %v5367_v28, %v5355_v18  ;;  %v2241_v1 = vadd.f32 %v2149_v47, %v2103_v31 }
 0x395   : > { %3034 = vrot.lane.b32.xlu0 %v3030_v17, %s5902_s29  ;;  %3012 = vrot.lane.b32.xlu1 %v3007_v56, %s3917_s5  ;;  %v2180_v17 = vadd.f32 %v2178_v11, %v2168_v6  ;;  %v2226_v7 = vadd.f32 %v2224_v21, %v2214_v12  ;;  %v2227_v61 = vadd.f32 %v2225_v4, %v2215_v25  ;;  %v3318_v11 = vrot.slane %v5071_v58, 5 }
 0x396   : > { %v2102_v56 = vadd.f32 %v2100_v16, %v2090_v46  ;;  %v2193_v2 = vadd.f32 %v2191_v41, %v2181_v8  ;;  %v3295_v35 = vrot.slane %v4987_v22, 3  ;;  %v3341_v4 = vrot.slane %v4987_v22, 7 }
 0x397   : > { %v5485_v45 = vpop.permute.xlu0 %2485  ;;  %v2235_v63 = vpop.permute.xlu1 %2234  ;;  %v2192_v48 = vadd.f32 %v2190_v51, %v2180_v17  ;;  %v3361_v47 = vrot.slane %v5123_v49, 1  ;;  %v3342_v17 = vrot.slane %v5071_v58, 7  ;;  %v3397_v8 = vrot.slane %v5123_v49, 4 }
 0x398   : > { %v2236_v13 = vsel %vm628_vm1, %v2233_v55, %v2235_v63  ;;  %v2237_v50 = vsel %vm628_vm1, %v2235_v63, %v2233_v55  ;;  %v2240_v36 = vadd.f32 %v2148_v53, %v2102_v56  ;;  %v3317_v55 = vrot.slane %v4987_v22, 5 }
 0x399   : > { %3275 = vrot.lane.b32.xlu0 %v3271_v20, %s3906_s20  ;;  %v2238_v18 = vadd.f32 %v2236_v13, %v2226_v7  ;;  %v2239_v28 = vadd.f32 %v2237_v50, %v2227_v61  ;;  %3024 = vrot.lane.b32.xlu1 %v3019_v59, %s5906_s9  ;;  %v3272_v59 = vrot.slane %v5071_v58, 1  ;;  %v3296_v53 = vrot.slane %v5071_v58, 3 }
 0x39a   : > { %v3407_v56 = vrot.slane %v5123_v49, 5  ;;  %v3362_v13 = vrot.slane %v5133_v62, 1 }
 0x39b   : > { %v5495_v23 = vpop.permute.xlu0 %2497  ;;  %v2242_v46 = vadd.f32 %v2238_v18, %v2192_v48  ;;  %v2243_v14 = vadd.f32 %v2239_v28, %v2193_v2  ;;  %v5498_v16 = vpop.permute.xlu1 %2475  ;;  %v3373_v48 = vrot.slane %v5123_v49, 2  ;;  %v3398_v18 = vrot.slane %v5133_v62, 4 }
 0x39c   : > { %v2477_v28 = vsel %vm454_vm0, %v5449_v38, %v5498_v16 }
 0x39d   : > { %3311 = vrot.lane.b32.xlu0 %v3307_v33, %s3908_s8  ;;  %v2244_v20 = vadd.f32 %v2242_v46, %v2240_v36  ;;  %v2245_v27 = vadd.f32 %v2243_v14, %v2241_v1  ;;  %3036 = vrot.lane.b32.xlu1 %v3031_v52, %s5902_s29  ;;  %v2478_v52 = vsel %vm454_vm0, %v5498_v16, %v5449_v38  ;;  %v3419_v1 = vrot.slane %v5123_v49, 6 }
 0x39e   : > { %v3408_v14 = vrot.slane %v5133_v62, 5  ;;  %v3374_v38 = vrot.slane %v5133_v62, 2  ;;  %v3431_v16 = vrot.slane %v5123_v49, 7 }
 0x39f   : > { %v5504_v9 = vpop.permute.xlu0 %2509  ;;  %v2248_v5 = vcombine.low %v2244_v20, %v2245_v27  ;;  %v5506_v30 = vpop.permute.xlu1 %2487 }
 0x3a1   : > { %3321 = vrot.lane.b32.xlu0 %v3317_v55, %s3909_s26  ;;  %v2255_v19 = vrot.slane %v2248_v5, %v4650_v3  ;;  %3277 = vrot.lane.b32.xlu1 %v3272_v59, %s3906_s20  ;;  %v3385_v55 = vrot.slane %v5123_v49, 3  ;;  %v2479_v59 = vadd.f32 %v2477_v28, %v4559_v0  ;;  %v2480_v5 = vadd.f32 %v2478_v52, %v4637_v40  ;;  %s3485_s20 = sshll.u32 %s4676_s6, 4  ;;  %s5840_s20 = int_to_ptr.vmem [resolvable:$true] %s3485_s20 }
 0x3a3   : > { %v5511_v33 = vpop.permute.xlu0 %2519  ;;  %v2262_v57 = vrot.slane %v2255_v19, %v4650_v3  ;;  %v5515_v42 = vpop.permute.xlu1 %2499  ;;  %v2489_v19 = vsel %vm467_vm3, %v5485_v45, %v5506_v30 }
 0x3a5   : > { %3287 = vrot.lane.b32.xlu0 %v3283_v54, %s3905_s14  ;;  %3627 = vst.msk [vmem:[%s4676_s6 + $0x4] ss:$8 sm:$0x3] %vm4664_vm2, %v2262_v57  ;;  %3313 = vrot.lane.b32.xlu1 %v3308_v34, %s3908_s8 }
 0x3a7   : > { %v5523_v26 = vpop.permute.xlu0 %2531  ;;  %v5526_v32 = vpop.permute.xlu1 %2511 }
 0x3a8   : > { %v2514_v0 = vsel %vm493_vm5, %v5526_v32, %v5504_v9 }
 0x3a9   : > { %3333 = vrot.lane.b32.xlu0 %v3329_v24, %s3910_s10  ;;  %3323 = vrot.lane.b32.xlu1 %v3318_v11, %s3909_s26  ;;  %v3420_v24 = vrot.slane %v5133_v62, 6  ;;  %v3386_v11 = vrot.slane %v5133_v62, 3 }
 0x3ab   : > { %v5531_v10 = vpop.permute.xlu0 %2543  ;;  %v2522_v39 = vpop.permute.xlu1 %2521 }
 0x3ac   : > { %v2523_v20 = vsel %vm504_vm6, %v5511_v33, %v2522_v39  ;;  %v2524_v27 = vsel %vm504_vm6, %v2522_v39, %v5511_v33  ;;  %v2490_v33 = vsel %vm467_vm3, %v5506_v30, %v5485_v45 }
 0x3ad   : > { %3299 = vrot.lane.b32.xlu0 %v3295_v35, %s3907_s22  ;;  %3289 = vrot.lane.b32.xlu1 %v3284_v15, %s3905_s14  ;;  %v2526_v57 = vadd.f32 %v2524_v27, %v2514_v0  ;;  %v2491_v35 = vadd.f32 %v2489_v19, %v2479_v59  ;;  %v2492_v39 = vadd.f32 %v2490_v33, %v2480_v5  ;;  %s3669_s14 = sshll.u32 %s3968_s19, 8  ;;  %s3832_s19 = scalar_lea.vmem %s5840_s20, 256 }
 0x3ae   : > { %s5838_s26 = scalar_lea.hbm %s5889_s4, %s3669_s14  ;;  %p3833_p11 = scmp.ne.s32.totalorder %s5840_s20, %s3832_s19 }
 0x3af   : > { %v5537_v21 = vpop.permute.xlu0 %2551  ;;  %v2534_v6 = vpop.permute.xlu1 %2533 }
 0x3b0   : > { %v2535_v40 = vsel %vm517_vm7, %v5523_v26, %v2534_v6  ;;  %v2536_v45 = vsel %vm517_vm7, %v2534_v6, %v5523_v26  ;;  %v2502_v26 = vsel %vm480_vm4, %v5515_v42, %v5495_v23  ;;  %p3834_p13 = pnand %p3833_p11, %p5907_p12 }
 0x3b1   : > { %3345 = vrot.lane.b32.xlu0 %v3341_v4, %s3911_s11  ;;  %3335 = vrot.lane.b32.xlu1 %v3330_v37, %s3910_s10  ;;  %v2538_v15 = vadd.f32 %v2536_v45, %v2526_v57  ;;  %v2504_v27 = vadd.f32 %v2502_v26, %v2492_v39  ;;  %s3471_s10 = scalar_lea.sflag [#allocation4], %s4051_s13 }
 0x3b2   : > { %p3835_p8 = pneg %p3834_p13 }
 0x3b3   : > { %v5543_v12 = vpop.permute.xlu0 %2563  ;;  %v5545_v25 = vpop.permute.xlu1 %2545 }
 0x3b4   : > { %v2547_v4 = vsel %vm530_vm8, %v5531_v10, %v5545_v25  ;;  %v2548_v6 = vsel %vm530_vm8, %v5545_v25, %v5531_v10 }
 0x3b5   : > { %3353 = vrot.lane.b32.xlu0 %v5123_v49, %s3912_s12  ;;  %3301 = vrot.lane.b32.xlu1 %v3296_v53, %s3907_s22  ;;  %v2513_v49 = vsel %vm493_vm5, %v5504_v9, %v5526_v32  ;;  %v2501_v9 = vsel %vm480_vm4, %v5495_v23, %v5515_v42 }
 0x3b6   : > { %v2525_v54 = vadd.f32 %v2523_v20, %v2513_v49  ;;  %v2503_v20 = vadd.f32 %v2501_v9, %v2491_v35 }
 0x3b7   : > { %v5552_v51 = vpop.permute.xlu0 %2575  ;;  %v5554_v41 = vpop.permute.xlu1 %2553 }
 0x3b8   : > { %v2537_v32 = vadd.f32 %v2535_v40, %v2525_v54  ;;  %v2555_v10 = vsel %vm539_vm9, %v5537_v21, %v5554_v41  ;;  %v2556_v25 = vsel %vm539_vm9, %v5554_v41, %v5537_v21 }
 0x3b9   : > { %3365 = vrot.lane.b32.xlu0 %v3361_v47, %s3913_s23  ;;  %3347 = vrot.lane.b32.xlu1 %v3342_v17, %s3911_s11  ;;  %s3921_s11 = smov [#allocation5]  }
 0x3bb   : > { %v5560_v7 = vpop.permute.xlu0 %2587  ;;  %v2566_v61 = vpop.permute.xlu1 %2565 }
 0x3bc   : > { %v2567_v23 = vsel %vm552_vm10, %v5543_v12, %v2566_v61  ;;  %v2568_v42 = vsel %vm552_vm10, %v2566_v61, %v5543_v12 }
 0x3bd   : > { %3401 = vrot.lane.b32.xlu0 %v3397_v8, %s3916_s30  ;;  %3355 = vrot.lane.b32.xlu1 %v5133_v62, %s3912_s12  ;;  %v2569_v41 = vadd.f32 %v2567_v23, %v2555_v10  ;;  %s3836_s12 = sshll.u32 %s3921_s11, 4  ;;  %s3837_s12 = int_to_ptr.vmem [resolvable:$false] %s3836_s12 }
 0x3be   : > { %p3839_p10 = scmp.lt.s32.totalorder %s5840_s20, %s3837_s12 }
 0x3bf   : > { %v2600_v63 = vpop.permute.xlu0 %2599  ;;  %v2578_v31 = vpop.permute.xlu1 %2577 }
 0x3c0   : > { %v2579_v12 = vsel %vm565_vm11, %v5552_v51, %v2578_v31  ;;  %v2580_v17 = vsel %vm565_vm11, %v2578_v31, %v5552_v51  ;;  %v2549_v51 = vadd.f32 %v2547_v4, %v2537_v32  ;;  %v2550_v31 = vadd.f32 %v2548_v6, %v2538_v15 }
 0x3c1   : > { %3411 = vrot.lane.b32.xlu0 %v3407_v56, %s3917_s5  ;;  %3367 = vrot.lane.b32.xlu1 %v3362_v13, %s3913_s23  ;;  %s3838_s23 = scalar_lea.vmem %s3837_s12, 512 }
 0x3c2   : > { %v2641_v49 = vadd.f32 %v2549_v51, %v2503_v20  ;;  %v2642_v0 = vadd.f32 %v2550_v31, %v2504_v27  ;;  %p3840_p0 = scmp.lt.s32.totalorder %s3838_s23, %s3832_s19 }
 0x3c3   : > { %v2610_v50 = vpop.permute.xlu0 %2609  ;;  %v5570_v2 = vpop.permute.xlu1 %2589 }
 0x3c4   : > { %v2592_v28 = vsel %vm578_vm12, %v5570_v2, %v5560_v7  ;;  %p3841_p2 = por %p3840_p0, %p3839_p10 }
 0x3c5   : > { %3377 = vrot.lane.b32.xlu0 %v3373_v48, %s3914_s25  ;;  %3403 = vrot.lane.b32.xlu1 %v3398_v18, %s3916_s30 }
 0x3c6   : > { %p3842_p4 = pnand %p3841_p2, %p3835_p8 }
 0x3c7   : > { %v2622_v36 = vpop.permute.xlu0 %2621  ;;  %v2602_v46 = vpop.permute.xlu1 %2601 }
 0x3c8   : > { %v2603_v61 = vsel %vm591_vm13, %v2600_v63, %v2602_v46  ;;  %v2604_v56 = vsel %vm591_vm13, %v2602_v46, %v2600_v63  ;;  %v2591_v63 = vsel %vm578_vm12, %v5560_v7, %v5570_v2  ;;  %v3432_v2 = vrot.slane %v5133_v62, 7 }
 0x3c9   : > { %3423 = vrot.lane.b32.xlu0 %v3419_v1, %s5906_s9  ;;  %3413 = vrot.lane.b32.xlu1 %v3408_v14, %s3917_s5 }
 0x3cb   : > { %v2634_v30 = vpop.permute.xlu0 %2633  ;;  %v2612_v34 = vpop.permute.xlu1 %2611 }
 0x3cc   : > { %v2613_v37 = vsel %vm602_vm14, %v2610_v50, %v2612_v34  ;;  %v2614_v53 = vsel %vm602_vm14, %v2612_v34, %v2610_v50  ;;  %v2570_v50 = vadd.f32 %v2568_v42, %v2556_v25 }
 0x3cd   : > { %3389 = vrot.lane.b32.xlu0 %v3385_v55, %s5903_s7  ;;  %3379 = vrot.lane.b32.xlu1 %v3374_v38, %s3914_s25  ;;  %v2615_v48 = vadd.f32 %v2613_v37, %v2603_v61  ;;  %v2616_v18 = vadd.f32 %v2614_v53, %v2604_v56 }
 0x3ce   : > { %v2582_v1 = vadd.f32 %v2580_v17, %v2570_v50 }
 0x3cf   : > { %v5650_v47 = vpop.permute.xlu0 %2874  ;;  %v2624_v8 = vpop.permute.xlu1 %2623 }
 0x3d0   : > { %v2625_v13 = vsel %vm615_vm15, %v2622_v36, %v2624_v8  ;;  %v2626_v21 = vsel %vm615_vm15, %v2624_v8, %v2622_v36  ;;  %v2581_v36 = vadd.f32 %v2579_v12, %v2569_v41  ;;  %v2594_v5 = vadd.f32 %v2592_v28, %v2582_v1 }
 0x3d1   : > { %3435 = vrot.lane.b32.xlu0 %v3431_v16, %s5902_s29  ;;  %3425 = vrot.lane.b32.xlu1 %v3420_v24, %s5906_s9  ;;  %v2627_v46 = vadd.f32 %v2625_v13, %v2615_v48  ;;  %v2628_v14 = vadd.f32 %v2626_v21, %v2616_v18 }
 0x3d2   : > { %v2593_v59 = vadd.f32 %v2591_v63, %v2581_v36 }
 0x3d3   : > { %v2887_v52 = vpop.permute.xlu0 %2886  ;;  %v2636_v55 = vpop.permute.xlu1 %2635 }
 0x3d4   : > { %v2637_v38 = vsel %vm628_vm1, %v2634_v30, %v2636_v55  ;;  %v2638_v16 = vsel %vm628_vm1, %v2636_v55, %v2634_v30 }
 0x3d5   : > { %v2639_v19 = vadd.f32 %v2637_v38, %v2627_v46  ;;  %v2640_v33 = vadd.f32 %v2638_v16, %v2628_v14  ;;  %3391 = vrot.lane.b32.xlu1 %v3386_v11, %s5903_s7 }
 0x3d7   : > { %v2899_v7 = vpop.permute.xlu0 %2898  ;;  %v2643_v40 = vadd.f32 %v2639_v19, %v2593_v59  ;;  %v2644_v45 = vadd.f32 %v2640_v33, %v2594_v5  ;;  %v2877_v54 = vpop.permute.xlu1 %2876 }
 0x3d8   : > { %v2878_v13 = vsel %vm454_vm0, %v5650_v47, %v2877_v54  ;;  %v2879_v21 = vsel %vm454_vm0, %v2877_v54, %v5650_v47 }
 0x3d9   : > { %v2645_v57 = vadd.f32 %v2643_v40, %v2641_v49  ;;  %v2646_v34 = vadd.f32 %v2644_v45, %v2642_v0  ;;  %3437 = vrot.lane.b32.xlu1 %v3432_v2, %s5902_s29  ;;  %v2880_v51 = vadd.f32 %v2878_v13, %v4788_v29  ;;  %v2881_v31 = vadd.f32 %v2879_v21, %v4862_v44 }
 0x3db   : > { %v2911_v30 = vpop.permute.xlu0 %2910  ;;  %v2649_v24 = vcombine.low %v2645_v57, %v2646_v34  ;;  %v2889_v35 = vpop.permute.xlu1 %2888 }
 0x3dc   : > { %v2890_v63 = vsel %vm467_vm3, %v2887_v52, %v2889_v35  ;;  %v2891_v28 = vsel %vm467_vm3, %v2889_v35, %v2887_v52 }
 0x3dd   : > { %v2656_v39 = vrot.slane %v2649_v24, %v4650_v3  ;;  %v2892_v20 = vadd.f32 %v2890_v63, %v2880_v51  ;;  %v2893_v27 = vadd.f32 %v2891_v28, %v2881_v31 }
 0x3df   : > { %v2921_v9 = vpop.permute.xlu0 %2920  ;;  %v2663_v11 = vrot.slane %v2656_v39, %v4650_v3  ;;  %v2901_v26 = vpop.permute.xlu1 %2900 }
 0x3e0   : > { %v2902_v52 = vsel %vm480_vm4, %v2899_v7, %v2901_v26  ;;  %v2903_v38 = vsel %vm480_vm4, %v2901_v26, %v2899_v7 }
 0x3e1   : > { %3638 = vst.msk [vmem:[%s4676_s6 + $0x5] ss:$8 sm:$0x3] %vm4664_vm2, %v2663_v11 }
 0x3e3   : > { %v2933_v62 = vpop.permute.xlu0 %2932  ;;  %v2913_v32 = vpop.permute.xlu1 %2912 }
 0x3e4   : > { %v2914_v47 = vsel %vm493_vm5, %v2911_v30, %v2913_v32  ;;  %v2915_v36 = vsel %vm493_vm5, %v2913_v32, %v2911_v30 }
 0x3e7   : > { %v2945_v15 = vpop.permute.xlu0 %2944  ;;  %v2923_v4 = vpop.permute.xlu1 %2922 }
 0x3e8   : > { %v2924_v48 = vsel %vm504_vm6, %v2921_v9, %v2923_v4  ;;  %v2925_v18 = vsel %vm504_vm6, %v2923_v4, %v2921_v9 }
 0x3e9   : > { %v2926_v44 = vadd.f32 %v2924_v48, %v2914_v47  ;;  %v2927_v14 = vadd.f32 %v2925_v18, %v2915_v36 }
 0x3eb   : > { %v2953_v6 = vpop.permute.xlu0 %2952  ;;  %v2935_v23 = vpop.permute.xlu1 %2934 }
 0x3ec   : > { %v2936_v1 = vsel %vm517_vm7, %v2933_v62, %v2935_v23  ;;  %v2937_v29 = vsel %vm517_vm7, %v2935_v23, %v2933_v62 }
 0x3ed   : > { %v2938_v16 = vadd.f32 %v2936_v1, %v2926_v44  ;;  %v2939_v59 = vadd.f32 %v2937_v29, %v2927_v14 }
 0x3ef   : > { %v2965_v42 = vpop.permute.xlu0 %2964  ;;  %v2947_v37 = vpop.permute.xlu1 %2946 }
 0x3f0   : > { %v2948_v5 = vsel %vm530_vm8, %v2945_v15, %v2947_v37  ;;  %v2949_v19 = vsel %vm530_vm8, %v2947_v37, %v2945_v15 }
 0x3f1   : > { %v2950_v32 = vadd.f32 %v2948_v5, %v2938_v16  ;;  %v2951_v15 = vadd.f32 %v2949_v19, %v2939_v59 }
 0x3f3   : > { %v2977_v53 = vpop.permute.xlu0 %2976  ;;  %v2955_v10 = vpop.permute.xlu1 %2954 }
 0x3f4   : > { %v2956_v40 = vsel %vm539_vm9, %v2953_v6, %v2955_v10  ;;  %v2957_v45 = vsel %vm539_vm9, %v2955_v10, %v2953_v6 }
 0x3f7   : > { %v2989_v25 = vpop.permute.xlu0 %2988  ;;  %v2967_v12 = vpop.permute.xlu1 %2966 }
 0x3f8   : > { %v2968_v33 = vsel %vm552_vm10, %v2965_v42, %v2967_v12  ;;  %v2969_v2 = vsel %vm552_vm10, %v2967_v12, %v2965_v42 }
 0x3f9   : > { %v2970_v9 = vadd.f32 %v2968_v33, %v2956_v40  ;;  %v2971_v11 = vadd.f32 %v2969_v2, %v2957_v45 }
 0x3fb   : > { %v3001_v17 = vpop.permute.xlu0 %3000  ;;  %v2979_v8 = vpop.permute.xlu1 %2978 }
 0x3fc   : > { %v2980_v54 = vsel %vm565_vm11, %v2977_v53, %v2979_v8  ;;  %v2981_v57 = vsel %vm565_vm11, %v2979_v8, %v2977_v53  ;;  %v2905_v8 = vadd.f32 %v2903_v38, %v2893_v27 }
 0x3fd   : > { %v2982_v42 = vadd.f32 %v2980_v54, %v2970_v9  ;;  %v2983_v37 = vadd.f32 %v2981_v57, %v2971_v11 }
 0x3fe   : > { %v3043_v18 = vadd.f32 %v2951_v15, %v2905_v8 }
 0x3ff   : > { %v3011_v61 = vpop.permute.xlu0 %3010  ;;  %v2991_v56 = vpop.permute.xlu1 %2990 }
 0x400   : > { %v2992_v4 = vsel %vm578_vm12, %v2989_v25, %v2991_v56  ;;  %v2993_v6 = vsel %vm578_vm12, %v2991_v56, %v2989_v25 }
 0x401   : > { %v2994_v21 = vadd.f32 %v2992_v4, %v2982_v42 }
 0x403   : > { %v3023_v41 = vpop.permute.xlu0 %3022  ;;  %v3003_v50 = vpop.permute.xlu1 %3002 }
 0x404   : > { %v3004_v30 = vsel %vm591_vm13, %v3001_v17, %v3003_v50  ;;  %v3005_v24 = vsel %vm591_vm13, %v3003_v50, %v3001_v17  ;;  %v2904_v17 = vadd.f32 %v2902_v52, %v2892_v20 }
 0x406   : > { %v3042_v56 = vadd.f32 %v2950_v32, %v2904_v17 }
 0x407   : > { %v3035_v46 = vpop.permute.xlu0 %3034  ;;  %v3013_v55 = vpop.permute.xlu1 %3012 }
 0x408   : > { %v3014_v49 = vsel %vm602_vm14, %v3011_v61, %v3013_v55  ;;  %v3015_v7 = vsel %vm602_vm14, %v3013_v55, %v3011_v61 }
 0x409   : > { %v3016_v26 = vadd.f32 %v3014_v49, %v3004_v30  ;;  %v3017_v62 = vadd.f32 %v3015_v7, %v3005_v24 }
 0x40b   : > { %v5736_v0 = vpop.permute.xlu0 %3275  ;;  %v3025_v34 = vpop.permute.xlu1 %3024 }
 0x40c   : > { %v3026_v35 = vsel %vm615_vm15, %v3023_v41, %v3025_v34  ;;  %v3027_v39 = vsel %vm615_vm15, %v3025_v34, %v3023_v41  ;;  %v2995_v41 = vadd.f32 %v2993_v6, %v2983_v37 }
 0x40d   : > { %v3028_v53 = vadd.f32 %v3026_v35, %v3016_v26  ;;  %v3029_v10 = vadd.f32 %v3027_v39, %v3017_v62 }
 0x40f   : > { %v3312_v23 = vpop.permute.xlu0 %3311  ;;  %v3037_v12 = vpop.permute.xlu1 %3036 }
 0x410   : > { %v3038_v61 = vsel %vm628_vm1, %v3035_v46, %v3037_v12  ;;  %v3039_v13 = vsel %vm628_vm1, %v3037_v12, %v3035_v46 }
 0x411   : > { %v3040_v50 = vadd.f32 %v3038_v61, %v3028_v53  ;;  %v3041_v48 = vadd.f32 %v3039_v13, %v3029_v10 }
 0x413   : > { %v3322_v25 = vpop.permute.xlu0 %3321  ;;  %v3044_v51 = vadd.f32 %v3040_v50, %v2994_v21  ;;  %v3045_v31 = vadd.f32 %v3041_v48, %v2995_v41  ;;  %v3278_v63 = vpop.permute.xlu1 %3277 }
 0x414   : > { %v3279_v57 = vsel %vm454_vm0, %v5736_v0, %v3278_v63  ;;  %v3280_v34 = vsel %vm454_vm0, %v3278_v63, %v5736_v0 }
 0x415   : > { %v3046_v28 = vadd.f32 %v3044_v51, %v3042_v56  ;;  %v3047_v47 = vadd.f32 %v3045_v31, %v3043_v18  ;;  %v3281_v15 = vadd.f32 %v3279_v57, %v4987_v22  ;;  %v3282_v4 = vadd.f32 %v3280_v34, %v5071_v58 }
 0x417   : > { %v3288_v36 = vpop.permute.xlu0 %3287  ;;  %v3050_v1 = vcombine.low %v3046_v28, %v3047_v47  ;;  %v3314_v29 = vpop.permute.xlu1 %3313 }
 0x418   : > { %v3315_v9 = vsel %vm493_vm5, %v3312_v23, %v3314_v29  ;;  %v3316_v11 = vsel %vm493_vm5, %v3314_v29, %v3312_v23 }
 0x419   : > { %v3057_v44 = vrot.slane %v3050_v1, %v4650_v3 }
 0x41b   : > { %v3334_v14 = vpop.permute.xlu0 %3333  ;;  %v3064_v46 = vrot.slane %v3057_v44, %v4650_v3  ;;  %v3324_v55 = vpop.permute.xlu1 %3323 }
 0x41c   : > { %v3325_v30 = vsel %vm504_vm6, %v3322_v25, %v3324_v55  ;;  %v3326_v24 = vsel %vm504_vm6, %v3324_v55, %v3322_v25 }
 0x41d   : > { %3649 = vst.msk [vmem:[%s4676_s6 + $0x6] ss:$8 sm:$0x3] %vm4664_vm2, %v3064_v46  ;;  %v3327_v6 = vadd.f32 %v3325_v30, %v3315_v9  ;;  %v3328_v42 = vadd.f32 %v3326_v24, %v3316_v11 }
 0x41f   : > { %v3300_v20 = vpop.permute.xlu0 %3299  ;;  %v3290_v27 = vpop.permute.xlu1 %3289 }
 0x420   : > { %v3291_v26 = vsel %vm467_vm3, %v3288_v36, %v3290_v27  ;;  %v3292_v0 = vsel %vm467_vm3, %v3290_v27, %v3288_v36 }
 0x421   : > { %v3293_v23 = vadd.f32 %v3291_v26, %v3281_v15  ;;  %v3294_v53 = vadd.f32 %v3292_v0, %v3282_v4 }
 0x423   : > { %v3346_v52 = vpop.permute.xlu0 %3345  ;;  %v3336_v38 = vpop.permute.xlu1 %3335 }
 0x424   : > { %v3337_v62 = vsel %vm517_vm7, %v3334_v14, %v3336_v38  ;;  %v3338_v32 = vsel %vm517_vm7, %v3336_v38, %v3334_v14 }
 0x425   : > { %v3339_v10 = vadd.f32 %v3337_v62, %v3327_v6  ;;  %v3340_v12 = vadd.f32 %v3338_v32, %v3328_v42 }
 0x427   : > { %v3354_v16 = vpop.permute.xlu0 %3353  ;;  %v3302_v59 = vpop.permute.xlu1 %3301 }
 0x428   : > { %v3303_v17 = vsel %vm480_vm4, %v3300_v20, %v3302_v59  ;;  %v3304_v8 = vsel %vm480_vm4, %v3302_v59, %v3300_v20 }
 0x42b   : > { %v3366_v5 = vpop.permute.xlu0 %3365  ;;  %v3348_v19 = vpop.permute.xlu1 %3347 }
 0x42c   : > { %v3349_v61 = vsel %vm530_vm8, %v3346_v52, %v3348_v19  ;;  %v3350_v22 = vsel %vm530_vm8, %v3348_v19, %v3346_v52  ;;  %v3305_v19 = vadd.f32 %v3303_v17, %v3293_v23 }
 0x42d   : > { %v3351_v14 = vadd.f32 %v3349_v61, %v3339_v10  ;;  %v3352_v46 = vadd.f32 %v3350_v22, %v3340_v12 }
 0x42f   : > { %v3402_v33 = vpop.permute.xlu0 %3401  ;;  %v3356_v2 = vpop.permute.xlu1 %3355  ;;  %v3443_v57 = vadd.f32 %v3351_v14, %v3305_v19 }
 0x430   : > { %v3357_v48 = vsel %vm539_vm9, %v3354_v16, %v3356_v2  ;;  %v3358_v25 = vsel %vm539_vm9, %v3356_v2, %v3354_v16 }
 0x433   : > { %v3412_v49 = vpop.permute.xlu0 %3411  ;;  %v3368_v7 = vpop.permute.xlu1 %3367 }
 0x434   : > { %v3369_v13 = vsel %vm552_vm10, %v3366_v5, %v3368_v7  ;;  %v3370_v21 = vsel %vm552_vm10, %v3368_v7, %v3366_v5 }
 0x435   : > { %v3371_v36 = vadd.f32 %v3369_v13, %v3357_v48  ;;  %v3372_v1 = vadd.f32 %v3370_v21, %v3358_v25 }
 0x437   : > { %v3404_v40 = vpop.permute.xlu1 %3403  ;;  %v3378_v45 = vpop.permute.xlu0 %3377 }
 0x438   : > { %v3405_v56 = vsel %vm591_vm13, %v3402_v33, %v3404_v40  ;;  %v3406_v18 = vsel %vm591_vm13, %v3404_v40, %v3402_v33  ;;  %v3306_v33 = vadd.f32 %v3304_v8, %v3294_v53 }
 0x43a   : > { %v3444_v34 = vadd.f32 %v3352_v46, %v3306_v33 }
 0x43b   : > { %v3414_v54 = vpop.permute.xlu1 %3413  ;;  %v3424_v35 = vpop.permute.xlu0 %3423 }
 0x43c   : > { %v3415_v41 = vsel %vm602_vm14, %v3412_v49, %v3414_v54  ;;  %v3416_v50 = vsel %vm602_vm14, %v3414_v54, %v3412_v49 }
 0x43d   : > { %v3417_v29 = vadd.f32 %v3415_v41, %v3405_v56  ;;  %v3418_v44 = vadd.f32 %v3416_v50, %v3406_v18 }
 0x43f   : > { %v3380_v39 = vpop.permute.xlu1 %3379  ;;  %v3390_v58 = vpop.permute.xlu0 %3389 }
 0x440   : > { %v3381_v31 = vsel %vm565_vm11, %v3378_v45, %v3380_v39  ;;  %v3382_v63 = vsel %vm565_vm11, %v3380_v39, %v3378_v45 }
 0x441   : > { %v3383_v27 = vadd.f32 %v3381_v31, %v3371_v36  ;;  %v3384_v52 = vadd.f32 %v3382_v63, %v3372_v1 }
 0x443   : > { %v3426_v37 = vpop.permute.xlu1 %3425  ;;  %v3436_v38 = vpop.permute.xlu0 %3435 }
 0x444   : > { %v3427_v28 = vsel %vm615_vm15, %v3424_v35, %v3426_v37  ;;  %v3428_v47 = vsel %vm615_vm15, %v3426_v37, %v3424_v35 }
 0x445   : > { %v3429_v16 = vadd.f32 %v3427_v28, %v3417_v29  ;;  %v3430_v59 = vadd.f32 %v3428_v47, %v3418_v44 }
 0x447   : > { %v3392_v51 = vpop.permute.xlu1 %3391 }
 0x448   : > { %v3393_v55 = vsel %vm578_vm12, %v3390_v58, %v3392_v51  ;;  %v3394_v20 = vsel %vm578_vm12, %v3392_v51, %v3390_v58 }
 0x449   : > { %v3395_v7 = vadd.f32 %v3393_v55, %v3383_v27  ;;  %v3396_v40 = vadd.f32 %v3394_v20, %v3384_v52 }
 0x44b   : > { %v3438_v5 = vpop.permute.xlu1 %3437 }
 0x44c   : > { %v3439_v2 = vsel %vm628_vm1, %v3436_v38, %v3438_v5  ;;  %v3440_v49 = vsel %vm628_vm1, %v3438_v5, %v3436_v38 }
 0x44d   : > { %v3441_v45 = vadd.f32 %v3439_v2, %v3429_v16  ;;  %v3442_v54 = vadd.f32 %v3440_v49, %v3430_v59 }
 0x44f   : > { %v3445_v30 = vadd.f32 %v3441_v45, %v3395_v7  ;;  %v3446_v24 = vadd.f32 %v3442_v54, %v3396_v40 }
 0x451   : > { %v3447_v35 = vadd.f32 %v3445_v30, %v3443_v57  ;;  %v3448_v39 = vadd.f32 %v3446_v24, %v3444_v34 }
 0x453   : > { %v3451_v9 = vcombine.low %v3447_v35, %v3448_v39 }
 0x455   : > { %v3458_v11 = vrot.slane %v3451_v9, %v4650_v3 }
 0x457   : > { %v3465_v43 = vrot.slane %v3458_v11, %v4650_v3 }
 0x459   : > { %3660 = vst.msk [vmem:[%s4676_s6 + $0x7] ss:$8 sm:$0x3] %vm4664_vm2, %v3465_v43 }
 0x45a   : > { %3845 = shalt.err (!%p3842_p4)
}
 0x45b   : > { %s3846_s13 = scalar_lea.hbm %s5838_s26, 256  ;;  %s3850_s30 = scalar_lea.hbm %s5889_s4, 512 }
 0x45c   : > { %p3847_p5 = scmp.ne.s32.totalorder %s5838_s26, %s3846_s13  ;;  %p3851_p1 = scmp.lt.u32.totalorder %s5838_s26, %s5889_s4 }
 0x45d   : > { %p3852_p3 = scmp.lt.u32.totalorder %s3850_s30, %s3846_s13  ;;  %p3854_p11 = scmp.lt.u32.totalorder %s3846_s13, %s5838_s26 }
 0x45e   : > { %p3848_p7 = pnand %p3847_p5, %p5907_p12 }
 0x45f   : > { %p3853_p6 = por %p3852_p3, %p3851_p1 }
 0x460   : > { %p3849_p9 = pneg %p3848_p7 }
 0x461   : > { %p3855_p13 = por %p3854_p11, %p3853_p6 }
 0x463   : > { %p3856_p8 = pnand %p3855_p13, %p3849_p9 }
 0x465   : > { %3859 = shalt.err (!%p3856_p8)
}
 0x466   : > { %3736 = dma.vmem_to_hbm [thread:$0]  (%p5907_p12), %s5840_s20, 256, %s5838_s26, %s3471_s10  }
 0x467 PF: > { %s3497_s7 = sand.u32 1, %s3886_s15   ;;  %p5908_p10 = scmp.ne.s32.totalorder %s5900_s28, 0 }
 0x468   : > { %p5909_p0 = scmp.ge.s32.totalorder %s3898_s18, 2  ;;  %s3498_s9 = scalar_lea.sflag [#allocation4], %s3497_s7 }
 0x46a   : > { %p3743_p2 = pnand %p5909_p0, %p5908_p10 }
 0x46c   : > { %3881 = dma.done.wait (!%p3743_p2), %s3498_s9, 256  }
 0x46d   : > { %3883 = vsyncadd (!%p3743_p2), %s3498_s9, 4294967040  ;;  %p17_p4 = scmp.ge.s32.totalorder %s3972_s21, 4   ;;  %s5910_s15 = smov %s3890_s16 }
 0x46e   : > { %s5911_s16 = smov %s3894_s17  ;;  %s5912_s17 = smov %s3984_s24 }
 0x46f   : > { %s5913_s18 = smov %s3972_s21  ;;  %19 = sbr.rel (!%p17_p4) target bundleno = 5 (0x5), region = 105 }
 0x476   :  { %3503 = vsyncpa [#allocation3], 1 }
 0x477   :  { %3505 = vsyncpa [#allocation3 + $0x1], 1 }
 0x478   :  { %3506 = vsyncpa [#allocation4], 1 }
 0x479   :  { %3508 = vsyncpa [#allocation4 + $0x1], 1 }

</bundles_post_ra>
